<compile_context>
chip_gen: v6e
topology: v6e:2x2x1
jax: 0.10.0
libtpu: 0.0.40
codegen_flags: <defaults>
</compile_context>

<pallas_src>
import functools

import jax
import jax.numpy as jnp
from jax.experimental import pallas as pl
from jax.experimental.pallas import tpu as pltpu

DIMS = [3 * 32 * 32, 256, 500, 500, 256, 256, 128, 10]       # true layer widths
PAD_DIMS = [3 * 32 * 32, 256, 512, 512, 256, 256, 128, 128]  # lane-dense widths
# ReLU after layer1, layer3, layer4, layer5, layer6; none after layer2 or fc1
# (layer2 = Linear+Dropout only; fc1 = bare Linear) — matches the torch module.
RELU = [True, False, True, True, True, True, False]
N_LAYERS = len(DIMS) - 1

MAX_BATCH_TILE = 1024                 # do not exceed on v7x with f32 input
VMEM_LIMIT_BYTES = 56 * 1024 * 1024   # < v7x 64 MiB physical; ample on v5e/v6e


def _round_up(x, m):
    return ((x + m - 1) // m) * m


def _choose_tile(n, batch_tile):
    """Batch tile: big enough to amortize per-step overhead, but capped so the
    grid has >= 2 steps when N allows (v7x has 2 TCs) and zero-padding waste
    stays bounded (<= 2*15 rows)."""
    tile = max(16, min(int(batch_tile), MAX_BATCH_TILE))
    if n >= 32:
        tile = min(tile, _round_up((n + 1) // 2, 16))
    else:
        tile = min(tile, _round_up(max(n, 1), 16))
    return tile


def mlp_kernel(x_ref,
               w1, b1, w2, b2, w3, b3, w4, b4, w5, b5, w6, b6, w7, b7,
               o_ref):
    ws = (w1, w2, w3, w4, w5, w6, w7)
    bs = (b1, b2, b3, b4, b5, b6, b7)
    # In-kernel f32 -> bf16 cast: x arrives as f32, only one HBM pass over it.
    h = x_ref[...].astype(jnp.bfloat16)  # (tile, 3072)
    for i, (w, b) in enumerate(zip(ws, bs)):
        acc = jnp.dot(h, w[...], preferred_element_type=jnp.float32) + b[...]
        if RELU[i]:
            acc = jnp.maximum(acc, 0.0)
        # nn.Dropout(...) -> identity at inference time.
        h = acc.astype(jnp.bfloat16) if i + 1 < N_LAYERS else acc
    o_ref[...] = h.astype(o_ref.dtype)


@functools.partial(jax.jit, static_argnames=("batch_tile",))
def net_forward(x, kernel_params, batch_tile=MAX_BATCH_TILE):
    """x: (N, 3, 32, 32) float32.

    kernel_params: list of (W_t bf16 (in_pad, out_pad), bias f32 (1, out_pad)),
    i.e. the output of pad_params_for_kernel().
    """
    n = x.shape[0]
    x2 = x.reshape(n, -1)  # (N, 3072) f32, torch .view ordering; cast is in-kernel

    tile = _choose_tile(n, batch_tile)
    n_pad = _round_up(n, tile)
    if n_pad != n:
        x2 = jnp.pad(x2, ((0, n_pad - n), (0, 0)))

    in_specs = [pl.BlockSpec((tile, PAD_DIMS[0]), lambda i: (i, 0))]
    flat_params = []
    for (w, b) in kernel_params:
        # Grid-invariant index_map: fetched once, resident for all grid steps.
        # Single-buffered — a second buffer would never be used.
        in_specs.append(pl.BlockSpec(w.shape, lambda i: (0, 0),
                                     pipeline_mode=pl.Buffered(1)))
        in_specs.append(pl.BlockSpec(b.shape, lambda i: (0, 0),
                                     pipeline_mode=pl.Buffered(1)))
        flat_params.extend([w, b])

    flops = 2 * n_pad * sum(PAD_DIMS[i] * PAD_DIMS[i + 1] for i in range(N_LAYERS))
    bytes_accessed = (x2.size * 4
                      + sum(w.size * 2 + b.size * 4 for (w, b) in kernel_params)
                      + n_pad * PAD_DIMS[-1] * 4)

    out = pl.pallas_call(
        mlp_kernel,
        out_shape=jax.ShapeDtypeStruct((n_pad, PAD_DIMS[-1]), jnp.float32),
        grid_spec=pltpu.PrefetchScalarGridSpec(
            num_scalar_prefetch=0,
            grid=(n_pad // tile,),
            in_specs=in_specs,
            out_specs=pl.BlockSpec((tile, PAD_DIMS[-1]), lambda i: (i, 0)),
        ),
        compiler_params=pltpu.CompilerParams(
            dimension_semantics=("parallel",),  # v7x: 2 TCs shard the batch axis
            vmem_limit_bytes=VMEM_LIMIT_BYTES,
        ),
        cost_estimate=pl.CostEstimate(
            flops=flops, transcendentals=0, bytes_accessed=bytes_accessed),
    )(x2, *flat_params)

    # Drop batch padding and the padded output lanes (128 -> 10).
    return out[:n, :DIMS[-1]]


def init_params(key):
    """Deterministic PyTorch-style (Kaiming-uniform-ish) init at TRUE dims.

    Returns list of (W_transposed (in, out), bias (1, out)) in float32.
    """
    params = []
    for i in range(N_LAYERS):
        fan_in, fan_out = DIMS[i], DIMS[i + 1]
        key, kw, kb = jax.random.split(key, 3)
        bound = 1.0 / jnp.sqrt(fan_in)
        w = jax.random.uniform(kw, (fan_in, fan_out), jnp.float32, -bound, bound)
        b = jax.random.uniform(kb, (1, fan_out), jnp.float32, -bound, bound)
        params.append((w, b))
    return params


def pad_params_for_kernel(params):
    """Zero-pad params to lane-dense PAD_DIMS; weights -> bf16, biases stay f32.

    Zero rows/cols contribute nothing, so padded layers compute the same values
    in the first DIMS[i+1] output columns as the unpadded network.
    """
    padded = []
    for i, (w, b) in enumerate(params):
        din, dout = PAD_DIMS[i], PAD_DIMS[i + 1]
        wp = jnp.zeros((din, dout), jnp.float32).at[: w.shape[0], : w.shape[1]].set(w)
        bp = jnp.zeros((1, dout), jnp.float32).at[:, : b.shape[1]].set(b)
        padded.append((wp.astype(jnp.bfloat16), bp))
    return padded


def reference_forward(x, kernel_params):
    """Plain-JAX reference mirroring the kernel numerics (bf16 matmuls, f32 acc)."""
    h = x.reshape(x.shape[0], -1).astype(jnp.bfloat16)
    for i, (w, b) in enumerate(kernel_params):
        acc = jnp.dot(h, w, preferred_element_type=jnp.float32) + b
        if RELU[i]:
            acc = jnp.maximum(acc, 0.0)
        h = acc.astype(jnp.bfloat16) if i + 1 < N_LAYERS else acc
    return h[:, :DIMS[-1]]


if __name__ == "__main__":
    key = jax.random.PRNGKey(0)
    params = init_params(jax.random.PRNGKey(0))
    kparams = pad_params_for_kernel(params)

    # Case 1: small batch (single grid step).
    key, kx = jax.random.split(key)
    x = jax.random.normal(kx, (16, 3, 32, 32), jnp.float32)
    out = jax.block_until_ready(net_forward(x, kparams))
    ref = reference_forward(x, kparams)
    assert out.shape == (16, 10), out.shape
    assert jnp.allclose(out, ref, atol=1e-2, rtol=1e-2), "mismatch vs reference (n=16)"

    # Case 2: batch that exercises grid=2 + batch zero-padding + slice-back.
    key, kx = jax.random.split(key)
    x2 = jax.random.normal(kx, (48, 3, 32, 32), jnp.float32)
    out2 = jax.block_until_ready(net_forward(x2, kparams))
    ref2 = reference_forward(x2, kparams)
    assert out2.shape == (48, 10), out2.shape
    assert jnp.allclose(out2, ref2, atol=1e-2, rtol=1e-2), "mismatch vs reference (n=48)"

    print("KERNEL_OK")
</pallas_src>

<mosaic_0001>
module attributes {stable_mosaic.version = 11 : i64} {
  func.func @mlp_kernel(%arg0: i32, %arg1: memref<16x3072xf32, #tpu.memory_space<vmem>>, %arg2: memref<3072x256xbf16, #tpu.memory_space<vmem>>, %arg3: memref<1x256xf32, #tpu.memory_space<vmem>>, %arg4: memref<256x512xbf16, #tpu.memory_space<vmem>>, %arg5: memref<1x512xf32, #tpu.memory_space<vmem>>, %arg6: memref<512x512xbf16, #tpu.memory_space<vmem>>, %arg7: memref<1x512xf32, #tpu.memory_space<vmem>>, %arg8: memref<512x256xbf16, #tpu.memory_space<vmem>>, %arg9: memref<1x256xf32, #tpu.memory_space<vmem>>, %arg10: memref<256x256xbf16, #tpu.memory_space<vmem>>, %arg11: memref<1x256xf32, #tpu.memory_space<vmem>>, %arg12: memref<256x128xbf16, #tpu.memory_space<vmem>>, %arg13: memref<1x128xf32, #tpu.memory_space<vmem>>, %arg14: memref<128x128xbf16, #tpu.memory_space<vmem>>, %arg15: memref<1x128xf32, #tpu.memory_space<vmem>>, %arg16: memref<16x128xf32, #tpu.memory_space<vmem>>) attributes {dimension_semantics = [#tpu.dimension_semantics<parallel>], iteration_bounds = array<i64: 1>, scalar_prefetch = 0 : i64, scratch_operands = 0 : i64, tpu.core_type = #tpu.core_type<tc>, window_params = [{transform_indices = @transform_0, window_bounds = array<i64: 16, 3072>}, {pipeline_mode = #tpu.pipeline_mode<synchronous>, transform_indices = @transform_1, window_bounds = array<i64: 3072, 256>}, {pipeline_mode = #tpu.pipeline_mode<synchronous>, transform_indices = @transform_2, window_bounds = array<i64: 1, 256>}, {pipeline_mode = #tpu.pipeline_mode<synchronous>, transform_indices = @transform_3, window_bounds = array<i64: 256, 512>}, {pipeline_mode = #tpu.pipeline_mode<synchronous>, transform_indices = @transform_4, window_bounds = array<i64: 1, 512>}, {pipeline_mode = #tpu.pipeline_mode<synchronous>, transform_indices = @transform_5, window_bounds = array<i64: 512, 512>}, {pipeline_mode = #tpu.pipeline_mode<synchronous>, transform_indices = @transform_6, window_bounds = array<i64: 1, 512>}, {pipeline_mode = #tpu.pipeline_mode<synchronous>, transform_indices = @transform_7, window_bounds = array<i64: 512, 256>}, {pipeline_mode = #tpu.pipeline_mode<synchronous>, transform_indices = @transform_8, window_bounds = array<i64: 1, 256>}, {pipeline_mode = #tpu.pipeline_mode<synchronous>, transform_indices = @transform_9, window_bounds = array<i64: 256, 256>}, {pipeline_mode = #tpu.pipeline_mode<synchronous>, transform_indices = @transform_10, window_bounds = array<i64: 1, 256>}, {pipeline_mode = #tpu.pipeline_mode<synchronous>, transform_indices = @transform_11, window_bounds = array<i64: 256, 128>}, {pipeline_mode = #tpu.pipeline_mode<synchronous>, transform_indices = @transform_12, window_bounds = array<i64: 1, 128>}, {pipeline_mode = #tpu.pipeline_mode<synchronous>, transform_indices = @transform_13, window_bounds = array<i64: 128, 128>}, {pipeline_mode = #tpu.pipeline_mode<synchronous>, transform_indices = @transform_14, window_bounds = array<i64: 1, 128>}, {transform_indices = @transform_15, window_bounds = array<i64: 16, 128>}]} {
    %c0 = arith.constant 0 : index
    %c0_0 = arith.constant 0 : index
    %0 = vector.load %arg1[%c0, %c0_0] : memref<16x3072xf32, #tpu.memory_space<vmem>>, vector<16x3072xf32>
    %1 = arith.truncf %0 : vector<16x3072xf32> to vector<16x3072xbf16>
    %c0_1 = arith.constant 0 : index
    %c0_2 = arith.constant 0 : index
    %2 = vector.load %arg2[%c0_1, %c0_2] : memref<3072x256xbf16, #tpu.memory_space<vmem>>, vector<3072x256xbf16>
    %cst = arith.constant dense<0.000000e+00> : vector<16x256xf32>
    %3 = tpu.matmul %1, %2, %cst {dimension_numbers = #tpu.dot_dimension_numbers<[1], [0], [0], [1], [0, 0, 1, 1], [], []>} : vector<16x3072xbf16>, vector<3072x256xbf16>, vector<16x256xf32> -> vector<16x256xf32>
    %c0_3 = arith.constant 0 : index
    %c0_4 = arith.constant 0 : index
    %4 = vector.load %arg3[%c0_3, %c0_4] : memref<1x256xf32, #tpu.memory_space<vmem>>, vector<1x256xf32>
    %5 = vector.broadcast %4 : vector<1x256xf32> to vector<16x256xf32>
    %6 = arith.addf %3, %5 : vector<16x256xf32>
    %cst_5 = arith.constant 0.000000e+00 : f32
    %7 = vector.broadcast %cst_5 : f32 to vector<16x256xf32>
    %8 = arith.maximumf %6, %7 : vector<16x256xf32>
    %9 = arith.truncf %8 : vector<16x256xf32> to vector<16x256xbf16>
    %c0_6 = arith.constant 0 : index
    %c0_7 = arith.constant 0 : index
    %10 = vector.load %arg4[%c0_6, %c0_7] : memref<256x512xbf16, #tpu.memory_space<vmem>>, vector<256x512xbf16>
    %cst_8 = arith.constant dense<0.000000e+00> : vector<16x512xf32>
    %11 = tpu.matmul %9, %10, %cst_8 {dimension_numbers = #tpu.dot_dimension_numbers<[1], [0], [0], [1], [0, 0, 1, 1], [], []>} : vector<16x256xbf16>, vector<256x512xbf16>, vector<16x512xf32> -> vector<16x512xf32>
    %c0_9 = arith.constant 0 : index
    %c0_10 = arith.constant 0 : index
    %12 = vector.load %arg5[%c0_9, %c0_10] : memref<1x512xf32, #tpu.memory_space<vmem>>, vector<1x512xf32>
    %13 = vector.broadcast %12 : vector<1x512xf32> to vector<16x512xf32>
    %14 = arith.addf %11, %13 : vector<16x512xf32>
    %15 = arith.truncf %14 : vector<16x512xf32> to vector<16x512xbf16>
    %c0_11 = arith.constant 0 : index
    %c0_12 = arith.constant 0 : index
    %16 = vector.load %arg6[%c0_11, %c0_12] : memref<512x512xbf16, #tpu.memory_space<vmem>>, vector<512x512xbf16>
    %cst_13 = arith.constant dense<0.000000e+00> : vector<16x512xf32>
    %17 = tpu.matmul %15, %16, %cst_13 {dimension_numbers = #tpu.dot_dimension_numbers<[1], [0], [0], [1], [0, 0, 1, 1], [], []>} : vector<16x512xbf16>, vector<512x512xbf16>, vector<16x512xf32> -> vector<16x512xf32>
    %c0_14 = arith.constant 0 : index
    %c0_15 = arith.constant 0 : index
    %18 = vector.load %arg7[%c0_14, %c0_15] : memref<1x512xf32, #tpu.memory_space<vmem>>, vector<1x512xf32>
    %19 = vector.broadcast %18 : vector<1x512xf32> to vector<16x512xf32>
    %20 = arith.addf %17, %19 : vector<16x512xf32>
    %cst_16 = arith.constant 0.000000e+00 : f32
    %21 = vector.broadcast %cst_16 : f32 to vector<16x512xf32>
    %22 = arith.maximumf %20, %21 : vector<16x512xf32>
    %23 = arith.truncf %22 : vector<16x512xf32> to vector<16x512xbf16>
    %c0_17 = arith.constant 0 : index
    %c0_18 = arith.constant 0 : index
    %24 = vector.load %arg8[%c0_17, %c0_18] : memref<512x256xbf16, #tpu.memory_space<vmem>>, vector<512x256xbf16>
    %cst_19 = arith.constant dense<0.000000e+00> : vector<16x256xf32>
    %25 = tpu.matmul %23, %24, %cst_19 {dimension_numbers = #tpu.dot_dimension_numbers<[1], [0], [0], [1], [0, 0, 1, 1], [], []>} : vector<16x512xbf16>, vector<512x256xbf16>, vector<16x256xf32> -> vector<16x256xf32>
    %c0_20 = arith.constant 0 : index
    %c0_21 = arith.constant 0 : index
    %26 = vector.load %arg9[%c0_20, %c0_21] : memref<1x256xf32, #tpu.memory_space<vmem>>, vector<1x256xf32>
    %27 = vector.broadcast %26 : vector<1x256xf32> to vector<16x256xf32>
    %28 = arith.addf %25, %27 : vector<16x256xf32>
    %cst_22 = arith.constant 0.000000e+00 : f32
    %29 = vector.broadcast %cst_22 : f32 to vector<16x256xf32>
    %30 = arith.maximumf %28, %29 : vector<16x256xf32>
    %31 = arith.truncf %30 : vector<16x256xf32> to vector<16x256xbf16>
    %c0_23 = arith.constant 0 : index
    %c0_24 = arith.constant 0 : index
    %32 = vector.load %arg10[%c0_23, %c0_24] : memref<256x256xbf16, #tpu.memory_space<vmem>>, vector<256x256xbf16>
    %cst_25 = arith.constant dense<0.000000e+00> : vector<16x256xf32>
    %33 = tpu.matmul %31, %32, %cst_25 {dimension_numbers = #tpu.dot_dimension_numbers<[1], [0], [0], [1], [0, 0, 1, 1], [], []>} : vector<16x256xbf16>, vector<256x256xbf16>, vector<16x256xf32> -> vector<16x256xf32>
    %c0_26 = arith.constant 0 : index
    %c0_27 = arith.constant 0 : index
    %34 = vector.load %arg11[%c0_26, %c0_27] : memref<1x256xf32, #tpu.memory_space<vmem>>, vector<1x256xf32>
    %35 = vector.broadcast %34 : vector<1x256xf32> to vector<16x256xf32>
    %36 = arith.addf %33, %35 : vector<16x256xf32>
    %cst_28 = arith.constant 0.000000e+00 : f32
    %37 = vector.broadcast %cst_28 : f32 to vector<16x256xf32>
    %38 = arith.maximumf %36, %37 : vector<16x256xf32>
    %39 = arith.truncf %38 : vector<16x256xf32> to vector<16x256xbf16>
    %c0_29 = arith.constant 0 : index
    %c0_30 = arith.constant 0 : index
    %40 = vector.load %arg12[%c0_29, %c0_30] : memref<256x128xbf16, #tpu.memory_space<vmem>>, vector<256x128xbf16>
    %cst_31 = arith.constant dense<0.000000e+00> : vector<16x128xf32>
    %41 = tpu.matmul %39, %40, %cst_31 {dimension_numbers = #tpu.dot_dimension_numbers<[1], [0], [0], [1], [0, 0, 1, 1], [], []>} : vector<16x256xbf16>, vector<256x128xbf16>, vector<16x128xf32> -> vector<16x128xf32>
    %c0_32 = arith.constant 0 : index
    %c0_33 = arith.constant 0 : index
    %42 = vector.load %arg13[%c0_32, %c0_33] : memref<1x128xf32, #tpu.memory_space<vmem>>, vector<1x128xf32>
    %43 = vector.broadcast %42 : vector<1x128xf32> to vector<16x128xf32>
    %44 = arith.addf %41, %43 : vector<16x128xf32>
    %cst_34 = arith.constant 0.000000e+00 : f32
    %45 = vector.broadcast %cst_34 : f32 to vector<16x128xf32>
    %46 = arith.maximumf %44, %45 : vector<16x128xf32>
    %47 = arith.truncf %46 : vector<16x128xf32> to vector<16x128xbf16>
    %c0_35 = arith.constant 0 : index
    %c0_36 = arith.constant 0 : index
    %48 = vector.load %arg14[%c0_35, %c0_36] : memref<128x128xbf16, #tpu.memory_space<vmem>>, vector<128x128xbf16>
    %cst_37 = arith.constant dense<0.000000e+00> : vector<16x128xf32>
    %49 = tpu.matmul %47, %48, %cst_37 {dimension_numbers = #tpu.dot_dimension_numbers<[1], [0], [0], [1], [0, 0, 1, 1], [], []>} : vector<16x128xbf16>, vector<128x128xbf16>, vector<16x128xf32> -> vector<16x128xf32>
    %c0_38 = arith.constant 0 : index
    %c0_39 = arith.constant 0 : index
    %50 = vector.load %arg15[%c0_38, %c0_39] : memref<1x128xf32, #tpu.memory_space<vmem>>, vector<1x128xf32>
    %51 = vector.broadcast %50 : vector<1x128xf32> to vector<16x128xf32>
    %52 = arith.addf %49, %51 : vector<16x128xf32>
    %c0_40 = arith.constant 0 : index
    %c0_41 = arith.constant 0 : index
    %53 = vector.load %arg16[%c0_40, %c0_41] : memref<16x128xf32, #tpu.memory_space<vmem>>, vector<16x128xf32>
    tpu.vector_store %arg16[%c0_40, %c0_41], %52 {strides = array<i32>} : memref<16x128xf32, #tpu.memory_space<vmem>>, vector<16x128xf32>,
    return
  }
  func.func @transform_0(%arg0: i32) -> (i32, i32) {
    %c0_i32 = arith.constant 0 : i32
    %c0_i32_0 = arith.constant 0 : i32
    return %arg0, %c0_i32 : i32, i32
  }
  func.func @transform_1(%arg0: i32) -> (i32, i32) {
    %c0_i32 = arith.constant 0 : i32
    %c0_i32_0 = arith.constant 0 : i32
    %c0_i32_1 = arith.constant 0 : i32
    return %c0_i32, %c0_i32_0 : i32, i32
  }
  func.func @transform_2(%arg0: i32) -> (i32, i32) {
    %c0_i32 = arith.constant 0 : i32
    %c0_i32_0 = arith.constant 0 : i32
    %c0_i32_1 = arith.constant 0 : i32
    return %c0_i32, %c0_i32_0 : i32, i32
  }
  func.func @transform_3(%arg0: i32) -> (i32, i32) {
    %c0_i32 = arith.constant 0 : i32
    %c0_i32_0 = arith.constant 0 : i32
    %c0_i32_1 = arith.constant 0 : i32
    return %c0_i32, %c0_i32_0 : i32, i32
  }
  func.func @transform_4(%arg0: i32) -> (i32, i32) {
    %c0_i32 = arith.constant 0 : i32
    %c0_i32_0 = arith.constant 0 : i32
    %c0_i32_1 = arith.constant 0 : i32
    return %c0_i32, %c0_i32_0 : i32, i32
  }
  func.func @transform_5(%arg0: i32) -> (i32, i32) {
    %c0_i32 = arith.constant 0 : i32
    %c0_i32_0 = arith.constant 0 : i32
    %c0_i32_1 = arith.constant 0 : i32
    return %c0_i32, %c0_i32_0 : i32, i32
  }
  func.func @transform_6(%arg0: i32) -> (i32, i32) {
    %c0_i32 = arith.constant 0 : i32
    %c0_i32_0 = arith.constant 0 : i32
    %c0_i32_1 = arith.constant 0 : i32
    return %c0_i32, %c0_i32_0 : i32, i32
  }
  func.func @transform_7(%arg0: i32) -> (i32, i32) {
    %c0_i32 = arith.constant 0 : i32
    %c0_i32_0 = arith.constant 0 : i32
    %c0_i32_1 = arith.constant 0 : i32
    return %c0_i32, %c0_i32_0 : i32, i32
  }
  func.func @transform_8(%arg0: i32) -> (i32, i32) {
    %c0_i32 = arith.constant 0 : i32
    %c0_i32_0 = arith.constant 0 : i32
    %c0_i32_1 = arith.constant 0 : i32
    return %c0_i32, %c0_i32_0 : i32, i32
  }
  func.func @transform_9(%arg0: i32) -> (i32, i32) {
    %c0_i32 = arith.constant 0 : i32
    %c0_i32_0 = arith.constant 0 : i32
    %c0_i32_1 = arith.constant 0 : i32
    return %c0_i32, %c0_i32_0 : i32, i32
  }
  func.func @transform_10(%arg0: i32) -> (i32, i32) {
    %c0_i32 = arith.constant 0 : i32
    %c0_i32_0 = arith.constant 0 : i32
    %c0_i32_1 = arith.constant 0 : i32
    return %c0_i32, %c0_i32_0 : i32, i32
  }
  func.func @transform_11(%arg0: i32) -> (i32, i32) {
    %c0_i32 = arith.constant 0 : i32
    %c0_i32_0 = arith.constant 0 : i32
    %c0_i32_1 = arith.constant 0 : i32
    return %c0_i32, %c0_i32_0 : i32, i32
  }
  func.func @transform_12(%arg0: i32) -> (i32, i32) {
    %c0_i32 = arith.constant 0 : i32
    %c0_i32_0 = arith.constant 0 : i32
    %c0_i32_1 = arith.constant 0 : i32
    return %c0_i32, %c0_i32_0 : i32, i32
  }
  func.func @transform_13(%arg0: i32) -> (i32, i32) {
    %c0_i32 = arith.constant 0 : i32
    %c0_i32_0 = arith.constant 0 : i32
    %c0_i32_1 = arith.constant 0 : i32
    return %c0_i32, %c0_i32_0 : i32, i32
  }
  func.func @transform_14(%arg0: i32) -> (i32, i32) {
    %c0_i32 = arith.constant 0 : i32
    %c0_i32_0 = arith.constant 0 : i32
    %c0_i32_1 = arith.constant 0 : i32
    return %c0_i32, %c0_i32_0 : i32, i32
  }
  func.func @transform_15(%arg0: i32) -> (i32, i32) {
    %c0_i32 = arith.constant 0 : i32
    %c0_i32_0 = arith.constant 0 : i32
    return %arg0, %c0_i32 : i32, i32
  }
}

</mosaic_0001>

<bundles_post_ra>
// kernel: net_forward.1
= control target key start
LH: loop header
LB: loop body
LE: loop exit
PB: predicated region body
PF: predicated region fallthrough
CT: control target
= control target key end

     0   :  { %20 = vsyncpa [#allocation3], 0  ;;  %s8128_s0 = inlined_call_operand.vmem [shape: f32[16,3072], index: 0, kind: input, shape index: {}]   ;;  %s8129_s1 = inlined_call_operand.hbm [shape: bf16[3072,256], index: 1, kind: input, shape index: {}]   ;;  %s8130_s2 = inlined_call_operand.hbm [shape: f32[1,256], index: 2, kind: input, shape index: {}]   ;;  %s8131_s3 = inlined_call_operand.hbm [shape: bf16[256,512], index: 3, kind: input, shape index: {}]   ;;  %s8132_s4 = inlined_call_operand.hbm [shape: f32[1,512], index: 4, kind: input, shape index: {}]   ;;  %s8133_s5 = inlined_call_operand.hbm [shape: bf16[512,512], index: 5, kind: input, shape index: {}]   ;;  %s8134_s6 = inlined_call_operand.hbm [shape: f32[1,512], index: 6, kind: input, shape index: {}]   ;;  %s8135_s7 = inlined_call_operand.hbm [shape: bf16[512,256], index: 7, kind: input, shape index: {}]   ;;  %s8136_s8 = inlined_call_operand.hbm [shape: f32[1,256], index: 8, kind: input, shape index: {}]   ;;  %s8137_s9 = inlined_call_operand.hbm [shape: bf16[256,256], index: 9, kind: input, shape index: {}]   ;;  %s8138_s10 = inlined_call_operand.hbm [shape: f32[1,256], index: 10, kind: input, shape index: {}]   ;;  %s8139_s11 = inlined_call_operand.hbm [shape: bf16[256,128], index: 11, kind: input, shape index: {}]   ;;  %s8140_s12 = inlined_call_operand.hbm [shape: f32[1,128], index: 12, kind: input, shape index: {}]   ;;  %s8141_s13 = inlined_call_operand.hbm [shape: bf16[128,128], index: 13, kind: input, shape index: {}]   ;;  %s8142_s14 = inlined_call_operand.hbm [shape: f32[1,128], index: 14, kind: input, shape index: {}]   ;;  %s8143_s15 = inlined_call_operand.hbm [shape: f32[16,128], index: 15, kind: output, shape index: {}]  }
   0x1   :  { %21 = vsyncpa [#allocation6], 0 }
   0x2   :  { %22 = vsyncpa [#allocation9], 0 }
   0x3   :  { %23 = vsyncpa [#allocation12], 0 }
   0x4   :  { %24 = vsyncpa [#allocation15], 0 }
   0x5   :  { %25 = vsyncpa [#allocation18], 0 }
   0x6   :  { %26 = vsyncpa [#allocation21], 0 }
   0x7   :  { %27 = vsyncpa [#allocation24], 0 }
   0x8   :  { %28 = vsyncpa [#allocation4], 0  ;;  %s7788_s18 = smov [#allocation5]   ;;  %s7789_s20 = smov [#allocation8]  }
   0x9   :  { %s49_s19 = sshll.u32 %s7788_s18, 4  ;;  %s71_s21 = sshll.u32 %s7789_s20, 4  ;;  %s50_s19 = int_to_ptr.vmem [resolvable:$true] %s49_s19  ;;  %s72_s21 = int_to_ptr.vmem [resolvable:$true] %s71_s21 }
   0xa   :  { %s7478_s22 = scalar_lea.vmem %s50_s19, 32  ;;  %p7483_p1 = scmp.lt.s32.totalorder %s50_s19, %s50_s19 }
   0xb   :  { %p7479_p0 = scmp.ne.s32.totalorder %s50_s19, %s7478_s22  ;;  %p7484_p2 = scmp.lt.s32.totalorder %s7478_s22, %s7478_s22 }
   0xd   :  { %p7485_p3 = por %p7484_p2, %p7483_p1 }
   0xf   :  { %p7486_p4 = pnand %p7485_p3, %p7479_p0 }
  0x11   :  { %7489 = shalt.err (!%p7486_p4)
}
  0x12   :  { %52 = dma.hbm_to_vmem [thread:$0]  %s8130_s2, 32, %s50_s19, [#allocation6]  }
  0x13   :  { %s7498_s25 = scalar_lea.vmem %s72_s21, 64  ;;  %p7503_p6 = scmp.lt.s32.totalorder %s72_s21, %s72_s21 }
  0x14   :  { %p7499_p5 = scmp.ne.s32.totalorder %s72_s21, %s7498_s25  ;;  %p7504_p7 = scmp.lt.s32.totalorder %s7498_s25, %s7498_s25 }
  0x16   :  { %p7505_p8 = por %p7504_p7, %p7503_p6 }
  0x18   :  { %p7506_p9 = pnand %p7505_p8, %p7499_p5 }
  0x1a   :  { %7509 = shalt.err (!%p7506_p9)
}
  0x1b   :  { %74 = dma.hbm_to_vmem [thread:$0]  %s8132_s4, 64, %s72_s21, [#allocation9]  }
  0x1c   :  { %s7790_s28 = smov [#allocation11]   ;;  %s7791_s30 = smov [#allocation14]  }
  0x1d   :  { %s93_s29 = sshll.u32 %s7790_s28, 4  ;;  %s115_s16 = sshll.u32 %s7791_s30, 4  ;;  %s94_s29 = int_to_ptr.vmem [resolvable:$true] %s93_s29  ;;  %s116_s16 = int_to_ptr.vmem [resolvable:$true] %s115_s16 }
  0x1e   :  { %s7518_s17 = scalar_lea.vmem %s94_s29, 64  ;;  %p7523_p11 = scmp.lt.s32.totalorder %s94_s29, %s94_s29 }
  0x1f   :  { %p7519_p10 = scmp.ne.s32.totalorder %s94_s29, %s7518_s17  ;;  %p7524_p12 = scmp.lt.s32.totalorder %s7518_s17, %s7518_s17 }
  0x21   :  { %p7525_p13 = por %p7524_p12, %p7523_p11 }
  0x23   :  { %p7526_p0 = pnand %p7525_p13, %p7519_p10 }
  0x25   :  { %7529 = shalt.err (!%p7526_p0)
}
  0x26   :  { %96 = dma.hbm_to_vmem [thread:$0]  %s8134_s6, 64, %s94_s29, [#allocation12]  }
  0x27   :  { %s7538_s19 = scalar_lea.vmem %s116_s16, 32  ;;  %p7543_p2 = scmp.lt.s32.totalorder %s116_s16, %s116_s16 }
  0x28   :  { %p7539_p1 = scmp.ne.s32.totalorder %s116_s16, %s7538_s19  ;;  %p7544_p3 = scmp.lt.s32.totalorder %s7538_s19, %s7538_s19 }
  0x2a   :  { %p7545_p4 = por %p7544_p3, %p7543_p2 }
  0x2c   :  { %p7546_p5 = pnand %p7545_p4, %p7539_p1 }
  0x2e   :  { %7549 = shalt.err (!%p7546_p5)
}
  0x2f   :  { %118 = dma.hbm_to_vmem [thread:$0]  %s8136_s8, 32, %s116_s16, [#allocation15]  }
  0x30   :  { %s7792_s21 = smov [#allocation17]   ;;  %s7793_s23 = smov [#allocation20]  }
  0x31   :  { %s137_s22 = sshll.u32 %s7792_s21, 4  ;;  %s159_s24 = sshll.u32 %s7793_s23, 4  ;;  %s138_s22 = int_to_ptr.vmem [resolvable:$true] %s137_s22  ;;  %s160_s24 = int_to_ptr.vmem [resolvable:$true] %s159_s24 }
  0x32   :  { %s7558_s25 = scalar_lea.vmem %s138_s22, 32  ;;  %p7563_p7 = scmp.lt.s32.totalorder %s138_s22, %s138_s22 }
  0x33   :  { %p7559_p6 = scmp.ne.s32.totalorder %s138_s22, %s7558_s25  ;;  %p7564_p8 = scmp.lt.s32.totalorder %s7558_s25, %s7558_s25 }
  0x35   :  { %p7565_p9 = por %p7564_p8, %p7563_p7 }
  0x37   :  { %p7566_p10 = pnand %p7565_p9, %p7559_p6 }
  0x39   :  { %7569 = shalt.err (!%p7566_p10)
}
  0x3a   :  { %140 = dma.hbm_to_vmem [thread:$0]  %s8138_s10, 32, %s138_s22, [#allocation18]  }
  0x3b   :  { %s7578_s27 = scalar_lea.vmem %s160_s24, 16  ;;  %s7582_s8 = scalar_lea.vmem %s160_s24, 32 }
  0x3c   :  { %p7579_p11 = scmp.ne.s32.totalorder %s160_s24, %s7578_s27  ;;  %p7583_p12 = scmp.lt.s32.totalorder %s160_s24, %s160_s24 }
  0x3d   :  { %p7584_p13 = scmp.lt.s32.totalorder %s7582_s8, %s7578_s27 }
  0x3f   :  { %p7585_p0 = por %p7584_p13, %p7583_p12 }
  0x41   :  { %p7586_p1 = pnand %p7585_p0, %p7579_p11 }
  0x43   :  { %7589 = shalt.err (!%p7586_p1)
}
  0x44   :  { %162 = dma.hbm_to_vmem [thread:$0]  %s8140_s12, 16, %s160_s24, [#allocation21]  }
  0x45   :  { %s7794_s30 = smov [#allocation2]  }
  0x46   :  { %s36_s16 = sshll.u32 %s7794_s30, 4  ;;  %s37_s16 = int_to_ptr.vmem [resolvable:$true] %s36_s16 }
  0x47   :  { %s7598_s17 = scalar_lea.vmem %s37_s16, 49152  ;;  %p7603_p3 = scmp.lt.s32.totalorder %s37_s16, %s37_s16 }
  0x48   :  { %p7599_p2 = scmp.ne.s32.totalorder %s37_s16, %s7598_s17  ;;  %p7604_p4 = scmp.lt.s32.totalorder %s7598_s17, %s7598_s17 }
  0x4a   :  { %p7605_p5 = por %p7604_p4, %p7603_p3 }
  0x4c   :  { %p7606_p6 = pnand %p7605_p5, %p7599_p2 }
  0x4e   :  { %7609 = shalt.err (!%p7606_p6)
}
  0x4f   :  { %s7795_s10 = smov 128   ;;  %s7796_s2 = smov 8  }
  0x50   :  { %42 = dma.hbm_to_vmem [thread:$0]  %s8129_s1, 49152, %s37_s16, [#allocation3], %s7795_s10, %s7795_s10, %s7796_s2  }
  0x51   :  { %s7797_s12 = smov [#allocation7]  }
  0x52   :  { %s58_s4 = sshll.u32 %s7797_s12, 4  ;;  %s59_s4 = int_to_ptr.vmem [resolvable:$true] %s58_s4 }
  0x53   :  { %s7618_s20 = scalar_lea.vmem %s59_s4, 8192  ;;  %p7623_p8 = scmp.lt.s32.totalorder %s59_s4, %s59_s4 }
  0x54   :  { %p7619_p7 = scmp.ne.s32.totalorder %s59_s4, %s7618_s20  ;;  %p7624_p9 = scmp.lt.s32.totalorder %s7618_s20, %s7618_s20 }
  0x56   :  { %p7625_p10 = por %p7624_p9, %p7623_p8 }
  0x58   :  { %p7626_p11 = pnand %p7625_p10, %p7619_p7 }
  0x5a   :  { %7629 = shalt.err (!%p7626_p11)
}
  0x5b   :  { %s7798_s21 = smov 256   ;;  %s7799_s22 = smov 16  }
  0x5c   :  { %64 = dma.hbm_to_vmem [thread:$0]  %s8131_s3, 8192, %s59_s4, [#allocation6], %s7798_s21, %s7798_s21, %s7799_s22  }
  0x5d   :  { %s7800_s25 = smov [#allocation10]   ;;  %s7801_s26 = smov [#allocation13]  }
  0x5e   :  { %s80_s6 = sshll.u32 %s7800_s25, 4  ;;  %s102_s1 = sshll.u32 %s7801_s26, 4  ;;  %s81_s6 = int_to_ptr.vmem [resolvable:$true] %s80_s6  ;;  %s103_s1 = int_to_ptr.vmem [resolvable:$true] %s102_s1 }
  0x5f   :  { %s7638_s27 = scalar_lea.vmem %s81_s6, 16384  ;;  %p7643_p13 = scmp.lt.s32.totalorder %s81_s6, %s81_s6 }
  0x60   :  { %p7639_p12 = scmp.ne.s32.totalorder %s81_s6, %s7638_s27  ;;  %p7644_p0 = scmp.lt.s32.totalorder %s7638_s27, %s7638_s27 }
  0x62   :  { %p7645_p1 = por %p7644_p0, %p7643_p13 }
  0x64   :  { %p7646_p2 = pnand %p7645_p1, %p7639_p12 }
  0x66   :  { %7649 = shalt.err (!%p7646_p2)
}
  0x67   :  { %86 = dma.hbm_to_vmem [thread:$0]  %s8133_s5, 16384, %s81_s6, [#allocation9], %s7798_s21, %s7798_s21, %s7799_s22  }
  0x68   :  { %s7658_s29 = scalar_lea.vmem %s103_s1, 8192  ;;  %p7663_p4 = scmp.lt.s32.totalorder %s103_s1, %s103_s1 }
  0x69   :  { %p7659_p3 = scmp.ne.s32.totalorder %s103_s1, %s7658_s29  ;;  %p7664_p5 = scmp.lt.s32.totalorder %s7658_s29, %s7658_s29 }
  0x6b   :  { %p7665_p6 = por %p7664_p5, %p7663_p4 }
  0x6d   :  { %p7666_p7 = pnand %p7665_p6, %p7659_p3 }
  0x6f   :  { %7669 = shalt.err (!%p7666_p7)
}
  0x70   :  { %108 = dma.hbm_to_vmem [thread:$0]  %s8135_s7, 8192, %s103_s1, [#allocation12], %s7795_s10, %s7795_s10, %s7796_s2  }
  0x71   :  { %s7802_s16 = smov [#allocation16]   ;;  %s7803_s18 = smov [#allocation19]  }
  0x72   :  { %s124_s17 = sshll.u32 %s7802_s16, 4  ;;  %s146_s19 = sshll.u32 %s7803_s18, 4  ;;  %s125_s17 = int_to_ptr.vmem [resolvable:$true] %s124_s17  ;;  %s147_s19 = int_to_ptr.vmem [resolvable:$true] %s146_s19 }
  0x73   :  { %s7678_s5 = scalar_lea.vmem %s125_s17, 4096  ;;  %p7683_p9 = scmp.lt.s32.totalorder %s125_s17, %s125_s17 }
  0x74   :  { %p7679_p8 = scmp.ne.s32.totalorder %s125_s17, %s7678_s5  ;;  %p7684_p10 = scmp.lt.s32.totalorder %s7678_s5, %s7678_s5 }
  0x76   :  { %p7685_p11 = por %p7684_p10, %p7683_p9 }
  0x78   :  { %p7686_p12 = pnand %p7685_p11, %p7679_p8 }
  0x7a   :  { %7689 = shalt.err (!%p7686_p12)
}
  0x7b   :  { %130 = dma.hbm_to_vmem [thread:$0]  %s8137_s9, 4096, %s125_s17, [#allocation15], %s7795_s10, %s7795_s10, %s7796_s2  }
  0x7c   :  { %s7698_s7 = scalar_lea.vmem %s147_s19, 2048  ;;  %p7703_p0 = scmp.lt.s32.totalorder %s147_s19, %s147_s19 }
  0x7d   :  { %p7699_p13 = scmp.ne.s32.totalorder %s147_s19, %s7698_s7  ;;  %p7704_p1 = scmp.lt.s32.totalorder %s7698_s7, %s7698_s7 }
  0x7f   :  { %p7705_p2 = por %p7704_p1, %p7703_p0 }
  0x81   :  { %p7706_p3 = pnand %p7705_p2, %p7699_p13 }
  0x83   :  { %7709 = shalt.err (!%p7706_p3)
}
  0x84   :  { %s7804_s20 = smov 64   ;;  %s7805_s21 = smov 4  }
  0x85   :  { %152 = dma.hbm_to_vmem [thread:$0]  %s8139_s11, 2048, %s147_s19, [#allocation18], %s7804_s20, %s7804_s20, %s7805_s21  }
  0x86   :  { %s7806_s24 = smov [#allocation22]   ;;  %s7807_s6 = smov [#allocation23]  }
  0x87   :  { %s168_s25 = sshll.u32 %s7806_s24, 4  ;;  %s181_s26 = sshll.u32 %s7807_s6, 4  ;;  %s169_s25 = int_to_ptr.vmem [resolvable:$true] %s168_s25  ;;  %s182_s26 = int_to_ptr.vmem [resolvable:$true] %s181_s26 }
  0x88   :  { %s7718_s9 = scalar_lea.vmem %s169_s25, 1024  ;;  %p7723_p5 = scmp.lt.s32.totalorder %s169_s25, %s169_s25 }
  0x89   :  { %p7719_p4 = scmp.ne.s32.totalorder %s169_s25, %s7718_s9  ;;  %p7724_p6 = scmp.lt.s32.totalorder %s7718_s9, %s7718_s9 }
  0x8b   :  { %p7725_p7 = por %p7724_p6, %p7723_p5 }
  0x8d   :  { %p7726_p8 = pnand %p7725_p7, %p7719_p4 }
  0x8f   :  { %7729 = shalt.err (!%p7726_p8)
}
  0x90   :  { %174 = dma.hbm_to_vmem [thread:$0]  %s8141_s13, 1024, %s169_s25, [#allocation21], %s7804_s20, %s7804_s20, %s7805_s21  }
  0x91   :  { %s7738_s8 = scalar_lea.vmem %s182_s26, 16  ;;  %s7742_s11 = scalar_lea.vmem %s182_s26, 32 }
  0x92   :  { %p7739_p9 = scmp.ne.s32.totalorder %s182_s26, %s7738_s8  ;;  %p7743_p10 = scmp.lt.s32.totalorder %s182_s26, %s182_s26 }
  0x93   :  { %p7744_p11 = scmp.lt.s32.totalorder %s7742_s11, %s7738_s8 }
  0x95   :  { %p7745_p12 = por %p7744_p11, %p7743_p10 }
  0x97   :  { %p7746_p13 = pnand %p7745_p12, %p7739_p9 }
  0x99   :  { %7749 = shalt.err (!%p7746_p13)
}
  0x9a   :  { %184 = dma.hbm_to_vmem [thread:$0]  %s8142_s14, 16, %s182_s26, [#allocation24]  }
  0x9b   :  { %7770 = dma.done.wait [#allocation3], 49152  }
  0x9c   :  { %7771 = vsyncadd [#allocation3], 4294918144 }
  0x9d   :  { %7772 = dma.done.wait [#allocation6], 8224  }
  0x9e   :  { %7773 = vsyncadd [#allocation6], 4294959072 }
  0x9f   :  { %7774 = dma.done.wait [#allocation9], 16448  }
  0xa0   :  { %7775 = vsyncadd [#allocation9], 4294950848 }
  0xa1   :  { %7776 = dma.done.wait [#allocation12], 8256  }
  0xa2   :  { %7777 = vsyncadd [#allocation12], 4294959040 }
  0xa3   :  { %7778 = dma.done.wait [#allocation15], 4128  }
  0xa4   :  { %7779 = vsyncadd [#allocation15], 4294963168 }
  0xa5   :  { %7780 = dma.done.wait [#allocation18], 2080  }
  0xa6   :  { %7781 = vsyncadd [#allocation18], 4294965216 }
  0xa7   :  { %7782 = dma.done.wait [#allocation21], 1040  }
  0xa8   :  { %7783 = vsyncadd [#allocation21], 4294966256 }
  0xa9   :  { %7784 = dma.done.wait [#allocation24], 16  }
  0xaa   :  { %7785 = vsyncadd [#allocation24], 4294967280  ;;  %v6438_v0 = vld [vmem:[#allocation2 + $0x74] ss:$8 sps:$4 sm:$0xff]   ;;  %v6442_v2 = vld [vmem:[#allocation2 + $0x70] ss:$8 sps:$4 sm:$0xff]  }
  0xab   :  { %v6440_v1 = vld [vmem:[#allocation2 + $0x174] ss:$8 sps:$4 sm:$0xff]   ;;  %2616 = vmatprep.subr.bf16.mxu0 %v6438_v0  ;;  %v6443_v3 = vld [vmem:[#allocation2 + $0x170] ss:$8 sps:$4 sm:$0xff]   ;;  %v6444_v4 = vld [vmem:[#allocation2 + $0x64] ss:$8 sps:$4 sm:$0xff]  }
  0xac   :  { %2659 = vmatprep.subr.bf16.mxu1 %v6440_v1  ;;  %2617 = vmatpush1.bf16.msra.mxu0 %v6442_v2  ;;  %v6446_v5 = vld [vmem:[#allocation2 + $0x164] ss:$8 sps:$4 sm:$0xff]   ;;  %v6448_v6 = vld [vmem:[#allocation2 + $0x60] ss:$8 sps:$4 sm:$0xff]   ;;  %v6450_v8 = vld [vmem:[#allocation2 + $0x54] ss:$8 sps:$4 sm:$0xff]  }
  0xad   :  { %2660 = vmatpush1.bf16.msra.mxu1 %v6443_v3  ;;  %2618 = vmatprep.subr.bf16.mxu0 %v6444_v4  ;;  %v6449_v7 = vld [vmem:[#allocation2 + $0x160] ss:$8 sps:$4 sm:$0xff]   ;;  %v6452_v9 = vld [vmem:[#allocation2 + $0x154] ss:$8 sps:$4 sm:$0xff]   ;;  %v6454_v10 = vld [vmem:[#allocation2 + $0x50] ss:$8 sps:$4 sm:$0xff]  }
  0xae   :  { %2661 = vmatprep.subr.bf16.mxu1 %v6446_v5  ;;  %v6455_v11 = vld [vmem:[#allocation2 + $0x150] ss:$8 sps:$4 sm:$0xff]   ;;  %v6456_v12 = vld [vmem:[#allocation2 + $0x44] ss:$8 sps:$4 sm:$0xff]   ;;  %v6460_v14 = vld [vmem:[#allocation2 + $0x40] ss:$8 sps:$4 sm:$0xff]  }
  0xaf   :  { %v6458_v13 = vld [vmem:[#allocation2 + $0x144] ss:$8 sps:$4 sm:$0xff]   ;;  %v6461_v15 = vld [vmem:[#allocation2 + $0x140] ss:$8 sps:$4 sm:$0xff]   ;;  %v6462_v16 = vld [vmem:[#allocation2 + $0x34] ss:$8 sps:$4 sm:$0xff]  }
  0xb0   :  { %2619 = vmatpush1.bf16.msra.mxu0 %v6448_v6  ;;  %v6464_v17 = vld [vmem:[#allocation2 + $0x134] ss:$8 sps:$4 sm:$0xff]   ;;  %v6466_v18 = vld [vmem:[#allocation2 + $0x30] ss:$8 sps:$4 sm:$0xff]   ;;  %v6468_v20 = vld [vmem:[#allocation2 + $0x24] ss:$8 sps:$4 sm:$0xff]  }
  0xb1   :  { %2662 = vmatpush1.bf16.msra.mxu1 %v6449_v7  ;;  %2620 = vmatprep.subr.bf16.mxu0 %v6450_v8  ;;  %v6467_v19 = vld [vmem:[#allocation2 + $0x130] ss:$8 sps:$4 sm:$0xff]   ;;  %v6470_v21 = vld [vmem:[#allocation2 + $0x124] ss:$8 sps:$4 sm:$0xff]   ;;  %v6472_v22 = vld [vmem:[#allocation2 + $0x20] ss:$8 sps:$4 sm:$0xff]  }
  0xb2   :  { %2663 = vmatprep.subr.bf16.mxu1 %v6452_v9  ;;  %v6473_v23 = vld [vmem:[#allocation2 + $0x120] ss:$8 sps:$4 sm:$0xff]   ;;  %v6474_v24 = vld [vmem:[#allocation2 + $0x14] ss:$8 sps:$4 sm:$0xff]   ;;  %v6478_v26 = vld [vmem:[#allocation2 + $0x10] ss:$8 sps:$4 sm:$0xff]  }
  0xb3   :  { %v6476_v25 = vld [vmem:[#allocation2 + $0x114] ss:$8 sps:$4 sm:$0xff]   ;;  %v6479_v27 = vld [vmem:[#allocation2 + $0x110] ss:$8 sps:$4 sm:$0xff]   ;;  %v6480_v28 = vld [vmem:[#allocation2 + $0x4] ss:$8 sps:$4 sm:$0xff]  }
  0xb4   :  { %2621 = vmatpush1.bf16.msra.mxu0 %v6454_v10  ;;  %v6482_v29 = vld [vmem:[#allocation2 + $0x104] ss:$8 sps:$4 sm:$0xff]   ;;  %v6484_v30 = vld [vmem:[#allocation2] ss:$8 sps:$4 sm:$0xff]   ;;  %v6486_v32 = vld [vmem:[#allocation2 + $0xf4] ss:$8 sps:$4 sm:$0xff]  }
  0xb5   :  { %2664 = vmatpush1.bf16.msra.mxu1 %v6455_v11  ;;  %2622 = vmatprep.subr.bf16.mxu0 %v6456_v12  ;;  %v6485_v31 = vld [vmem:[#allocation2 + $0x100] ss:$8 sps:$4 sm:$0xff]   ;;  %v6488_v33 = vld [vmem:[#allocation2 + $0x1f4] ss:$8 sps:$4 sm:$0xff]   ;;  %v6490_v34 = vld [vmem:[#allocation2 + $0xf0] ss:$8 sps:$4 sm:$0xff]  }
  0xb6   :  { %2665 = vmatprep.subr.bf16.mxu1 %v6458_v13  ;;  %v6491_v35 = vld [vmem:[#allocation2 + $0x1f0] ss:$8 sps:$4 sm:$0xff]   ;;  %v6492_v36 = vld [vmem:[#allocation2 + $0xe4] ss:$8 sps:$4 sm:$0xff]   ;;  %v6496_v38 = vld [vmem:[#allocation2 + $0xe0] ss:$8 sps:$4 sm:$0xff]  }
  0xb7   :  { %v6494_v37 = vld [vmem:[#allocation2 + $0x1e4] ss:$8 sps:$4 sm:$0xff]   ;;  %v6497_v39 = vld [vmem:[#allocation2 + $0x1e0] ss:$8 sps:$4 sm:$0xff]   ;;  %v6498_v40 = vld [vmem:[#allocation2 + $0xd4] ss:$8 sps:$4 sm:$0xff]  }
  0xb8   :  { %2623 = vmatpush1.bf16.msra.mxu0 %v6460_v14  ;;  %v6500_v41 = vld [vmem:[#allocation2 + $0x1d4] ss:$8 sps:$4 sm:$0xff]   ;;  %v6502_v42 = vld [vmem:[#allocation2 + $0xd0] ss:$8 sps:$4 sm:$0xff]   ;;  %v6504_v44 = vld [vmem:[#allocation2 + $0xc4] ss:$8 sps:$4 sm:$0xff]  }
  0xb9   :  { %2666 = vmatpush1.bf16.msra.mxu1 %v6461_v15  ;;  %2624 = vmatprep.subr.bf16.mxu0 %v6462_v16  ;;  %v6503_v43 = vld [vmem:[#allocation2 + $0x1d0] ss:$8 sps:$4 sm:$0xff]   ;;  %v6506_v45 = vld [vmem:[#allocation2 + $0x1c4] ss:$8 sps:$4 sm:$0xff]   ;;  %v6508_v50 = vld [vmem:[#allocation2 + $0xc0] ss:$8 sps:$4 sm:$0xff]  }
  0xba   :  { %2667 = vmatprep.subr.bf16.mxu1 %v6464_v17  ;;  %v229_v46 = vld [vmem:[%s8128_s0 + $0x8] sm:$0xff]  ;;  %v231_v48 = vld [vmem:[%s8128_s0 + $0x18] sm:$0xff]  ;;  %v228_v6 = vld [vmem:[%s8128_s0] sm:$0xff]  ;;  %vm7809_vm0 = vmmov 0  }
  0xbb   :  { %v253_v47 = vld [vmem:[%s8128_s0 + $0xc8] sm:$0xff]  ;;  %v255_v49 = vld [vmem:[%s8128_s0 + $0xd8] sm:$0xff]  ;;  %v252_v7 = vld [vmem:[%s8128_s0 + $0xc0] sm:$0xff] }
  0xbc   :  { %2625 = vmatpush1.bf16.msra.mxu0 %v6466_v18  ;;  %v6509_v51 = vld [vmem:[#allocation2 + $0x1c0] ss:$8 sps:$4 sm:$0xff]   ;;  %v6510_v52 = vld [vmem:[#allocation2 + $0xb4] ss:$8 sps:$4 sm:$0xff]   ;;  %v277_v53 = vpack.c.bf16 %v253_v47, %v229_v46  ;;  %v279_v54 = vpack.c.bf16 %v255_v49, %v231_v48  ;;  %v6514_v56 = vld [vmem:[#allocation2 + $0xb0] ss:$8 sps:$4 sm:$0xff]   ;;  %v276_v12 = vpack.c.bf16 %v252_v7, %v228_v6 }
  0xbd   :  { %2668 = vmatpush1.bf16.msra.mxu1 %v6467_v19  ;;  %2626 = vmatprep.subr.bf16.mxu0 %v6468_v20  ;;  %v6512_v55 = vld [vmem:[#allocation2 + $0x1b4] ss:$8 sps:$4 sm:$0xff]   ;;  %v6515_v57 = vld [vmem:[#allocation2 + $0x1b0] ss:$8 sps:$4 sm:$0xff]   ;;  %v6516_v58 = vld [vmem:[#allocation2 + $0xa4] ss:$8 sps:$4 sm:$0xff]  }
  0xbe   :  { %2669 = vmatprep.subr.bf16.mxu1 %v6470_v21  ;;  %2648 = vmatprep.mubr.bf16.mxu0 %v277_v53  ;;  %v6518_v59 = vld [vmem:[#allocation2 + $0x1a4] ss:$8 sps:$4 sm:$0xff]   ;;  %v6520_v60 = vld [vmem:[#allocation2 + $0xa0] ss:$8 sps:$4 sm:$0xff]   ;;  %v6522_v62 = vld [vmem:[#allocation2 + $0x94] ss:$8 sps:$4 sm:$0xff]  }
  0xbf   :  { %2691 = vmatprep.mubr.bf16.mxu1 %v279_v54  ;;  %v6521_v61 = vld [vmem:[#allocation2 + $0x1a0] ss:$8 sps:$4 sm:$0xff]   ;;  %v6524_v63 = vld [vmem:[#allocation2 + $0x194] ss:$8 sps:$4 sm:$0xff]   ;;  %v6526_v0 = vld [vmem:[#allocation2 + $0x90] ss:$8 sps:$4 sm:$0xff]  }
  0xc0   :  { %2627 = vmatpush1.bf16.msra.mxu0 %v6472_v22  ;;  %v6527_v1 = vld [vmem:[#allocation2 + $0x190] ss:$8 sps:$4 sm:$0xff]   ;;  %v6528_v2 = vld [vmem:[#allocation2 + $0x84] ss:$8 sps:$4 sm:$0xff]   ;;  %v6532_v4 = vld [vmem:[#allocation2 + $0x80] ss:$8 sps:$4 sm:$0xff]  }
  0xc1   :  { %2670 = vmatpush1.bf16.msra.mxu1 %v6473_v23  ;;  %2628 = vmatprep.subr.bf16.mxu0 %v6474_v24  ;;  %v6530_v3 = vld [vmem:[#allocation2 + $0x184] ss:$8 sps:$4 sm:$0xff]   ;;  %v6533_v5 = vld [vmem:[#allocation2 + $0x180] ss:$8 sps:$4 sm:$0xff]   ;;  %v230_v8 = vld [vmem:[%s8128_s0 + $0x10] sm:$0xff] }
  0xc2   :  { %2671 = vmatprep.subr.bf16.mxu1 %v6476_v25  ;;  %v254_v9 = vld [vmem:[%s8128_s0 + $0xd0] sm:$0xff]  ;;  %v6542_v16 = vld [vmem:[#allocation2 + $0x264] ss:$8 sps:$4 sm:$0xff]   ;;  %v6540_v18 = vld [vmem:[#allocation2 + $0x260] ss:$8 sps:$4 sm:$0xff]  }
  0xc3   :  { %v6536_v10 = vld [vmem:[#allocation2 + $0x274] ss:$8 sps:$4 sm:$0xff]   ;;  %v278_v13 = vpack.c.bf16 %v254_v9, %v230_v8  ;;  %v6534_v14 = vld [vmem:[#allocation2 + $0x270] ss:$8 sps:$4 sm:$0xff]   ;;  %v6545_v17 = vld [vmem:[#allocation2 + $0x364] ss:$8 sps:$4 sm:$0xff]  }
  0xc4   :  { %2629 = vmatpush1.bf16.msra.mxu0 %v6478_v26  ;;  %v6539_v11 = vld [vmem:[#allocation2 + $0x374] ss:$8 sps:$4 sm:$0xff]   ;;  %v6537_v15 = vld [vmem:[#allocation2 + $0x370] ss:$8 sps:$4 sm:$0xff]   ;;  %v6543_v19 = vld [vmem:[#allocation2 + $0x360] ss:$8 sps:$4 sm:$0xff]  }
  0xc5   :  { %2672 = vmatpush1.bf16.msra.mxu1 %v6479_v27  ;;  %2630 = vmatprep.subr.bf16.mxu0 %v6480_v28  ;;  %v6548_v20 = vld [vmem:[#allocation2 + $0x254] ss:$8 sps:$4 sm:$0xff]   ;;  %v6546_v22 = vld [vmem:[#allocation2 + $0x250] ss:$8 sps:$4 sm:$0xff]   ;;  %v6554_v24 = vld [vmem:[#allocation2 + $0x244] ss:$8 sps:$4 sm:$0xff]  }
  0xc6   :  { %2673 = vmatprep.subr.bf16.mxu1 %v6482_v29  ;;  %v6551_v21 = vld [vmem:[#allocation2 + $0x354] ss:$8 sps:$4 sm:$0xff]   ;;  %v6549_v23 = vld [vmem:[#allocation2 + $0x350] ss:$8 sps:$4 sm:$0xff]   ;;  %v6557_v25 = vld [vmem:[#allocation2 + $0x344] ss:$8 sps:$4 sm:$0xff]  }
  0xc7   :  { %v6552_v26 = vld [vmem:[#allocation2 + $0x240] ss:$8 sps:$4 sm:$0xff]   ;;  %v6560_v28 = vld [vmem:[#allocation2 + $0x234] ss:$8 sps:$4 sm:$0xff]   ;;  %v6585_v53 = vld [vmem:[#allocation2 + $0x3f0] ss:$8 sps:$4 sm:$0xff]  }
  0xc8   :  { %2631 = vmatpush1.bf16.msra.mxu0 %v6484_v30  ;;  %v6555_v27 = vld [vmem:[#allocation2 + $0x340] ss:$8 sps:$4 sm:$0xff]   ;;  %v6563_v29 = vld [vmem:[#allocation2 + $0x334] ss:$8 sps:$4 sm:$0xff]   ;;  %v6558_v30 = vld [vmem:[#allocation2 + $0x230] ss:$8 sps:$4 sm:$0xff]  }
  0xc9   :  { %2674 = vmatpush1.bf16.msra.mxu1 %v6485_v31  ;;  %2632 = vmatprep.subr.bf16.mxu0 %v6486_v32  ;;  %v6561_v31 = vld [vmem:[#allocation2 + $0x330] ss:$8 sps:$4 sm:$0xff]   ;;  %v6566_v32 = vld [vmem:[#allocation2 + $0x224] ss:$8 sps:$4 sm:$0xff]   ;;  %v6576_v48 = vld [vmem:[#allocation2 + $0x200] ss:$8 sps:$4 sm:$0xff]  }
  0xca   :  { %2675 = vmatprep.subr.bf16.mxu1 %v6488_v33  ;;  %v6569_v33 = vld [vmem:[#allocation2 + $0x324] ss:$8 sps:$4 sm:$0xff]   ;;  %v259_v46 = vld [vmem:[%s8128_s0 + $0xf8] sm:$0xff]  ;;  %v6579_v49 = vld [vmem:[#allocation2 + $0x300] ss:$8 sps:$4 sm:$0xff]  }
  0xcb   :  { %v6590_v54 = vld [vmem:[#allocation2 + $0x2e4] ss:$8 sps:$4 sm:$0xff]   ;;  %v6612_v8 = vld [vmem:[#allocation2 + $0x2a0] ss:$8 sps:$4 sm:$0xff]  }
  0xcc   :  { %2633 = vmatpush2.bf16.msra.mxu0 %v6490_v34  ;;  %v6564_v34 = vld [vmem:[#allocation2 + $0x220] ss:$8 sps:$4 sm:$0xff]   ;;  %v6614_v6 = vld [vmem:[#allocation2 + $0x2a4] ss:$8 sps:$4 sm:$0xff]  }
  0xcd   :  { %2676 = vmatpush2.bf16.msra.mxu1 %v6491_v35  ;;  %2634 = vmatprep.subr.bf16.mxu0 %v6492_v36  ;;  %v6567_v35 = vld [vmem:[#allocation2 + $0x320] ss:$8 sps:$4 sm:$0xff]   ;;  %v6572_v36 = vld [vmem:[#allocation2 + $0x214] ss:$8 sps:$4 sm:$0xff]   ;;  %v6617_v7 = vld [vmem:[#allocation2 + $0x3a4] ss:$8 sps:$4 sm:$0xff]  }
  0xce   :  { %2677 = vmatprep.subr.bf16.mxu1 %v6494_v37  ;;  %v6575_v37 = vld [vmem:[#allocation2 + $0x314] ss:$8 sps:$4 sm:$0xff]   ;;  %v6615_v9 = vld [vmem:[#allocation2 + $0x3a0] ss:$8 sps:$4 sm:$0xff]  }
  0xd0   :  { %2635 = vmatpush2.bf16.msra.mxu0 %v6496_v38  ;;  %v6570_v38 = vld [vmem:[#allocation2 + $0x210] ss:$8 sps:$4 sm:$0xff]  }
  0xd1   :  { %2678 = vmatpush2.bf16.msra.mxu1 %v6497_v39  ;;  %2636 = vmatprep.subr.bf16.mxu0 %v6498_v40  ;;  %v6573_v39 = vld [vmem:[#allocation2 + $0x310] ss:$8 sps:$4 sm:$0xff]   ;;  %v233_v40 = vld [vmem:[%s8128_s0 + $0x28] sm:$0xff] }
  0xd2   :  { %2679 = vmatprep.subr.bf16.mxu1 %v6500_v41  ;;  %v257_v41 = vld [vmem:[%s8128_s0 + $0xe8] sm:$0xff] }
  0xd4   :  { %2637 = vmatpush2.bf16.msra.mxu0 %v6502_v42  ;;  %v235_v42 = vld [vmem:[%s8128_s0 + $0x38] sm:$0xff] }
  0xd5   :  { %2680 = vmatpush2.bf16.msra.mxu1 %v6503_v43  ;;  %2638 = vmatprep.subr.bf16.mxu0 %v6504_v44  ;;  %v6578_v43 = vld [vmem:[#allocation2 + $0x204] ss:$8 sps:$4 sm:$0xff]   ;;  %v283_v47 = vpack.c.bf16 %v259_v46, %v235_v42  ;;  %v6656_v46 = vld [vmem:[#allocation2 + $0x434] ss:$8 sps:$4 sm:$0xff]  }
  0xd6   :  { %2681 = vmatprep.subr.bf16.mxu1 %v6506_v45  ;;  %v6581_v44 = vld [vmem:[#allocation2 + $0x304] ss:$8 sps:$4 sm:$0xff]   ;;  %v281_v45 = vpack.c.bf16 %v257_v41, %v233_v40  ;;  %v6645_v40 = vld [vmem:[#allocation2 + $0x550] ss:$8 sps:$4 sm:$0xff]  }
  0xd7   :  { %v6650_v42 = vld [vmem:[#allocation2 + $0x444] ss:$8 sps:$4 sm:$0xff]  }
  0xd8   :  { %2639 = vmatpush2.bf16.msra.mxu0 %v6508_v50  ;;  %v6584_v50 = vld [vmem:[#allocation2 + $0x2f4] ss:$8 sps:$4 sm:$0xff]  }
  0xd9   :  { %2682 = vmatpush2.bf16.msra.mxu1 %v6509_v51  ;;  %2640 = vmatprep.subr.bf16.mxu0 %v6510_v52  ;;  %v6587_v51 = vld [vmem:[#allocation2 + $0x3f4] ss:$8 sps:$4 sm:$0xff]   ;;  %v6582_v52 = vld [vmem:[#allocation2 + $0x2f0] ss:$8 sps:$4 sm:$0xff]  }
  0xda   :  { %2683 = vmatprep.subr.bf16.mxu1 %v6512_v55  ;;  %v6593_v55 = vld [vmem:[#allocation2 + $0x3e4] ss:$8 sps:$4 sm:$0xff]  }
  0xdc   :  { %2641 = vmatpush2.bf16.msra.mxu0 %v6514_v56  ;;  %v6588_v56 = vld [vmem:[#allocation2 + $0x2e0] ss:$8 sps:$4 sm:$0xff]  }
  0xdd   :  { %2684 = vmatpush2.bf16.msra.mxu1 %v6515_v57  ;;  %2642 = vmatprep.subr.bf16.mxu0 %v6516_v58  ;;  %v6591_v57 = vld [vmem:[#allocation2 + $0x3e0] ss:$8 sps:$4 sm:$0xff]   ;;  %v6596_v58 = vld [vmem:[#allocation2 + $0x2d4] ss:$8 sps:$4 sm:$0xff]  }
  0xde   :  { %2685 = vmatprep.subr.bf16.mxu1 %v6518_v59  ;;  %v6599_v59 = vld [vmem:[#allocation2 + $0x3d4] ss:$8 sps:$4 sm:$0xff]  }
  0xe0   :  { %2643 = vmatpush2.bf16.msra.mxu0 %v6520_v60  ;;  %v6594_v60 = vld [vmem:[#allocation2 + $0x2d0] ss:$8 sps:$4 sm:$0xff]  }
  0xe1   :  { %2686 = vmatpush2.bf16.msra.mxu1 %v6521_v61  ;;  %2644 = vmatprep.subr.bf16.mxu0 %v6522_v62  ;;  %v6597_v61 = vld [vmem:[#allocation2 + $0x3d0] ss:$8 sps:$4 sm:$0xff]   ;;  %v6602_v62 = vld [vmem:[#allocation2 + $0x2c4] ss:$8 sps:$4 sm:$0xff]  }
  0xe2   :  { %2687 = vmatprep.subr.bf16.mxu1 %v6524_v63  ;;  %v6605_v63 = vld [vmem:[#allocation2 + $0x3c4] ss:$8 sps:$4 sm:$0xff]  }
  0xe4   :  { %2645 = vmatpush2.bf16.msra.mxu0 %v6526_v0  ;;  %v6600_v0 = vld [vmem:[#allocation2 + $0x2c0] ss:$8 sps:$4 sm:$0xff]  }
  0xe5   :  { %2688 = vmatpush2.bf16.msra.mxu1 %v6527_v1  ;;  %2646 = vmatprep.subr.bf16.mxu0 %v6528_v2  ;;  %v6603_v1 = vld [vmem:[#allocation2 + $0x3c0] ss:$8 sps:$4 sm:$0xff]   ;;  %v6608_v2 = vld [vmem:[#allocation2 + $0x2b4] ss:$8 sps:$4 sm:$0xff]  }
  0xe6   :  { %2689 = vmatprep.subr.bf16.mxu1 %v6530_v3  ;;  %v6611_v3 = vld [vmem:[#allocation2 + $0x3b4] ss:$8 sps:$4 sm:$0xff]  }
  0xe8   :  { %2647 = vmatpush2.bf16.msra.mxu0 %v6532_v4  ;;  %v6606_v4 = vld [vmem:[#allocation2 + $0x2b0] ss:$8 sps:$4 sm:$0xff]  }
  0xe9   :  { %2690 = vmatpush2.bf16.msra.mxu1 %v6533_v5  ;;  %2702 = vmatprep.subr.bf16.mxu0 %v6536_v10  ;;  %v6609_v5 = vld [vmem:[#allocation2 + $0x3b0] ss:$8 sps:$4 sm:$0xff]   ;;  %v6620_v10 = vld [vmem:[#allocation2 + $0x294] ss:$8 sps:$4 sm:$0xff]  }
  0xea   :  { %2745 = vmatprep.subr.bf16.mxu1 %v6539_v11  ;;  %v6623_v11 = vld [vmem:[#allocation2 + $0x394] ss:$8 sps:$4 sm:$0xff]  }
  0xeb   :  { %2649 = vmatmul.mubr.bf16.vlgmr.msra.gmra.mxu0 %v276_v12  ;;  %v6618_v12 = vld [vmem:[#allocation2 + $0x290] ss:$8 sps:$4 sm:$0xff]  }
  0xec   :  { %2692 = vmatmul.mubr.bf16.vlgmr.msra.gmra.mxu1 %v278_v13  ;;  %2703 = vmatpush1.bf16.msra.mxu0 %v6534_v14  ;;  %v6621_v13 = vld [vmem:[#allocation2 + $0x390] ss:$8 sps:$4 sm:$0xff]   ;;  %v6626_v14 = vld [vmem:[#allocation2 + $0x284] ss:$8 sps:$4 sm:$0xff]  }
  0xed   :  { %2746 = vmatpush1.bf16.msra.mxu1 %v6537_v15  ;;  %2704 = vmatprep.subr.bf16.mxu0 %v6542_v16  ;;  %v6629_v15 = vld [vmem:[#allocation2 + $0x384] ss:$8 sps:$4 sm:$0xff]   ;;  %v6624_v16 = vld [vmem:[#allocation2 + $0x280] ss:$8 sps:$4 sm:$0xff]  }
  0xee   :  { %2747 = vmatprep.subr.bf16.mxu1 %v6545_v17  ;;  %2734 = vmatprep.mubr.bf16.mxu0 %v281_v45  ;;  %v6627_v17 = vld [vmem:[#allocation2 + $0x380] ss:$8 sps:$4 sm:$0xff]  }
  0xef   :  { %2777 = vmatprep.mubr.bf16.mxu1 %v283_v47  ;;  %v6651_v45 = vld [vmem:[#allocation2 + $0x540] ss:$8 sps:$4 sm:$0xff]   ;;  %v6659_v47 = vld [vmem:[#allocation2 + $0x534] ss:$8 sps:$4 sm:$0xff]  }
  0xf0   :  { %2705 = vmatpush1.bf16.msra.mxu0 %v6540_v18  ;;  %v232_v18 = vld [vmem:[%s8128_s0 + $0x20] sm:$0xff] }
  0xf1   :  { %2748 = vmatpush1.bf16.msra.mxu1 %v6543_v19  ;;  %2706 = vmatprep.subr.bf16.mxu0 %v6548_v20  ;;  %v256_v19 = vld [vmem:[%s8128_s0 + $0xe0] sm:$0xff]  ;;  %v234_v20 = vld [vmem:[%s8128_s0 + $0x30] sm:$0xff] }
  0xf2   :  { %2749 = vmatprep.subr.bf16.mxu1 %v6551_v21  ;;  %v258_v21 = vld [vmem:[%s8128_s0 + $0xf0] sm:$0xff] }
  0xf4   :  { %2707 = vmatpush1.bf16.msra.mxu0 %v6546_v22  ;;  %v6632_v22 = vld [vmem:[#allocation2 + $0x474] ss:$8 sps:$4 sm:$0xff]  }
  0xf5   :  { %2750 = vmatpush1.bf16.msra.mxu1 %v6549_v23  ;;  %2708 = vmatprep.subr.bf16.mxu0 %v6554_v24  ;;  %v6635_v23 = vld [vmem:[#allocation2 + $0x574] ss:$8 sps:$4 sm:$0xff]   ;;  %v280_v24 = vpack.c.bf16 %v256_v19, %v232_v18  ;;  %v6710_v18 = vld [vmem:[#allocation2 + $0x4a4] ss:$8 sps:$4 sm:$0xff]  }
  0xf6   :  { %2751 = vmatprep.subr.bf16.mxu1 %v6557_v25  ;;  %v282_v25 = vpack.c.bf16 %v258_v21, %v234_v20  ;;  %v6713_v19 = vld [vmem:[#allocation2 + $0x5a4] ss:$8 sps:$4 sm:$0xff]   ;;  %v6708_v20 = vld [vmem:[#allocation2 + $0x4a0] ss:$8 sps:$4 sm:$0xff]  }
  0xf7   :  { %v6711_v21 = vld [vmem:[#allocation2 + $0x5a0] ss:$8 sps:$4 sm:$0xff]  }
  0xf8   :  { %2709 = vmatpush1.bf16.msra.mxu0 %v6552_v26  ;;  %v6630_v26 = vld [vmem:[#allocation2 + $0x470] ss:$8 sps:$4 sm:$0xff]  }
  0xf9   :  { %2752 = vmatpush1.bf16.msra.mxu1 %v6555_v27  ;;  %2710 = vmatprep.subr.bf16.mxu0 %v6560_v28  ;;  %v6633_v27 = vld [vmem:[#allocation2 + $0x570] ss:$8 sps:$4 sm:$0xff]   ;;  %v6638_v28 = vld [vmem:[#allocation2 + $0x464] ss:$8 sps:$4 sm:$0xff]  }
  0xfa   :  { %2753 = vmatprep.subr.bf16.mxu1 %v6563_v29  ;;  %v6641_v29 = vld [vmem:[#allocation2 + $0x564] ss:$8 sps:$4 sm:$0xff]  }
  0xfc   :  { %2711 = vmatpush1.bf16.msra.mxu0 %v6558_v30  ;;  %v6636_v30 = vld [vmem:[#allocation2 + $0x460] ss:$8 sps:$4 sm:$0xff]  }
  0xfd   :  { %2754 = vmatpush1.bf16.msra.mxu1 %v6561_v31  ;;  %2712 = vmatprep.subr.bf16.mxu0 %v6566_v32  ;;  %v6639_v31 = vld [vmem:[#allocation2 + $0x560] ss:$8 sps:$4 sm:$0xff]   ;;  %v6644_v32 = vld [vmem:[#allocation2 + $0x454] ss:$8 sps:$4 sm:$0xff]  }
  0xfe   :  { %2755 = vmatprep.subr.bf16.mxu1 %v6569_v33  ;;  %v6647_v33 = vld [vmem:[#allocation2 + $0x554] ss:$8 sps:$4 sm:$0xff]  }
 0x100   :  { %2713 = vmatpush1.bf16.msra.mxu0 %v6564_v34  ;;  %v237_v34 = vld [vmem:[%s8128_s0 + $0x48] sm:$0xff] }
 0x101   :  { %2756 = vmatpush1.bf16.msra.mxu1 %v6567_v35  ;;  %2714 = vmatprep.subr.bf16.mxu0 %v6572_v36  ;;  %v261_v35 = vld [vmem:[%s8128_s0 + $0x108] sm:$0xff] }
 0x102   :  { %2757 = vmatprep.subr.bf16.mxu1 %v6575_v37  ;;  %v285_v36 = vpack.c.bf16 %v261_v35, %v237_v34  ;;  %v239_v37 = vld [vmem:[%s8128_s0 + $0x58] sm:$0xff] }
 0x103   :  { %v6728_v34 = vld [vmem:[#allocation2 + $0x674] ss:$8 sps:$4 sm:$0xff]  }
 0x104   :  { %2715 = vmatpush1.bf16.msra.mxu0 %v6570_v38  ;;  %v263_v38 = vld [vmem:[%s8128_s0 + $0x118] sm:$0xff] }
 0x105   :  { %2758 = vmatpush1.bf16.msra.mxu1 %v6573_v39  ;;  %2716 = vmatprep.subr.bf16.mxu0 %v6578_v43  ;;  %v6642_v39 = vld [vmem:[#allocation2 + $0x450] ss:$8 sps:$4 sm:$0xff]   ;;  %v287_v41 = vpack.c.bf16 %v263_v38, %v239_v37  ;;  %v6653_v43 = vld [vmem:[#allocation2 + $0x544] ss:$8 sps:$4 sm:$0xff]   ;;  %v6731_v35 = vld [vmem:[#allocation2 + $0x774] ss:$8 sps:$4 sm:$0xff]  }
 0x106   :  { %2759 = vmatprep.subr.bf16.mxu1 %v6581_v44  ;;  %v6648_v44 = vld [vmem:[#allocation2 + $0x440] ss:$8 sps:$4 sm:$0xff]   ;;  %v6726_v37 = vld [vmem:[#allocation2 + $0x670] ss:$8 sps:$4 sm:$0xff]  }
 0x107   :  { %v265_v38 = vld [vmem:[%s8128_s0 + $0x128] sm:$0xff] }
 0x108   :  { %2717 = vmatpush1.bf16.msra.mxu0 %v6576_v48  ;;  %v6654_v48 = vld [vmem:[#allocation2 + $0x430] ss:$8 sps:$4 sm:$0xff]  }
 0x109   :  { %2760 = vmatpush1.bf16.msra.mxu1 %v6579_v49  ;;  %2718 = vmatprep.subr.bf16.mxu0 %v6584_v50  ;;  %v6657_v49 = vld [vmem:[#allocation2 + $0x530] ss:$8 sps:$4 sm:$0xff]   ;;  %v6662_v50 = vld [vmem:[#allocation2 + $0x424] ss:$8 sps:$4 sm:$0xff]  }
 0x10a   :  { %2761 = vmatprep.subr.bf16.mxu1 %v6587_v51  ;;  %v6665_v51 = vld [vmem:[#allocation2 + $0x524] ss:$8 sps:$4 sm:$0xff]  }
 0x10c   :  { %2719 = vmatpush2.bf16.msra.mxu0 %v6582_v52  ;;  %v6660_v52 = vld [vmem:[#allocation2 + $0x420] ss:$8 sps:$4 sm:$0xff]  }
 0x10d   :  { %2762 = vmatpush2.bf16.msra.mxu1 %v6585_v53  ;;  %2720 = vmatprep.subr.bf16.mxu0 %v6590_v54  ;;  %v6663_v53 = vld [vmem:[#allocation2 + $0x520] ss:$8 sps:$4 sm:$0xff]   ;;  %v6668_v54 = vld [vmem:[#allocation2 + $0x414] ss:$8 sps:$4 sm:$0xff]  }
 0x10e   :  { %2763 = vmatprep.subr.bf16.mxu1 %v6593_v55  ;;  %v6671_v55 = vld [vmem:[#allocation2 + $0x514] ss:$8 sps:$4 sm:$0xff]  }
 0x110   :  { %2721 = vmatpush2.bf16.msra.mxu0 %v6588_v56  ;;  %v6666_v56 = vld [vmem:[#allocation2 + $0x410] ss:$8 sps:$4 sm:$0xff]  }
 0x111   :  { %2764 = vmatpush2.bf16.msra.mxu1 %v6591_v57  ;;  %2722 = vmatprep.subr.bf16.mxu0 %v6596_v58  ;;  %v6669_v57 = vld [vmem:[#allocation2 + $0x510] ss:$8 sps:$4 sm:$0xff]   ;;  %v6674_v58 = vld [vmem:[#allocation2 + $0x404] ss:$8 sps:$4 sm:$0xff]  }
 0x112   :  { %2765 = vmatprep.subr.bf16.mxu1 %v6599_v59  ;;  %v6677_v59 = vld [vmem:[#allocation2 + $0x504] ss:$8 sps:$4 sm:$0xff]  }
 0x114   :  { %2723 = vmatpush2.bf16.msra.mxu0 %v6594_v60  ;;  %v6672_v60 = vld [vmem:[#allocation2 + $0x400] ss:$8 sps:$4 sm:$0xff]  }
 0x115   :  { %2766 = vmatpush2.bf16.msra.mxu1 %v6597_v61  ;;  %2724 = vmatprep.subr.bf16.mxu0 %v6602_v62  ;;  %v6675_v61 = vld [vmem:[#allocation2 + $0x500] ss:$8 sps:$4 sm:$0xff]   ;;  %v6680_v62 = vld [vmem:[#allocation2 + $0x4f4] ss:$8 sps:$4 sm:$0xff]  }
 0x116   :  { %2767 = vmatprep.subr.bf16.mxu1 %v6605_v63  ;;  %v6683_v63 = vld [vmem:[#allocation2 + $0x5f4] ss:$8 sps:$4 sm:$0xff]  }
 0x118   :  { %2725 = vmatpush2.bf16.msra.mxu0 %v6600_v0  ;;  %v6678_v0 = vld [vmem:[#allocation2 + $0x4f0] ss:$8 sps:$4 sm:$0xff]  }
 0x119   :  { %2768 = vmatpush2.bf16.msra.mxu1 %v6603_v1  ;;  %2726 = vmatprep.subr.bf16.mxu0 %v6608_v2  ;;  %v6681_v1 = vld [vmem:[#allocation2 + $0x5f0] ss:$8 sps:$4 sm:$0xff]   ;;  %v6686_v2 = vld [vmem:[#allocation2 + $0x4e4] ss:$8 sps:$4 sm:$0xff]  }
 0x11a   :  { %2769 = vmatprep.subr.bf16.mxu1 %v6611_v3  ;;  %v6689_v3 = vld [vmem:[#allocation2 + $0x5e4] ss:$8 sps:$4 sm:$0xff]  }
 0x11c   :  { %2727 = vmatpush2.bf16.msra.mxu0 %v6606_v4  ;;  %v6684_v4 = vld [vmem:[#allocation2 + $0x4e0] ss:$8 sps:$4 sm:$0xff]  }
 0x11d   :  { %2770 = vmatpush2.bf16.msra.mxu1 %v6609_v5  ;;  %2728 = vmatprep.subr.bf16.mxu0 %v6614_v6  ;;  %v6687_v5 = vld [vmem:[#allocation2 + $0x5e0] ss:$8 sps:$4 sm:$0xff]   ;;  %v6692_v6 = vld [vmem:[#allocation2 + $0x4d4] ss:$8 sps:$4 sm:$0xff]  }
 0x11e   :  { %2771 = vmatprep.subr.bf16.mxu1 %v6617_v7  ;;  %v6695_v7 = vld [vmem:[#allocation2 + $0x5d4] ss:$8 sps:$4 sm:$0xff]  }
 0x120   :  { %2729 = vmatpush2.bf16.msra.mxu0 %v6612_v8  ;;  %v6690_v8 = vld [vmem:[#allocation2 + $0x4d0] ss:$8 sps:$4 sm:$0xff]  }
 0x121   :  { %2772 = vmatpush2.bf16.msra.mxu1 %v6615_v9  ;;  %2730 = vmatprep.subr.bf16.mxu0 %v6620_v10  ;;  %v6693_v9 = vld [vmem:[#allocation2 + $0x5d0] ss:$8 sps:$4 sm:$0xff]   ;;  %v6698_v10 = vld [vmem:[#allocation2 + $0x4c4] ss:$8 sps:$4 sm:$0xff]  }
 0x122   :  { %2773 = vmatprep.subr.bf16.mxu1 %v6623_v11  ;;  %v6701_v11 = vld [vmem:[#allocation2 + $0x5c4] ss:$8 sps:$4 sm:$0xff]  }
 0x124   :  { %2731 = vmatpush2.bf16.msra.mxu0 %v6618_v12  ;;  %v6696_v12 = vld [vmem:[#allocation2 + $0x4c0] ss:$8 sps:$4 sm:$0xff]  }
 0x125   :  { %2774 = vmatpush2.bf16.msra.mxu1 %v6621_v13  ;;  %2732 = vmatprep.subr.bf16.mxu0 %v6626_v14  ;;  %v6699_v13 = vld [vmem:[#allocation2 + $0x5c0] ss:$8 sps:$4 sm:$0xff]   ;;  %v6704_v14 = vld [vmem:[#allocation2 + $0x4b4] ss:$8 sps:$4 sm:$0xff]  }
 0x126   :  { %2775 = vmatprep.subr.bf16.mxu1 %v6629_v15  ;;  %v6707_v15 = vld [vmem:[#allocation2 + $0x5b4] ss:$8 sps:$4 sm:$0xff]  }
 0x128   :  { %2733 = vmatpush2.bf16.msra.mxu0 %v6624_v16  ;;  %v6702_v16 = vld [vmem:[#allocation2 + $0x4b0] ss:$8 sps:$4 sm:$0xff]  }
 0x129   :  { %2776 = vmatpush2.bf16.msra.mxu1 %v6627_v17  ;;  %2788 = vmatprep.subr.bf16.mxu0 %v6632_v22  ;;  %v6705_v17 = vld [vmem:[#allocation2 + $0x5b0] ss:$8 sps:$4 sm:$0xff]   ;;  %v6716_v22 = vld [vmem:[#allocation2 + $0x494] ss:$8 sps:$4 sm:$0xff]  }
 0x12a   :  { %2831 = vmatprep.subr.bf16.mxu1 %v6635_v23  ;;  %v6719_v23 = vld [vmem:[#allocation2 + $0x594] ss:$8 sps:$4 sm:$0xff]  }
 0x12b   :  { %2735 = vmatmul.mubr.bf16.vlgmr.msra.gmra.mxu0 %v280_v24  ;;  %v6714_v24 = vld [vmem:[#allocation2 + $0x490] ss:$8 sps:$4 sm:$0xff]  }
 0x12c   :  { %2778 = vmatmul.mubr.bf16.vlgmr.msra.gmra.mxu1 %v282_v25  ;;  %2789 = vmatpush1.bf16.msra.mxu0 %v6630_v26  ;;  %v6717_v25 = vld [vmem:[#allocation2 + $0x590] ss:$8 sps:$4 sm:$0xff]   ;;  %v6722_v26 = vld [vmem:[#allocation2 + $0x484] ss:$8 sps:$4 sm:$0xff]  }
 0x12d   :  { %2832 = vmatpush1.bf16.msra.mxu1 %v6633_v27  ;;  %2790 = vmatprep.subr.bf16.mxu0 %v6638_v28  ;;  %v6725_v27 = vld [vmem:[#allocation2 + $0x584] ss:$8 sps:$4 sm:$0xff]   ;;  %v6720_v28 = vld [vmem:[#allocation2 + $0x480] ss:$8 sps:$4 sm:$0xff]  }
 0x12e   :  { %2833 = vmatprep.subr.bf16.mxu1 %v6641_v29  ;;  %2820 = vmatprep.mubr.bf16.mxu0 %v285_v36  ;;  %v6723_v29 = vld [vmem:[#allocation2 + $0x580] ss:$8 sps:$4 sm:$0xff]  }
 0x12f   :  { %2863 = vmatprep.mubr.bf16.mxu1 %v287_v41  ;;  %v241_v36 = vld [vmem:[%s8128_s0 + $0x68] sm:$0xff] }
 0x130   :  { %2791 = vmatpush1.bf16.msra.mxu0 %v6636_v30  ;;  %v236_v30 = vld [vmem:[%s8128_s0 + $0x40] sm:$0xff] }
 0x131   :  { %2834 = vmatpush1.bf16.msra.mxu1 %v6639_v31  ;;  %2792 = vmatprep.subr.bf16.mxu0 %v6644_v32  ;;  %v260_v31 = vld [vmem:[%s8128_s0 + $0x100] sm:$0xff]  ;;  %v238_v32 = vld [vmem:[%s8128_s0 + $0x50] sm:$0xff] }
 0x132   :  { %2835 = vmatprep.subr.bf16.mxu1 %v6647_v33  ;;  %v262_v33 = vld [vmem:[%s8128_s0 + $0x110] sm:$0xff] }
 0x133   :  { %v286_v41 = vpack.c.bf16 %v262_v33, %v238_v32  ;;  %v6804_v32 = vld [vmem:[#allocation2 + $0x6a0] ss:$8 sps:$4 sm:$0xff]  }
 0x134   :  { %2793 = vmatpush1.bf16.msra.mxu0 %v6642_v39  ;;  %v243_v39 = vld [vmem:[%s8128_s0 + $0x78] sm:$0xff]  ;;  %v6807_v33 = vld [vmem:[#allocation2 + $0x7a0] ss:$8 sps:$4 sm:$0xff]  }
 0x135   :  { %2836 = vmatpush1.bf16.msra.mxu1 %v6645_v40  ;;  %2794 = vmatprep.subr.bf16.mxu0 %v6650_v42  ;;  %v284_v40 = vpack.c.bf16 %v260_v31, %v236_v30  ;;  %v267_v42 = vld [vmem:[%s8128_s0 + $0x138] sm:$0xff]  ;;  %v6806_v30 = vld [vmem:[#allocation2 + $0x6a4] ss:$8 sps:$4 sm:$0xff]  }
 0x136   :  { %2837 = vmatprep.subr.bf16.mxu1 %v6653_v43  ;;  %v6729_v43 = vld [vmem:[#allocation2 + $0x770] ss:$8 sps:$4 sm:$0xff]   ;;  %v6809_v31 = vld [vmem:[#allocation2 + $0x7a4] ss:$8 sps:$4 sm:$0xff]  }
 0x138   :  { %2795 = vmatpush1.bf16.msra.mxu0 %v6648_v44  ;;  %v6734_v44 = vld [vmem:[#allocation2 + $0x664] ss:$8 sps:$4 sm:$0xff]  }
 0x139   :  { %2838 = vmatpush1.bf16.msra.mxu1 %v6651_v45  ;;  %2796 = vmatprep.subr.bf16.mxu0 %v6656_v46  ;;  %v6737_v45 = vld [vmem:[#allocation2 + $0x764] ss:$8 sps:$4 sm:$0xff]   ;;  %v289_v46 = vpack.c.bf16 %v265_v38, %v241_v36  ;;  %v6810_v36 = vld [vmem:[#allocation2 + $0x690] ss:$8 sps:$4 sm:$0xff]  }
 0x13a   :  { %2839 = vmatprep.subr.bf16.mxu1 %v6659_v47  ;;  %v291_v47 = vpack.c.bf16 %v267_v42, %v243_v39  ;;  %v6818_v38 = vld [vmem:[#allocation2 + $0x684] ss:$8 sps:$4 sm:$0xff]  }
 0x13b   :  { %v6821_v39 = vld [vmem:[#allocation2 + $0x784] ss:$8 sps:$4 sm:$0xff]  }
 0x13c   :  { %2797 = vmatpush1.bf16.msra.mxu0 %v6654_v48  ;;  %v6732_v48 = vld [vmem:[#allocation2 + $0x660] ss:$8 sps:$4 sm:$0xff]  }
 0x13d   :  { %2840 = vmatpush1.bf16.msra.mxu1 %v6657_v49  ;;  %2798 = vmatprep.subr.bf16.mxu0 %v6662_v50  ;;  %v6735_v49 = vld [vmem:[#allocation2 + $0x760] ss:$8 sps:$4 sm:$0xff]   ;;  %v6740_v50 = vld [vmem:[#allocation2 + $0x654] ss:$8 sps:$4 sm:$0xff]  }
 0x13e   :  { %2841 = vmatprep.subr.bf16.mxu1 %v6665_v51  ;;  %v6743_v51 = vld [vmem:[#allocation2 + $0x754] ss:$8 sps:$4 sm:$0xff]   ;;  %v240_v42 = vld [vmem:[%s8128_s0 + $0x60] sm:$0xff] }
 0x140   :  { %2799 = vmatpush1.bf16.msra.mxu0 %v6660_v52  ;;  %v6738_v52 = vld [vmem:[#allocation2 + $0x650] ss:$8 sps:$4 sm:$0xff]  }
 0x141   :  { %2842 = vmatpush1.bf16.msra.mxu1 %v6663_v53  ;;  %2800 = vmatprep.subr.bf16.mxu0 %v6668_v54  ;;  %v6741_v53 = vld [vmem:[#allocation2 + $0x750] ss:$8 sps:$4 sm:$0xff]   ;;  %v6746_v54 = vld [vmem:[#allocation2 + $0x644] ss:$8 sps:$4 sm:$0xff]  }
 0x142   :  { %2843 = vmatprep.subr.bf16.mxu1 %v6671_v55  ;;  %v6749_v55 = vld [vmem:[#allocation2 + $0x744] ss:$8 sps:$4 sm:$0xff]  }
 0x144   :  { %2801 = vmatpush1.bf16.msra.mxu0 %v6666_v56  ;;  %v6744_v56 = vld [vmem:[#allocation2 + $0x640] ss:$8 sps:$4 sm:$0xff]  }
 0x145   :  { %2844 = vmatpush1.bf16.msra.mxu1 %v6669_v57  ;;  %2802 = vmatprep.subr.bf16.mxu0 %v6674_v58  ;;  %v6747_v57 = vld [vmem:[#allocation2 + $0x740] ss:$8 sps:$4 sm:$0xff]   ;;  %v6752_v58 = vld [vmem:[#allocation2 + $0x634] ss:$8 sps:$4 sm:$0xff]  }
 0x146   :  { %2845 = vmatprep.subr.bf16.mxu1 %v6677_v59  ;;  %v6755_v59 = vld [vmem:[#allocation2 + $0x734] ss:$8 sps:$4 sm:$0xff]  }
 0x148   :  { %2803 = vmatpush1.bf16.msra.mxu0 %v6672_v60  ;;  %v6750_v60 = vld [vmem:[#allocation2 + $0x630] ss:$8 sps:$4 sm:$0xff]  }
 0x149   :  { %2846 = vmatpush1.bf16.msra.mxu1 %v6675_v61  ;;  %2804 = vmatprep.subr.bf16.mxu0 %v6680_v62  ;;  %v6753_v61 = vld [vmem:[#allocation2 + $0x730] ss:$8 sps:$4 sm:$0xff]   ;;  %v6758_v62 = vld [vmem:[#allocation2 + $0x624] ss:$8 sps:$4 sm:$0xff]  }
 0x14a   :  { %2847 = vmatprep.subr.bf16.mxu1 %v6683_v63  ;;  %v6761_v63 = vld [vmem:[#allocation2 + $0x724] ss:$8 sps:$4 sm:$0xff]  }
 0x14c   :  { %2805 = vmatpush2.bf16.msra.mxu0 %v6678_v0  ;;  %v6756_v0 = vld [vmem:[#allocation2 + $0x620] ss:$8 sps:$4 sm:$0xff]  }
 0x14d   :  { %2848 = vmatpush2.bf16.msra.mxu1 %v6681_v1  ;;  %2806 = vmatprep.subr.bf16.mxu0 %v6686_v2  ;;  %v6759_v1 = vld [vmem:[#allocation2 + $0x720] ss:$8 sps:$4 sm:$0xff]   ;;  %v6764_v2 = vld [vmem:[#allocation2 + $0x614] ss:$8 sps:$4 sm:$0xff]  }
 0x14e   :  { %2849 = vmatprep.subr.bf16.mxu1 %v6689_v3  ;;  %v6767_v3 = vld [vmem:[#allocation2 + $0x714] ss:$8 sps:$4 sm:$0xff]  }
 0x150   :  { %2807 = vmatpush2.bf16.msra.mxu0 %v6684_v4  ;;  %v6762_v4 = vld [vmem:[#allocation2 + $0x610] ss:$8 sps:$4 sm:$0xff]  }
 0x151   :  { %2850 = vmatpush2.bf16.msra.mxu1 %v6687_v5  ;;  %2808 = vmatprep.subr.bf16.mxu0 %v6692_v6  ;;  %v6765_v5 = vld [vmem:[#allocation2 + $0x710] ss:$8 sps:$4 sm:$0xff]   ;;  %v6770_v6 = vld [vmem:[#allocation2 + $0x604] ss:$8 sps:$4 sm:$0xff]  }
 0x152   :  { %2851 = vmatprep.subr.bf16.mxu1 %v6695_v7  ;;  %v6773_v7 = vld [vmem:[#allocation2 + $0x704] ss:$8 sps:$4 sm:$0xff]  }
 0x154   :  { %2809 = vmatpush2.bf16.msra.mxu0 %v6690_v8  ;;  %v6768_v8 = vld [vmem:[#allocation2 + $0x600] ss:$8 sps:$4 sm:$0xff]  }
 0x155   :  { %2852 = vmatpush2.bf16.msra.mxu1 %v6693_v9  ;;  %2810 = vmatprep.subr.bf16.mxu0 %v6698_v10  ;;  %v6771_v9 = vld [vmem:[#allocation2 + $0x700] ss:$8 sps:$4 sm:$0xff]   ;;  %v6776_v10 = vld [vmem:[#allocation2 + $0x6f4] ss:$8 sps:$4 sm:$0xff]  }
 0x156   :  { %2853 = vmatprep.subr.bf16.mxu1 %v6701_v11  ;;  %v6779_v11 = vld [vmem:[#allocation2 + $0x7f4] ss:$8 sps:$4 sm:$0xff]  }
 0x158   :  { %2811 = vmatpush2.bf16.msra.mxu0 %v6696_v12  ;;  %v6774_v12 = vld [vmem:[#allocation2 + $0x6f0] ss:$8 sps:$4 sm:$0xff]  }
 0x159   :  { %2854 = vmatpush2.bf16.msra.mxu1 %v6699_v13  ;;  %2812 = vmatprep.subr.bf16.mxu0 %v6704_v14  ;;  %v6777_v13 = vld [vmem:[#allocation2 + $0x7f0] ss:$8 sps:$4 sm:$0xff]   ;;  %v6782_v14 = vld [vmem:[#allocation2 + $0x6e4] ss:$8 sps:$4 sm:$0xff]  }
 0x15a   :  { %2855 = vmatprep.subr.bf16.mxu1 %v6707_v15  ;;  %v6785_v15 = vld [vmem:[#allocation2 + $0x7e4] ss:$8 sps:$4 sm:$0xff]  }
 0x15c   :  { %2813 = vmatpush2.bf16.msra.mxu0 %v6702_v16  ;;  %v6780_v16 = vld [vmem:[#allocation2 + $0x6e0] ss:$8 sps:$4 sm:$0xff]  }
 0x15d   :  { %2856 = vmatpush2.bf16.msra.mxu1 %v6705_v17  ;;  %2814 = vmatprep.subr.bf16.mxu0 %v6710_v18  ;;  %v6783_v17 = vld [vmem:[#allocation2 + $0x7e0] ss:$8 sps:$4 sm:$0xff]   ;;  %v6788_v18 = vld [vmem:[#allocation2 + $0x6d4] ss:$8 sps:$4 sm:$0xff]  }
 0x15e   :  { %2857 = vmatprep.subr.bf16.mxu1 %v6713_v19  ;;  %v6791_v19 = vld [vmem:[#allocation2 + $0x7d4] ss:$8 sps:$4 sm:$0xff]  }
 0x160   :  { %2815 = vmatpush2.bf16.msra.mxu0 %v6708_v20  ;;  %v6786_v20 = vld [vmem:[#allocation2 + $0x6d0] ss:$8 sps:$4 sm:$0xff]  }
 0x161   :  { %2858 = vmatpush2.bf16.msra.mxu1 %v6711_v21  ;;  %2816 = vmatprep.subr.bf16.mxu0 %v6716_v22  ;;  %v6789_v21 = vld [vmem:[#allocation2 + $0x7d0] ss:$8 sps:$4 sm:$0xff]   ;;  %v6794_v22 = vld [vmem:[#allocation2 + $0x6c4] ss:$8 sps:$4 sm:$0xff]  }
 0x162   :  { %2859 = vmatprep.subr.bf16.mxu1 %v6719_v23  ;;  %v6797_v23 = vld [vmem:[#allocation2 + $0x7c4] ss:$8 sps:$4 sm:$0xff]  }
 0x164   :  { %2817 = vmatpush2.bf16.msra.mxu0 %v6714_v24  ;;  %v6792_v24 = vld [vmem:[#allocation2 + $0x6c0] ss:$8 sps:$4 sm:$0xff]  }
 0x165   :  { %2860 = vmatpush2.bf16.msra.mxu1 %v6717_v25  ;;  %2818 = vmatprep.subr.bf16.mxu0 %v6722_v26  ;;  %v6795_v25 = vld [vmem:[#allocation2 + $0x7c0] ss:$8 sps:$4 sm:$0xff]   ;;  %v6800_v26 = vld [vmem:[#allocation2 + $0x6b4] ss:$8 sps:$4 sm:$0xff]  }
 0x166   :  { %2861 = vmatprep.subr.bf16.mxu1 %v6725_v27  ;;  %v6803_v27 = vld [vmem:[#allocation2 + $0x7b4] ss:$8 sps:$4 sm:$0xff]  }
 0x168   :  { %2819 = vmatpush2.bf16.msra.mxu0 %v6720_v28  ;;  %v6798_v28 = vld [vmem:[#allocation2 + $0x6b0] ss:$8 sps:$4 sm:$0xff]  }
 0x169   :  { %2862 = vmatpush2.bf16.msra.mxu1 %v6723_v29  ;;  %2874 = vmatprep.subr.bf16.mxu0 %v6728_v34  ;;  %v6801_v29 = vld [vmem:[#allocation2 + $0x7b0] ss:$8 sps:$4 sm:$0xff]   ;;  %v6812_v34 = vld [vmem:[#allocation2 + $0x694] ss:$8 sps:$4 sm:$0xff]  }
 0x16a   :  { %2917 = vmatprep.subr.bf16.mxu1 %v6731_v35  ;;  %v6815_v35 = vld [vmem:[#allocation2 + $0x794] ss:$8 sps:$4 sm:$0xff]  }
 0x16b   :  { %2821 = vmatmul.mubr.bf16.vlgmr.msra.gmra.mxu0 %v284_v40  ;;  %v6816_v40 = vld [vmem:[#allocation2 + $0x680] ss:$8 sps:$4 sm:$0xff]  }
 0x16c   :  { %2864 = vmatmul.mubr.bf16.vlgmr.msra.gmra.mxu1 %v286_v41  ;;  %2875 = vmatpush1.bf16.msra.mxu0 %v6726_v37  ;;  %v6813_v37 = vld [vmem:[#allocation2 + $0x790] ss:$8 sps:$4 sm:$0xff]   ;;  %v6819_v41 = vld [vmem:[#allocation2 + $0x780] ss:$8 sps:$4 sm:$0xff]  }
 0x16d   :  { %2918 = vmatpush1.bf16.msra.mxu1 %v6729_v43  ;;  %2876 = vmatprep.subr.bf16.mxu0 %v6734_v44  ;;  %v264_v43 = vld [vmem:[%s8128_s0 + $0x120] sm:$0xff]  ;;  %v242_v44 = vld [vmem:[%s8128_s0 + $0x70] sm:$0xff] }
 0x16e   :  { %2919 = vmatprep.subr.bf16.mxu1 %v6737_v45  ;;  %2906 = vmatprep.mubr.bf16.mxu0 %v289_v46  ;;  %v266_v45 = vld [vmem:[%s8128_s0 + $0x130] sm:$0xff] }
 0x16f   :  { %2949 = vmatprep.mubr.bf16.mxu1 %v291_v47  ;;  %v6824_v46 = vld [vmem:[#allocation2 + $0x874] ss:$8 sps:$4 sm:$0xff]  }
 0x170   :  { %2877 = vmatpush1.bf16.msra.mxu0 %v6732_v48  ;;  %v6827_v47 = vld [vmem:[#allocation2 + $0x974] ss:$8 sps:$4 sm:$0xff]   ;;  %v245_v48 = vld [vmem:[%s8128_s0 + $0x88] sm:$0xff] }
 0x171   :  { %2920 = vmatpush1.bf16.msra.mxu1 %v6735_v49  ;;  %2878 = vmatprep.subr.bf16.mxu0 %v6740_v50  ;;  %v6822_v49 = vld [vmem:[#allocation2 + $0x870] ss:$8 sps:$4 sm:$0xff]   ;;  %v269_v50 = vld [vmem:[%s8128_s0 + $0x148] sm:$0xff] }
 0x172   :  { %2921 = vmatprep.subr.bf16.mxu1 %v6743_v51  ;;  %v247_v51 = vld [vmem:[%s8128_s0 + $0x98] sm:$0xff] }
 0x174   :  { %2879 = vmatpush1.bf16.msra.mxu0 %v6738_v52  ;;  %v288_v52 = vpack.c.bf16 %v264_v43, %v240_v42  ;;  %v6902_v42 = vld [vmem:[#allocation2 + $0x8a4] ss:$8 sps:$4 sm:$0xff]  }
 0x175   :  { %2922 = vmatpush1.bf16.msra.mxu1 %v6741_v53  ;;  %2880 = vmatprep.subr.bf16.mxu0 %v6746_v54  ;;  %v290_v53 = vpack.c.bf16 %v266_v45, %v242_v44  ;;  %v271_v54 = vld [vmem:[%s8128_s0 + $0x158] sm:$0xff]  ;;  %v6905_v43 = vld [vmem:[#allocation2 + $0x9a4] ss:$8 sps:$4 sm:$0xff]   ;;  %v6900_v44 = vld [vmem:[#allocation2 + $0x8a0] ss:$8 sps:$4 sm:$0xff]  }
 0x176   :  { %2923 = vmatprep.subr.bf16.mxu1 %v6749_v55  ;;  %v6825_v55 = vld [vmem:[#allocation2 + $0x970] ss:$8 sps:$4 sm:$0xff]   ;;  %v6903_v45 = vld [vmem:[#allocation2 + $0x9a0] ss:$8 sps:$4 sm:$0xff]  }
 0x178   :  { %2881 = vmatpush1.bf16.msra.mxu0 %v6744_v56  ;;  %v6830_v56 = vld [vmem:[#allocation2 + $0x864] ss:$8 sps:$4 sm:$0xff]  }
 0x179   :  { %2924 = vmatpush1.bf16.msra.mxu1 %v6747_v57  ;;  %2882 = vmatprep.subr.bf16.mxu0 %v6752_v58  ;;  %v6833_v57 = vld [vmem:[#allocation2 + $0x964] ss:$8 sps:$4 sm:$0xff]   ;;  %v293_v58 = vpack.c.bf16 %v269_v50, %v245_v48  ;;  %v6906_v48 = vld [vmem:[#allocation2 + $0x890] ss:$8 sps:$4 sm:$0xff]  }
 0x17a   :  { %2925 = vmatprep.subr.bf16.mxu1 %v6755_v59  ;;  %v295_v59 = vpack.c.bf16 %v271_v54, %v247_v51  ;;  %v6914_v50 = vld [vmem:[#allocation2 + $0x884] ss:$8 sps:$4 sm:$0xff]  }
 0x17b   :  { %v6917_v51 = vld [vmem:[#allocation2 + $0x984] ss:$8 sps:$4 sm:$0xff]  }
 0x17c   :  { %2883 = vmatpush1.bf16.msra.mxu0 %v6750_v60  ;;  %v6828_v60 = vld [vmem:[#allocation2 + $0x860] ss:$8 sps:$4 sm:$0xff]  }
 0x17d   :  { %2926 = vmatpush1.bf16.msra.mxu1 %v6753_v61  ;;  %2884 = vmatprep.subr.bf16.mxu0 %v6758_v62  ;;  %v6831_v61 = vld [vmem:[#allocation2 + $0x960] ss:$8 sps:$4 sm:$0xff]   ;;  %v6836_v62 = vld [vmem:[#allocation2 + $0x854] ss:$8 sps:$4 sm:$0xff]  }
 0x17e   :  { %2927 = vmatprep.subr.bf16.mxu1 %v6761_v63  ;;  %v6839_v63 = vld [vmem:[#allocation2 + $0x954] ss:$8 sps:$4 sm:$0xff]   ;;  %v244_v54 = vld [vmem:[%s8128_s0 + $0x80] sm:$0xff] }
 0x180   :  { %2885 = vmatpush1.bf16.msra.mxu0 %v6756_v0  ;;  %v6834_v0 = vld [vmem:[#allocation2 + $0x850] ss:$8 sps:$4 sm:$0xff]  }
 0x181   :  { %2928 = vmatpush1.bf16.msra.mxu1 %v6759_v1  ;;  %2886 = vmatprep.subr.bf16.mxu0 %v6764_v2  ;;  %v6837_v1 = vld [vmem:[#allocation2 + $0x950] ss:$8 sps:$4 sm:$0xff]   ;;  %v6842_v2 = vld [vmem:[#allocation2 + $0x844] ss:$8 sps:$4 sm:$0xff]  }
 0x182   :  { %2929 = vmatprep.subr.bf16.mxu1 %v6767_v3  ;;  %v6845_v3 = vld [vmem:[#allocation2 + $0x944] ss:$8 sps:$4 sm:$0xff]  }
 0x184   :  { %2887 = vmatpush1.bf16.msra.mxu0 %v6762_v4  ;;  %v6840_v4 = vld [vmem:[#allocation2 + $0x840] ss:$8 sps:$4 sm:$0xff]  }
 0x185   :  { %2930 = vmatpush1.bf16.msra.mxu1 %v6765_v5  ;;  %2888 = vmatprep.subr.bf16.mxu0 %v6770_v6  ;;  %v6843_v5 = vld [vmem:[#allocation2 + $0x940] ss:$8 sps:$4 sm:$0xff]   ;;  %v6848_v6 = vld [vmem:[#allocation2 + $0x834] ss:$8 sps:$4 sm:$0xff]  }
 0x186   :  { %2931 = vmatprep.subr.bf16.mxu1 %v6773_v7  ;;  %v6851_v7 = vld [vmem:[#allocation2 + $0x934] ss:$8 sps:$4 sm:$0xff]  }
 0x188   :  { %2889 = vmatpush1.bf16.msra.mxu0 %v6768_v8  ;;  %v6846_v8 = vld [vmem:[#allocation2 + $0x830] ss:$8 sps:$4 sm:$0xff]  }
 0x189   :  { %2932 = vmatpush1.bf16.msra.mxu1 %v6771_v9  ;;  %2890 = vmatprep.subr.bf16.mxu0 %v6776_v10  ;;  %v6849_v9 = vld [vmem:[#allocation2 + $0x930] ss:$8 sps:$4 sm:$0xff]   ;;  %v6854_v10 = vld [vmem:[#allocation2 + $0x824] ss:$8 sps:$4 sm:$0xff]  }
 0x18a   :  { %2933 = vmatprep.subr.bf16.mxu1 %v6779_v11  ;;  %v6857_v11 = vld [vmem:[#allocation2 + $0x924] ss:$8 sps:$4 sm:$0xff]  }
 0x18c   :  { %2891 = vmatpush2.bf16.msra.mxu0 %v6774_v12  ;;  %v6852_v12 = vld [vmem:[#allocation2 + $0x820] ss:$8 sps:$4 sm:$0xff]  }
 0x18d   :  { %2934 = vmatpush2.bf16.msra.mxu1 %v6777_v13  ;;  %2892 = vmatprep.subr.bf16.mxu0 %v6782_v14  ;;  %v6855_v13 = vld [vmem:[#allocation2 + $0x920] ss:$8 sps:$4 sm:$0xff]   ;;  %v6860_v14 = vld [vmem:[#allocation2 + $0x814] ss:$8 sps:$4 sm:$0xff]  }
 0x18e   :  { %2935 = vmatprep.subr.bf16.mxu1 %v6785_v15  ;;  %v6863_v15 = vld [vmem:[#allocation2 + $0x914] ss:$8 sps:$4 sm:$0xff]  }
 0x190   :  { %2893 = vmatpush2.bf16.msra.mxu0 %v6780_v16  ;;  %v6858_v16 = vld [vmem:[#allocation2 + $0x810] ss:$8 sps:$4 sm:$0xff]  }
 0x191   :  { %2936 = vmatpush2.bf16.msra.mxu1 %v6783_v17  ;;  %2894 = vmatprep.subr.bf16.mxu0 %v6788_v18  ;;  %v6861_v17 = vld [vmem:[#allocation2 + $0x910] ss:$8 sps:$4 sm:$0xff]   ;;  %v6866_v18 = vld [vmem:[#allocation2 + $0x804] ss:$8 sps:$4 sm:$0xff]  }
 0x192   :  { %2937 = vmatprep.subr.bf16.mxu1 %v6791_v19  ;;  %v6869_v19 = vld [vmem:[#allocation2 + $0x904] ss:$8 sps:$4 sm:$0xff]  }
 0x194   :  { %2895 = vmatpush2.bf16.msra.mxu0 %v6786_v20  ;;  %v6864_v20 = vld [vmem:[#allocation2 + $0x800] ss:$8 sps:$4 sm:$0xff]  }
 0x195   :  { %2938 = vmatpush2.bf16.msra.mxu1 %v6789_v21  ;;  %2896 = vmatprep.subr.bf16.mxu0 %v6794_v22  ;;  %v6867_v21 = vld [vmem:[#allocation2 + $0x900] ss:$8 sps:$4 sm:$0xff]   ;;  %v6872_v22 = vld [vmem:[#allocation2 + $0x8f4] ss:$8 sps:$4 sm:$0xff]  }
 0x196   :  { %2939 = vmatprep.subr.bf16.mxu1 %v6797_v23  ;;  %v6875_v23 = vld [vmem:[#allocation2 + $0x9f4] ss:$8 sps:$4 sm:$0xff]  }
 0x198   :  { %2897 = vmatpush2.bf16.msra.mxu0 %v6792_v24  ;;  %v6870_v24 = vld [vmem:[#allocation2 + $0x8f0] ss:$8 sps:$4 sm:$0xff]  }
 0x199   :  { %2940 = vmatpush2.bf16.msra.mxu1 %v6795_v25  ;;  %2898 = vmatprep.subr.bf16.mxu0 %v6800_v26  ;;  %v6873_v25 = vld [vmem:[#allocation2 + $0x9f0] ss:$8 sps:$4 sm:$0xff]   ;;  %v6878_v26 = vld [vmem:[#allocation2 + $0x8e4] ss:$8 sps:$4 sm:$0xff]  }
 0x19a   :  { %2941 = vmatprep.subr.bf16.mxu1 %v6803_v27  ;;  %v6881_v27 = vld [vmem:[#allocation2 + $0x9e4] ss:$8 sps:$4 sm:$0xff]  }
 0x19c   :  { %2899 = vmatpush2.bf16.msra.mxu0 %v6798_v28  ;;  %v6876_v28 = vld [vmem:[#allocation2 + $0x8e0] ss:$8 sps:$4 sm:$0xff]  }
 0x19d   :  { %2942 = vmatpush2.bf16.msra.mxu1 %v6801_v29  ;;  %2900 = vmatprep.subr.bf16.mxu0 %v6806_v30  ;;  %v6879_v29 = vld [vmem:[#allocation2 + $0x9e0] ss:$8 sps:$4 sm:$0xff]   ;;  %v6884_v30 = vld [vmem:[#allocation2 + $0x8d4] ss:$8 sps:$4 sm:$0xff]  }
 0x19e   :  { %2943 = vmatprep.subr.bf16.mxu1 %v6809_v31  ;;  %v6887_v31 = vld [vmem:[#allocation2 + $0x9d4] ss:$8 sps:$4 sm:$0xff]  }
 0x1a0   :  { %2901 = vmatpush2.bf16.msra.mxu0 %v6804_v32  ;;  %v6882_v32 = vld [vmem:[#allocation2 + $0x8d0] ss:$8 sps:$4 sm:$0xff]  }
 0x1a1   :  { %2944 = vmatpush2.bf16.msra.mxu1 %v6807_v33  ;;  %2902 = vmatprep.subr.bf16.mxu0 %v6812_v34  ;;  %v6885_v33 = vld [vmem:[#allocation2 + $0x9d0] ss:$8 sps:$4 sm:$0xff]   ;;  %v6890_v34 = vld [vmem:[#allocation2 + $0x8c4] ss:$8 sps:$4 sm:$0xff]  }
 0x1a2   :  { %2945 = vmatprep.subr.bf16.mxu1 %v6815_v35  ;;  %v6893_v35 = vld [vmem:[#allocation2 + $0x9c4] ss:$8 sps:$4 sm:$0xff]  }
 0x1a4   :  { %2903 = vmatpush2.bf16.msra.mxu0 %v6810_v36  ;;  %v6888_v36 = vld [vmem:[#allocation2 + $0x8c0] ss:$8 sps:$4 sm:$0xff]  }
 0x1a5   :  { %2946 = vmatpush2.bf16.msra.mxu1 %v6813_v37  ;;  %2904 = vmatprep.subr.bf16.mxu0 %v6818_v38  ;;  %v6891_v37 = vld [vmem:[#allocation2 + $0x9c0] ss:$8 sps:$4 sm:$0xff]   ;;  %v6896_v38 = vld [vmem:[#allocation2 + $0x8b4] ss:$8 sps:$4 sm:$0xff]  }
 0x1a6   :  { %2947 = vmatprep.subr.bf16.mxu1 %v6821_v39  ;;  %v6899_v39 = vld [vmem:[#allocation2 + $0x9b4] ss:$8 sps:$4 sm:$0xff]  }
 0x1a8   :  { %2905 = vmatpush2.bf16.msra.mxu0 %v6816_v40  ;;  %v6894_v40 = vld [vmem:[#allocation2 + $0x8b0] ss:$8 sps:$4 sm:$0xff]  }
 0x1a9   :  { %2948 = vmatpush2.bf16.msra.mxu1 %v6819_v41  ;;  %2960 = vmatprep.subr.bf16.mxu0 %v6824_v46  ;;  %v6897_v41 = vld [vmem:[#allocation2 + $0x9b0] ss:$8 sps:$4 sm:$0xff]   ;;  %v6908_v46 = vld [vmem:[#allocation2 + $0x894] ss:$8 sps:$4 sm:$0xff]  }
 0x1aa   :  { %3003 = vmatprep.subr.bf16.mxu1 %v6827_v47  ;;  %v6911_v47 = vld [vmem:[#allocation2 + $0x994] ss:$8 sps:$4 sm:$0xff]  }
 0x1ab   :  { %2907 = vmatmul.mubr.bf16.vlgmr.msra.gmra.mxu0 %v288_v52  ;;  %v6912_v52 = vld [vmem:[#allocation2 + $0x880] ss:$8 sps:$4 sm:$0xff]  }
 0x1ac   :  { %2950 = vmatmul.mubr.bf16.vlgmr.msra.gmra.mxu1 %v290_v53  ;;  %2961 = vmatpush1.bf16.msra.mxu0 %v6822_v49  ;;  %v6909_v49 = vld [vmem:[#allocation2 + $0x990] ss:$8 sps:$4 sm:$0xff]   ;;  %v6915_v53 = vld [vmem:[#allocation2 + $0x980] ss:$8 sps:$4 sm:$0xff]  }
 0x1ad   :  { %3004 = vmatpush1.bf16.msra.mxu1 %v6825_v55  ;;  %2962 = vmatprep.subr.bf16.mxu0 %v6830_v56  ;;  %v268_v55 = vld [vmem:[%s8128_s0 + $0x140] sm:$0xff]  ;;  %v246_v56 = vld [vmem:[%s8128_s0 + $0x90] sm:$0xff] }
 0x1ae   :  { %3005 = vmatprep.subr.bf16.mxu1 %v6833_v57  ;;  %2992 = vmatprep.mubr.bf16.mxu0 %v293_v58  ;;  %v270_v57 = vld [vmem:[%s8128_s0 + $0x150] sm:$0xff] }
 0x1af   :  { %3035 = vmatprep.mubr.bf16.mxu1 %v295_v59  ;;  %v6920_v58 = vld [vmem:[#allocation2 + $0xa74] ss:$8 sps:$4 sm:$0xff]  }
 0x1b0   :  { %2963 = vmatpush1.bf16.msra.mxu0 %v6828_v60  ;;  %v6923_v59 = vld [vmem:[#allocation2 + $0xb74] ss:$8 sps:$4 sm:$0xff]   ;;  %v249_v60 = vld [vmem:[%s8128_s0 + $0xa8] sm:$0xff] }
 0x1b1   :  { %3006 = vmatpush1.bf16.msra.mxu1 %v6831_v61  ;;  %2964 = vmatprep.subr.bf16.mxu0 %v6836_v62  ;;  %v273_v61 = vld [vmem:[%s8128_s0 + $0x168] sm:$0xff]  ;;  %v251_v62 = vld [vmem:[%s8128_s0 + $0xb8] sm:$0xff] }
 0x1b2   :  { %3007 = vmatprep.subr.bf16.mxu1 %v6839_v63  ;;  %v275_v63 = vld [vmem:[%s8128_s0 + $0x178] sm:$0xff] }
 0x1b4   :  { %2965 = vmatpush1.bf16.msra.mxu0 %v6834_v0  ;;  %v6918_v0 = vld [vmem:[#allocation2 + $0xa70] ss:$8 sps:$4 sm:$0xff]  }
 0x1b5   :  { %3008 = vmatpush1.bf16.msra.mxu1 %v6837_v1  ;;  %2966 = vmatprep.subr.bf16.mxu0 %v6842_v2  ;;  %v6921_v1 = vld [vmem:[#allocation2 + $0xb70] ss:$8 sps:$4 sm:$0xff]   ;;  %v292_v2 = vpack.c.bf16 %v268_v55, %v244_v54  ;;  %v6998_v54 = vld [vmem:[#allocation2 + $0xaa4] ss:$8 sps:$4 sm:$0xff]  }
 0x1b6   :  { %3009 = vmatprep.subr.bf16.mxu1 %v6845_v3  ;;  %v294_v3 = vpack.c.bf16 %v270_v57, %v246_v56  ;;  %v7001_v55 = vld [vmem:[#allocation2 + $0xba4] ss:$8 sps:$4 sm:$0xff]   ;;  %v6996_v56 = vld [vmem:[#allocation2 + $0xaa0] ss:$8 sps:$4 sm:$0xff]  }
 0x1b7   :  { %v6999_v57 = vld [vmem:[#allocation2 + $0xba0] ss:$8 sps:$4 sm:$0xff]  }
 0x1b8   :  { %2967 = vmatpush1.bf16.msra.mxu0 %v6840_v4  ;;  %v6926_v4 = vld [vmem:[#allocation2 + $0xa64] ss:$8 sps:$4 sm:$0xff]  }
 0x1b9   :  { %3010 = vmatpush1.bf16.msra.mxu1 %v6843_v5  ;;  %2968 = vmatprep.subr.bf16.mxu0 %v6848_v6  ;;  %v6929_v5 = vld [vmem:[#allocation2 + $0xb64] ss:$8 sps:$4 sm:$0xff]   ;;  %v6924_v6 = vld [vmem:[#allocation2 + $0xa60] ss:$8 sps:$4 sm:$0xff]  }
 0x1ba   :  { %3011 = vmatprep.subr.bf16.mxu1 %v6851_v7  ;;  %v6927_v7 = vld [vmem:[#allocation2 + $0xb60] ss:$8 sps:$4 sm:$0xff]  }
 0x1bc   :  { %2969 = vmatpush1.bf16.msra.mxu0 %v6846_v8  ;;  %v297_v8 = vpack.c.bf16 %v273_v61, %v249_v60  ;;  %v7002_v60 = vld [vmem:[#allocation2 + $0xa90] ss:$8 sps:$4 sm:$0xff]  }
 0x1bd   :  { %3012 = vmatpush1.bf16.msra.mxu1 %v6849_v9  ;;  %2970 = vmatprep.subr.bf16.mxu0 %v6854_v10  ;;  %v299_v9 = vpack.c.bf16 %v275_v63, %v251_v62  ;;  %v6932_v10 = vld [vmem:[#allocation2 + $0xa54] ss:$8 sps:$4 sm:$0xff]   ;;  %v7005_v61 = vld [vmem:[#allocation2 + $0xb90] ss:$8 sps:$4 sm:$0xff]   ;;  %v7010_v62 = vld [vmem:[#allocation2 + $0xa84] ss:$8 sps:$4 sm:$0xff]  }
 0x1be   :  { %3013 = vmatprep.subr.bf16.mxu1 %v6857_v11  ;;  %v6935_v11 = vld [vmem:[#allocation2 + $0xb54] ss:$8 sps:$4 sm:$0xff]   ;;  %v7013_v63 = vld [vmem:[#allocation2 + $0xb84] ss:$8 sps:$4 sm:$0xff]  }
 0x1c0   :  { %2971 = vmatpush1.bf16.msra.mxu0 %v6852_v12  ;;  %v6930_v12 = vld [vmem:[#allocation2 + $0xa50] ss:$8 sps:$4 sm:$0xff]  }
 0x1c1   :  { %3014 = vmatpush1.bf16.msra.mxu1 %v6855_v13  ;;  %2972 = vmatprep.subr.bf16.mxu0 %v6860_v14  ;;  %v6933_v13 = vld [vmem:[#allocation2 + $0xb50] ss:$8 sps:$4 sm:$0xff]   ;;  %v6938_v14 = vld [vmem:[#allocation2 + $0xa44] ss:$8 sps:$4 sm:$0xff]  }
 0x1c2   :  { %3015 = vmatprep.subr.bf16.mxu1 %v6863_v15  ;;  %v6941_v15 = vld [vmem:[#allocation2 + $0xb44] ss:$8 sps:$4 sm:$0xff]  }
 0x1c4   :  { %2973 = vmatpush1.bf16.msra.mxu0 %v6858_v16  ;;  %v6936_v16 = vld [vmem:[#allocation2 + $0xa40] ss:$8 sps:$4 sm:$0xff]  }
 0x1c5   :  { %3016 = vmatpush1.bf16.msra.mxu1 %v6861_v17  ;;  %2974 = vmatprep.subr.bf16.mxu0 %v6866_v18  ;;  %v6939_v17 = vld [vmem:[#allocation2 + $0xb40] ss:$8 sps:$4 sm:$0xff]   ;;  %v6944_v18 = vld [vmem:[#allocation2 + $0xa34] ss:$8 sps:$4 sm:$0xff]  }
 0x1c6   :  { %3017 = vmatprep.subr.bf16.mxu1 %v6869_v19  ;;  %v6947_v19 = vld [vmem:[#allocation2 + $0xb34] ss:$8 sps:$4 sm:$0xff]  }
 0x1c8   :  { %2975 = vmatpush1.bf16.msra.mxu0 %v6864_v20  ;;  %v6942_v20 = vld [vmem:[#allocation2 + $0xa30] ss:$8 sps:$4 sm:$0xff]  }
 0x1c9   :  { %3018 = vmatpush1.bf16.msra.mxu1 %v6867_v21  ;;  %2976 = vmatprep.subr.bf16.mxu0 %v6872_v22  ;;  %v6945_v21 = vld [vmem:[#allocation2 + $0xb30] ss:$8 sps:$4 sm:$0xff]   ;;  %v6950_v22 = vld [vmem:[#allocation2 + $0xa24] ss:$8 sps:$4 sm:$0xff]  }
 0x1ca   :  { %3019 = vmatprep.subr.bf16.mxu1 %v6875_v23  ;;  %v6953_v23 = vld [vmem:[#allocation2 + $0xb24] ss:$8 sps:$4 sm:$0xff]  }
 0x1cc   :  { %2977 = vmatpush2.bf16.msra.mxu0 %v6870_v24  ;;  %v6948_v24 = vld [vmem:[#allocation2 + $0xa20] ss:$8 sps:$4 sm:$0xff]  }
 0x1cd   :  { %3020 = vmatpush2.bf16.msra.mxu1 %v6873_v25  ;;  %2978 = vmatprep.subr.bf16.mxu0 %v6878_v26  ;;  %v6951_v25 = vld [vmem:[#allocation2 + $0xb20] ss:$8 sps:$4 sm:$0xff]   ;;  %v6956_v26 = vld [vmem:[#allocation2 + $0xa14] ss:$8 sps:$4 sm:$0xff]  }
 0x1ce   :  { %3021 = vmatprep.subr.bf16.mxu1 %v6881_v27  ;;  %v6959_v27 = vld [vmem:[#allocation2 + $0xb14] ss:$8 sps:$4 sm:$0xff]  }
 0x1d0   :  { %2979 = vmatpush2.bf16.msra.mxu0 %v6876_v28  ;;  %v6954_v28 = vld [vmem:[#allocation2 + $0xa10] ss:$8 sps:$4 sm:$0xff]  }
 0x1d1   :  { %3022 = vmatpush2.bf16.msra.mxu1 %v6879_v29  ;;  %2980 = vmatprep.subr.bf16.mxu0 %v6884_v30  ;;  %v6957_v29 = vld [vmem:[#allocation2 + $0xb10] ss:$8 sps:$4 sm:$0xff]   ;;  %v6962_v30 = vld [vmem:[#allocation2 + $0xa04] ss:$8 sps:$4 sm:$0xff]  }
 0x1d2   :  { %3023 = vmatprep.subr.bf16.mxu1 %v6887_v31  ;;  %v6965_v31 = vld [vmem:[#allocation2 + $0xb04] ss:$8 sps:$4 sm:$0xff]  }
 0x1d4   :  { %2981 = vmatpush2.bf16.msra.mxu0 %v6882_v32  ;;  %v6960_v32 = vld [vmem:[#allocation2 + $0xa00] ss:$8 sps:$4 sm:$0xff]  }
 0x1d5   :  { %3024 = vmatpush2.bf16.msra.mxu1 %v6885_v33  ;;  %2982 = vmatprep.subr.bf16.mxu0 %v6890_v34  ;;  %v6963_v33 = vld [vmem:[#allocation2 + $0xb00] ss:$8 sps:$4 sm:$0xff]   ;;  %v6968_v34 = vld [vmem:[#allocation2 + $0xaf4] ss:$8 sps:$4 sm:$0xff]  }
 0x1d6   :  { %3025 = vmatprep.subr.bf16.mxu1 %v6893_v35  ;;  %v6971_v35 = vld [vmem:[#allocation2 + $0xbf4] ss:$8 sps:$4 sm:$0xff]  }
 0x1d8   :  { %2983 = vmatpush2.bf16.msra.mxu0 %v6888_v36  ;;  %v6966_v36 = vld [vmem:[#allocation2 + $0xaf0] ss:$8 sps:$4 sm:$0xff]  }
 0x1d9   :  { %3026 = vmatpush2.bf16.msra.mxu1 %v6891_v37  ;;  %2984 = vmatprep.subr.bf16.mxu0 %v6896_v38  ;;  %v6969_v37 = vld [vmem:[#allocation2 + $0xbf0] ss:$8 sps:$4 sm:$0xff]   ;;  %v6974_v38 = vld [vmem:[#allocation2 + $0xae4] ss:$8 sps:$4 sm:$0xff]  }
 0x1da   :  { %3027 = vmatprep.subr.bf16.mxu1 %v6899_v39  ;;  %v6977_v39 = vld [vmem:[#allocation2 + $0xbe4] ss:$8 sps:$4 sm:$0xff]  }
 0x1dc   :  { %2985 = vmatpush2.bf16.msra.mxu0 %v6894_v40  ;;  %v6972_v40 = vld [vmem:[#allocation2 + $0xae0] ss:$8 sps:$4 sm:$0xff]  }
 0x1dd   :  { %3028 = vmatpush2.bf16.msra.mxu1 %v6897_v41  ;;  %2986 = vmatprep.subr.bf16.mxu0 %v6902_v42  ;;  %v6975_v41 = vld [vmem:[#allocation2 + $0xbe0] ss:$8 sps:$4 sm:$0xff]   ;;  %v6980_v42 = vld [vmem:[#allocation2 + $0xad4] ss:$8 sps:$4 sm:$0xff]  }
 0x1de   :  { %3029 = vmatprep.subr.bf16.mxu1 %v6905_v43  ;;  %v6983_v43 = vld [vmem:[#allocation2 + $0xbd4] ss:$8 sps:$4 sm:$0xff]  }
 0x1e0   :  { %2987 = vmatpush2.bf16.msra.mxu0 %v6900_v44  ;;  %v6978_v44 = vld [vmem:[#allocation2 + $0xad0] ss:$8 sps:$4 sm:$0xff]  }
 0x1e1   :  { %3030 = vmatpush2.bf16.msra.mxu1 %v6903_v45  ;;  %2988 = vmatprep.subr.bf16.mxu0 %v6908_v46  ;;  %v6981_v45 = vld [vmem:[#allocation2 + $0xbd0] ss:$8 sps:$4 sm:$0xff]   ;;  %v6986_v46 = vld [vmem:[#allocation2 + $0xac4] ss:$8 sps:$4 sm:$0xff]  }
 0x1e2   :  { %3031 = vmatprep.subr.bf16.mxu1 %v6911_v47  ;;  %v6989_v47 = vld [vmem:[#allocation2 + $0xbc4] ss:$8 sps:$4 sm:$0xff]  }
 0x1e4   :  { %2989 = vmatpush2.bf16.msra.mxu0 %v6906_v48  ;;  %v6984_v48 = vld [vmem:[#allocation2 + $0xac0] ss:$8 sps:$4 sm:$0xff]  }
 0x1e5   :  { %3032 = vmatpush2.bf16.msra.mxu1 %v6909_v49  ;;  %2990 = vmatprep.subr.bf16.mxu0 %v6914_v50  ;;  %v6987_v49 = vld [vmem:[#allocation2 + $0xbc0] ss:$8 sps:$4 sm:$0xff]   ;;  %v6992_v50 = vld [vmem:[#allocation2 + $0xab4] ss:$8 sps:$4 sm:$0xff]  }
 0x1e6   :  { %3033 = vmatprep.subr.bf16.mxu1 %v6917_v51  ;;  %v6995_v51 = vld [vmem:[#allocation2 + $0xbb4] ss:$8 sps:$4 sm:$0xff]  }
 0x1e8   :  { %2991 = vmatpush2.bf16.msra.mxu0 %v6912_v52  ;;  %v6990_v52 = vld [vmem:[#allocation2 + $0xab0] ss:$8 sps:$4 sm:$0xff]  }
 0x1e9   :  { %3034 = vmatpush2.bf16.msra.mxu1 %v6915_v53  ;;  %3046 = vmatprep.subr.bf16.mxu0 %v6920_v58  ;;  %v6993_v53 = vld [vmem:[#allocation2 + $0xbb0] ss:$8 sps:$4 sm:$0xff]   ;;  %v7004_v58 = vld [vmem:[#allocation2 + $0xa94] ss:$8 sps:$4 sm:$0xff]  }
 0x1ea   :  { %3089 = vmatprep.subr.bf16.mxu1 %v6923_v59  ;;  %v7007_v59 = vld [vmem:[#allocation2 + $0xb94] ss:$8 sps:$4 sm:$0xff]  }
 0x1eb   :  { %2993 = vmatmul.mubr.bf16.vlgmr.msra.gmra.mxu0 %v292_v2  ;;  %v248_v2 = vld [vmem:[%s8128_s0 + $0xa0] sm:$0xff] }
 0x1ec   :  { %3036 = vmatmul.mubr.bf16.vlgmr.msra.gmra.mxu1 %v294_v3  ;;  %3047 = vmatpush1.bf16.msra.mxu0 %v6918_v0  ;;  %v7008_v0 = vld [vmem:[#allocation2 + $0xa80] ss:$8 sps:$4 sm:$0xff]  }
 0x1ed   :  { %3090 = vmatpush1.bf16.msra.mxu1 %v6921_v1  ;;  %3048 = vmatprep.subr.bf16.mxu0 %v6926_v4  ;;  %v7011_v1 = vld [vmem:[#allocation2 + $0xb80] ss:$8 sps:$4 sm:$0xff]   ;;  %v250_v4 = vld [vmem:[%s8128_s0 + $0xb0] sm:$0xff] }
 0x1ee   :  { %3091 = vmatprep.subr.bf16.mxu1 %v6929_v5  ;;  %3078 = vmatprep.mubr.bf16.mxu0 %v297_v8  ;;  %v272_v3 = vld [vmem:[%s8128_s0 + $0x160] sm:$0xff]  ;;  %v274_v5 = vld [vmem:[%s8128_s0 + $0x170] sm:$0xff]  ;;  %s7810_s0 = smov [#allocation25]  }
 0x1ef   :  { %3121 = vmatprep.mubr.bf16.mxu1 %v299_v9  ;;  %v7014_v8 = vld [vmem:[#allocation7 + $0xe0] ss:$16 sps:$4 sm:$0xff]   ;;  %v7016_v9 = vld [vmem:[#allocation7 + $0xe4] ss:$16 sps:$4 sm:$0xff]   ;;  %s5647_s23 = sshll.u32 %s7810_s0, 4  ;;  %s5648_s23 = int_to_ptr.vmem [resolvable:$true] %s5647_s23 }
 0x1f0   :  { %3049 = vmatpush1.bf16.msra.mxu0 %v6924_v6  ;;  %v296_v6 = vpack.c.bf16 %v272_v3, %v248_v2  ;;  %v7098_v2 = vld [vmem:[#allocation7 + $0x120] ss:$16 sps:$4 sm:$0xff]   ;;  %v7101_v3 = vld [vmem:[#allocation7 + $0x128] ss:$16 sps:$4 sm:$0xff]   ;;  %s7750_s24 = scalar_lea.vmem %s5648_s23, 256  ;;  %p7755_p1 = scmp.lt.s32.totalorder %s5648_s23, %s5648_s23 }
 0x1f1   :  { %3092 = vmatpush1.bf16.msra.mxu1 %v6927_v7  ;;  %3050 = vmatprep.subr.bf16.mxu0 %v6932_v10  ;;  %v298_v7 = vpack.c.bf16 %v274_v5, %v250_v4  ;;  %v7017_v10 = vld [vmem:[#allocation7 + $0xe8] ss:$16 sps:$4 sm:$0xff]   ;;  %v7106_v4 = vld [vmem:[#allocation7 + $0x104] ss:$16 sps:$4 sm:$0xff]   ;;  %v7109_v5 = vld [vmem:[#allocation7 + $0x10c] ss:$16 sps:$4 sm:$0xff]   ;;  %p7751_p0 = scmp.ne.s32.totalorder %s5648_s23, %s7750_s24  ;;  %p7756_p2 = scmp.lt.s32.totalorder %s7750_s24, %s7750_s24 }
 0x1f2   :  { %3093 = vmatprep.subr.bf16.mxu1 %v6935_v11  ;;  %v7019_v11 = vld [vmem:[#allocation7 + $0xec] ss:$16 sps:$4 sm:$0xff]  }
 0x1f3   :  { %p7757_p3 = por %p7756_p2, %p7755_p1 }
 0x1f4   :  { %3051 = vmatpush1.bf16.msra.mxu0 %v6930_v12  ;;  %v7022_v12 = vld [vmem:[#allocation7 + $0xc4] ss:$16 sps:$4 sm:$0xff]  }
 0x1f5   :  { %3094 = vmatpush1.bf16.msra.mxu1 %v6933_v13  ;;  %3052 = vmatprep.subr.bf16.mxu0 %v6938_v14  ;;  %v7025_v13 = vld [vmem:[#allocation7 + $0xcc] ss:$16 sps:$4 sm:$0xff]   ;;  %v7020_v14 = vld [vmem:[#allocation7 + $0xc0] ss:$16 sps:$4 sm:$0xff]   ;;  %p7758_p4 = pnand %p7757_p3, %p7751_p0 }
 0x1f6   :  { %3095 = vmatprep.subr.bf16.mxu1 %v6941_v15  ;;  %v7023_v15 = vld [vmem:[#allocation7 + $0xc8] ss:$16 sps:$4 sm:$0xff]  }
 0x1f8   :  { %3053 = vmatpush1.bf16.msra.mxu0 %v6936_v16  ;;  %v7028_v16 = vld [vmem:[#allocation7 + $0xa4] ss:$16 sps:$4 sm:$0xff]  }
 0x1f9   :  { %3096 = vmatpush1.bf16.msra.mxu1 %v6939_v17  ;;  %3054 = vmatprep.subr.bf16.mxu0 %v6944_v18  ;;  %v7031_v17 = vld [vmem:[#allocation7 + $0xac] ss:$16 sps:$4 sm:$0xff]   ;;  %v7026_v18 = vld [vmem:[#allocation7 + $0xa0] ss:$16 sps:$4 sm:$0xff]  }
 0x1fa   :  { %3097 = vmatprep.subr.bf16.mxu1 %v6947_v19  ;;  %v7029_v19 = vld [vmem:[#allocation7 + $0xa8] ss:$16 sps:$4 sm:$0xff]  }
 0x1fc   :  { %3055 = vmatpush1.bf16.msra.mxu0 %v6942_v20  ;;  %v7034_v20 = vld [vmem:[#allocation7 + $0x84] ss:$16 sps:$4 sm:$0xff]  }
 0x1fd   :  { %3098 = vmatpush1.bf16.msra.mxu1 %v6945_v21  ;;  %3056 = vmatprep.subr.bf16.mxu0 %v6950_v22  ;;  %v7037_v21 = vld [vmem:[#allocation7 + $0x8c] ss:$16 sps:$4 sm:$0xff]   ;;  %v7032_v22 = vld [vmem:[#allocation7 + $0x80] ss:$16 sps:$4 sm:$0xff]  }
 0x1fe   :  { %3099 = vmatprep.subr.bf16.mxu1 %v6953_v23  ;;  %v7035_v23 = vld [vmem:[#allocation7 + $0x88] ss:$16 sps:$4 sm:$0xff]  }
 0x200   :  { %3057 = vmatpush1.bf16.msra.mxu0 %v6948_v24  ;;  %v7040_v24 = vld [vmem:[#allocation7 + $0x64] ss:$16 sps:$4 sm:$0xff]  }
 0x201   :  { %3100 = vmatpush1.bf16.msra.mxu1 %v6951_v25  ;;  %3058 = vmatprep.subr.bf16.mxu0 %v6956_v26  ;;  %v7043_v25 = vld [vmem:[#allocation7 + $0x6c] ss:$16 sps:$4 sm:$0xff]   ;;  %v7038_v26 = vld [vmem:[#allocation7 + $0x60] ss:$16 sps:$4 sm:$0xff]  }
 0x202   :  { %3101 = vmatprep.subr.bf16.mxu1 %v6959_v27  ;;  %v7041_v27 = vld [vmem:[#allocation7 + $0x68] ss:$16 sps:$4 sm:$0xff]  }
 0x204   :  { %3059 = vmatpush1.bf16.msra.mxu0 %v6954_v28  ;;  %v7046_v28 = vld [vmem:[#allocation7 + $0x44] ss:$16 sps:$4 sm:$0xff]  }
 0x205   :  { %3102 = vmatpush1.bf16.msra.mxu1 %v6957_v29  ;;  %3060 = vmatprep.subr.bf16.mxu0 %v6962_v30  ;;  %v7049_v29 = vld [vmem:[#allocation7 + $0x4c] ss:$16 sps:$4 sm:$0xff]   ;;  %v7044_v30 = vld [vmem:[#allocation7 + $0x40] ss:$16 sps:$4 sm:$0xff]  }
 0x206   :  { %3103 = vmatprep.subr.bf16.mxu1 %v6965_v31  ;;  %v7047_v31 = vld [vmem:[#allocation7 + $0x48] ss:$16 sps:$4 sm:$0xff]  }
 0x208   :  { %3061 = vmatpush1.bf16.msra.mxu0 %v6960_v32  ;;  %v7052_v32 = vld [vmem:[#allocation7 + $0x24] ss:$16 sps:$4 sm:$0xff]  }
 0x209   :  { %3104 = vmatpush1.bf16.msra.mxu1 %v6963_v33  ;;  %3062 = vmatprep.subr.bf16.mxu0 %v6968_v34  ;;  %v7055_v33 = vld [vmem:[#allocation7 + $0x2c] ss:$16 sps:$4 sm:$0xff]   ;;  %v7050_v34 = vld [vmem:[#allocation7 + $0x20] ss:$16 sps:$4 sm:$0xff]  }
 0x20a   :  { %3105 = vmatprep.subr.bf16.mxu1 %v6971_v35  ;;  %v7053_v35 = vld [vmem:[#allocation7 + $0x28] ss:$16 sps:$4 sm:$0xff]  }
 0x20c   :  { %3063 = vmatpush2.bf16.msra.mxu0 %v6966_v36  ;;  %v7058_v36 = vld [vmem:[#allocation7 + $0x4] ss:$16 sps:$4 sm:$0xff]  }
 0x20d   :  { %3106 = vmatpush2.bf16.msra.mxu1 %v6969_v37  ;;  %3064 = vmatprep.subr.bf16.mxu0 %v6974_v38  ;;  %v7061_v37 = vld [vmem:[#allocation7 + $0xc] ss:$16 sps:$4 sm:$0xff]   ;;  %v7056_v38 = vld [vmem:[#allocation7] ss:$16 sps:$4 sm:$0xff]  }
 0x20e   :  { %3107 = vmatprep.subr.bf16.mxu1 %v6977_v39  ;;  %v7059_v39 = vld [vmem:[#allocation7 + $0x8] ss:$16 sps:$4 sm:$0xff]  }
 0x210   :  { %3065 = vmatpush2.bf16.msra.mxu0 %v6972_v40  ;;  %v7064_v40 = vld [vmem:[#allocation7 + $0x1e4] ss:$16 sps:$4 sm:$0xff]  }
 0x211   :  { %3108 = vmatpush2.bf16.msra.mxu1 %v6975_v41  ;;  %3066 = vmatprep.subr.bf16.mxu0 %v6980_v42  ;;  %v7067_v41 = vld [vmem:[#allocation7 + $0x1ec] ss:$16 sps:$4 sm:$0xff]   ;;  %v7062_v42 = vld [vmem:[#allocation7 + $0x1e0] ss:$16 sps:$4 sm:$0xff]  }
 0x212   :  { %3109 = vmatprep.subr.bf16.mxu1 %v6983_v43  ;;  %v7065_v43 = vld [vmem:[#allocation7 + $0x1e8] ss:$16 sps:$4 sm:$0xff]  }
 0x214   :  { %3067 = vmatpush2.bf16.msra.mxu0 %v6978_v44  ;;  %v7070_v44 = vld [vmem:[#allocation7 + $0x1c4] ss:$16 sps:$4 sm:$0xff]  }
 0x215   :  { %3110 = vmatpush2.bf16.msra.mxu1 %v6981_v45  ;;  %3068 = vmatprep.subr.bf16.mxu0 %v6986_v46  ;;  %v7073_v45 = vld [vmem:[#allocation7 + $0x1cc] ss:$16 sps:$4 sm:$0xff]   ;;  %v7068_v46 = vld [vmem:[#allocation7 + $0x1c0] ss:$16 sps:$4 sm:$0xff]  }
 0x216   :  { %3111 = vmatprep.subr.bf16.mxu1 %v6989_v47  ;;  %v7071_v47 = vld [vmem:[#allocation7 + $0x1c8] ss:$16 sps:$4 sm:$0xff]  }
 0x218   :  { %3069 = vmatpush2.bf16.msra.mxu0 %v6984_v48  ;;  %v7076_v48 = vld [vmem:[#allocation7 + $0x1a4] ss:$16 sps:$4 sm:$0xff]  }
 0x219   :  { %3112 = vmatpush2.bf16.msra.mxu1 %v6987_v49  ;;  %3070 = vmatprep.subr.bf16.mxu0 %v6992_v50  ;;  %v7079_v49 = vld [vmem:[#allocation7 + $0x1ac] ss:$16 sps:$4 sm:$0xff]   ;;  %v7074_v50 = vld [vmem:[#allocation7 + $0x1a0] ss:$16 sps:$4 sm:$0xff]  }
 0x21a   :  { %3113 = vmatprep.subr.bf16.mxu1 %v6995_v51  ;;  %v7077_v51 = vld [vmem:[#allocation7 + $0x1a8] ss:$16 sps:$4 sm:$0xff]  }
 0x21c   :  { %3071 = vmatpush2.bf16.msra.mxu0 %v6990_v52  ;;  %v7082_v52 = vld [vmem:[#allocation7 + $0x184] ss:$16 sps:$4 sm:$0xff]  }
 0x21d   :  { %3114 = vmatpush2.bf16.msra.mxu1 %v6993_v53  ;;  %3072 = vmatprep.subr.bf16.mxu0 %v6998_v54  ;;  %v7085_v53 = vld [vmem:[#allocation7 + $0x18c] ss:$16 sps:$4 sm:$0xff]   ;;  %v7080_v54 = vld [vmem:[#allocation7 + $0x180] ss:$16 sps:$4 sm:$0xff]  }
 0x21e   :  { %3115 = vmatprep.subr.bf16.mxu1 %v7001_v55  ;;  %v7083_v55 = vld [vmem:[#allocation7 + $0x188] ss:$16 sps:$4 sm:$0xff]  }
 0x220   :  { %3073 = vmatpush2.bf16.msra.mxu0 %v6996_v56  ;;  %v7088_v56 = vld [vmem:[#allocation7 + $0x164] ss:$16 sps:$4 sm:$0xff]  }
 0x221   :  { %3116 = vmatpush2.bf16.msra.mxu1 %v6999_v57  ;;  %3074 = vmatprep.subr.bf16.mxu0 %v7004_v58  ;;  %v7091_v57 = vld [vmem:[#allocation7 + $0x16c] ss:$16 sps:$4 sm:$0xff]   ;;  %v7086_v58 = vld [vmem:[#allocation7 + $0x160] ss:$16 sps:$4 sm:$0xff]  }
 0x222   :  { %3117 = vmatprep.subr.bf16.mxu1 %v7007_v59  ;;  %v7089_v59 = vld [vmem:[#allocation7 + $0x168] ss:$16 sps:$4 sm:$0xff]  }
 0x224   :  { %3075 = vmatpush2.bf16.msra.mxu0 %v7002_v60  ;;  %v7094_v60 = vld [vmem:[#allocation7 + $0x144] ss:$16 sps:$4 sm:$0xff]  }
 0x225   :  { %3118 = vmatpush2.bf16.msra.mxu1 %v7005_v61  ;;  %3076 = vmatprep.subr.bf16.mxu0 %v7010_v62  ;;  %v7097_v61 = vld [vmem:[#allocation7 + $0x14c] ss:$16 sps:$4 sm:$0xff]   ;;  %v7092_v62 = vld [vmem:[#allocation7 + $0x140] ss:$16 sps:$4 sm:$0xff]  }
 0x226   :  { %3119 = vmatprep.subr.bf16.mxu1 %v7013_v63  ;;  %v7095_v63 = vld [vmem:[#allocation7 + $0x148] ss:$16 sps:$4 sm:$0xff]  }
 0x228   :  { %3077 = vmatpush2.bf16.msra.mxu0 %v7008_v0  ;;  %v7100_v0 = vld [vmem:[#allocation7 + $0x124] ss:$16 sps:$4 sm:$0xff]  }
 0x229   :  { %3120 = vmatpush2.bf16.msra.mxu1 %v7011_v1  ;;  %3544 = vmatprep.subr.bf16.mxu0 %v7016_v9  ;;  %v7103_v1 = vld [vmem:[#allocation7 + $0x12c] ss:$16 sps:$4 sm:$0xff]   ;;  %v7115_v9 = vld [vmem:[#allocation10 + $0x2e4] ss:$16 sps:$4 sm:$0xff]  }
 0x22a   :  { %3587 = vmatprep.subr.bf16.mxu1 %v7019_v11  ;;  %v2693_v11 = vpop.f32.mrf.mxu1 }
 0x22b   :  { %3079 = vmatmul.mubr.bf16.vlgmr.msra.gmra.mxu0 %v296_v6  ;;  %v7104_v6 = vld [vmem:[#allocation7 + $0x100] ss:$16 sps:$4 sm:$0xff]  }
 0x22c   :  { %3122 = vmatmul.mubr.bf16.vlgmr.msra.gmra.mxu1 %v298_v7  ;;  %3545 = vmatpush1.bf16.msra.mxu0 %v7014_v8  ;;  %v7107_v7 = vld [vmem:[#allocation7 + $0x108] ss:$16 sps:$4 sm:$0xff]  }
 0x22d   :  { %3588 = vmatpush1.bf16.msra.mxu1 %v7017_v10  ;;  %3546 = vmatprep.subr.bf16.mxu0 %v7022_v12  ;;  %v7112_v8 = vld [vmem:[#allocation10 + $0xe4] ss:$16 sps:$4 sm:$0xff]   ;;  %v2650_v10 = vpop.f32.mrf.mxu0 }
 0x22e   :  { %3589 = vmatprep.subr.bf16.mxu1 %v7025_v13  ;;  %v2695_v13 = vpop.f32.mrf.mxu1 }
 0x22f   :  { %v2652_v12 = vpop.f32.mrf.mxu0 }
 0x230   :  { %3547 = vmatpush1.bf16.msra.mxu0 %v7020_v14 }
 0x231   :  { %3590 = vmatpush1.bf16.msra.mxu1 %v7023_v15  ;;  %3548 = vmatprep.subr.bf16.mxu0 %v7028_v16  ;;  %v2654_v14 = vpop.f32.mrf.mxu0  ;;  %v2697_v15 = vpop.f32.mrf.mxu1 }
 0x232   :  { %3591 = vmatprep.subr.bf16.mxu1 %v7031_v17 }
 0x233   :  { %v2656_v16 = vpop.f32.mrf.mxu0  ;;  %v2699_v17 = vpop.f32.mrf.mxu1 }
 0x234   :  { %3549 = vmatpush1.bf16.msra.mxu0 %v7026_v18 }
 0x235   :  { %3592 = vmatpush1.bf16.msra.mxu1 %v7029_v19  ;;  %3550 = vmatprep.subr.bf16.mxu0 %v7034_v20  ;;  %v2736_v18 = vpop.f32.mrf.mxu0  ;;  %v2779_v19 = vpop.f32.mrf.mxu1 }
 0x236   :  { %3593 = vmatprep.subr.bf16.mxu1 %v7037_v21 }
 0x237   :  { %v2738_v20 = vpop.f32.mrf.mxu0  ;;  %v2781_v21 = vpop.f32.mrf.mxu1 }
 0x238   :  { %3551 = vmatpush1.bf16.msra.mxu0 %v7032_v22 }
 0x239   :  { %3594 = vmatpush1.bf16.msra.mxu1 %v7035_v23  ;;  %3552 = vmatprep.subr.bf16.mxu0 %v7040_v24  ;;  %v2740_v22 = vpop.f32.mrf.mxu0  ;;  %v2783_v23 = vpop.f32.mrf.mxu1 }
 0x23a   :  { %3595 = vmatprep.subr.bf16.mxu1 %v7043_v25 }
 0x23b   :  { %v2742_v24 = vpop.f32.mrf.mxu0  ;;  %v2785_v25 = vpop.f32.mrf.mxu1 }
 0x23c   :  { %3553 = vmatpush1.bf16.msra.mxu0 %v7038_v26  ;;  %v686_v26 = vlaneseq }
 0x23d   :  { %3596 = vmatpush1.bf16.msra.mxu1 %v7041_v27  ;;  %3554 = vmatprep.subr.bf16.mxu0 %v7046_v28  ;;  %v2822_v27 = vpop.f32.mrf.mxu0  ;;  %v2865_v28 = vpop.f32.mrf.mxu1 }
 0x23e   :  { %3597 = vmatprep.subr.bf16.mxu1 %v7049_v29  ;;  %v8086_v29 = vshrl.u32 %v686_v26, 7 }
 0x240   :  { %3555 = vmatpush1.bf16.msra.mxu0 %v7044_v30  ;;  %v2824_v30 = vpop.f32.mrf.mxu0 }
 0x241   :  { %3598 = vmatpush1.bf16.msra.mxu1 %v7047_v31  ;;  %3556 = vmatprep.subr.bf16.mxu0 %v7052_v32  ;;  %v2867_v31 = vpop.f32.mrf.mxu1  ;;  %v8089_v32 = vsub.s32 1, %v8086_v29 }
 0x242   :  { %3599 = vmatprep.subr.bf16.mxu1 %v7055_v33  ;;  %v684_v33 = vld [vmem:[#allocation5] sm:$0x3] }
 0x244   :  { %3557 = vmatpush1.bf16.msra.mxu0 %v7050_v34  ;;  %v8092_v34 = vsub.s32 0, %v8086_v29 }
 0x245   :  { %3600 = vmatpush1.bf16.msra.mxu1 %v7053_v35  ;;  %3558 = vmatprep.subr.bf16.mxu0 %v7058_v36  ;;  %v2826_v35 = vpop.f32.mrf.mxu0  ;;  %v2869_v36 = vpop.f32.mrf.mxu1 }
 0x246   :  { %3601 = vmatprep.subr.bf16.mxu1 %v7061_v37  ;;  %v693_v37 = vrot.slane %v684_v33, %v8089_v32 }
 0x248   :  { %3559 = vmatpush1.bf16.msra.mxu0 %v7056_v38  ;;  %v689_v38 = vrot.slane %v684_v33, %v8092_v34 }
 0x249   :  { %3602 = vmatpush1.bf16.msra.mxu1 %v7059_v39  ;;  %3560 = vmatprep.subr.bf16.mxu0 %v7064_v40  ;;  %v2828_v39 = vpop.f32.mrf.mxu0  ;;  %v2871_v40 = vpop.f32.mrf.mxu1 }
 0x24a   :  { %3603 = vmatprep.subr.bf16.mxu1 %v7067_v41 }
 0x24c   :  { %3561 = vmatpush2.bf16.msra.mxu0 %v7062_v42 }
 0x24d   :  { %3604 = vmatpush2.bf16.msra.mxu1 %v7065_v43  ;;  %3562 = vmatprep.subr.bf16.mxu0 %v7070_v44  ;;  %v2653_v43 = vadd.f32 %v2652_v12, %v693_v37  ;;  %v2651_v44 = vadd.f32 %v2650_v10, %v689_v38 }
 0x24e   :  { %3605 = vmatprep.subr.bf16.mxu1 %v7073_v45  ;;  %v2655_v45 = vadd.f32 %v2654_v14, %v689_v38 }
 0x250   :  { %3563 = vmatpush2.bf16.msra.mxu0 %v7068_v46 }
 0x251   :  { %3606 = vmatpush2.bf16.msra.mxu1 %v7071_v47  ;;  %3564 = vmatprep.subr.bf16.mxu0 %v7076_v48  ;;  %v2696_v48 = vadd.f32 %v2695_v13, %v2653_v43 }
 0x252   :  { %3607 = vmatprep.subr.bf16.mxu1 %v7079_v49  ;;  %v2657_v49 = vadd.f32 %v2656_v16, %v693_v37 }
 0x254   :  { %3565 = vmatpush2.bf16.msra.mxu0 %v7074_v50  ;;  %v2694_v50 = vadd.f32 %v2693_v11, %v2651_v44 }
 0x255   :  { %3608 = vmatpush2.bf16.msra.mxu1 %v7077_v51  ;;  %3566 = vmatprep.subr.bf16.mxu0 %v7082_v52  ;;  %v2698_v51 = vadd.f32 %v2697_v15, %v2655_v45  ;;  %v2739_v52 = vadd.f32 %v2738_v20, %v2696_v48 }
 0x256   :  { %3609 = vmatprep.subr.bf16.mxu1 %v7085_v53  ;;  %v2737_v53 = vadd.f32 %v2736_v18, %v2694_v50 }
 0x258   :  { %3567 = vmatpush2.bf16.msra.mxu0 %v7080_v54 }
 0x259   :  { %3610 = vmatpush2.bf16.msra.mxu1 %v7083_v55  ;;  %3568 = vmatprep.subr.bf16.mxu0 %v7088_v56  ;;  %v2700_v56 = vadd.f32 %v2699_v17, %v2657_v49 }
 0x25a   :  { %3611 = vmatprep.subr.bf16.mxu1 %v7091_v57  ;;  %v2741_v57 = vadd.f32 %v2740_v22, %v2698_v51 }
 0x25c   :  { %3569 = vmatpush2.bf16.msra.mxu0 %v7086_v58  ;;  %v2782_v58 = vadd.f32 %v2781_v21, %v2739_v52 }
 0x25d   :  { %3612 = vmatpush2.bf16.msra.mxu1 %v7089_v59  ;;  %3570 = vmatprep.subr.bf16.mxu0 %v7094_v60  ;;  %v2743_v59 = vadd.f32 %v2742_v24, %v2700_v56  ;;  %v2780_v60 = vadd.f32 %v2779_v19, %v2737_v53 }
 0x25e   :  { %3613 = vmatprep.subr.bf16.mxu1 %v7097_v61 }
 0x260   :  { %3571 = vmatpush2.bf16.msra.mxu0 %v7092_v62 }
 0x261   :  { %3614 = vmatpush2.bf16.msra.mxu1 %v7095_v63  ;;  %3572 = vmatprep.subr.bf16.mxu0 %v7100_v0  ;;  %v2784_v63 = vadd.f32 %v2783_v23, %v2741_v57  ;;  %v2825_v0 = vadd.f32 %v2824_v30, %v2782_v58  ;;  %v7110_v57 = vld [vmem:[#allocation10 + $0xe0] ss:$16 sps:$4 sm:$0xff]  }
 0x262   :  { %3615 = vmatprep.subr.bf16.mxu1 %v7103_v1  ;;  %v2823_v1 = vadd.f32 %v2822_v27, %v2780_v60  ;;  %v7113_v58 = vld [vmem:[#allocation10 + $0x2e0] ss:$16 sps:$4 sm:$0xff]   ;;  %v7118_v60 = vld [vmem:[#allocation10 + $0xc4] ss:$16 sps:$4 sm:$0xff]  }
 0x264   :  { %3573 = vmatpush2.bf16.msra.mxu0 %v7098_v2 }
 0x265   :  { %3616 = vmatpush2.bf16.msra.mxu1 %v7101_v3  ;;  %3574 = vmatprep.subr.bf16.mxu0 %v7106_v4  ;;  %v2786_v4 = vadd.f32 %v2785_v25, %v2743_v59 }
 0x266   :  { %3617 = vmatprep.subr.bf16.mxu1 %v7109_v5  ;;  %v2827_v5 = vadd.f32 %v2826_v35, %v2784_v63  ;;  %v7119_v63 = vld [vmem:[#allocation10 + $0x2c0] ss:$16 sps:$4 sm:$0xff]  }
 0x268   :  { %3575 = vmatpush2.bf16.msra.mxu0 %v7104_v6  ;;  %v2868_v6 = vadd.f32 %v2867_v31, %v2825_v0  ;;  %v2870_v11 = vadd.f32 %v2869_v36, %v2827_v5  ;;  %v7124_v0 = vld [vmem:[#allocation10 + $0xa4] ss:$16 sps:$4 sm:$0xff]  }
 0x269   :  { %3618 = vmatpush2.bf16.msra.mxu1 %v7107_v7  ;;  %4424 = vmatprep.subr.bf16.mxu0 %v7112_v8  ;;  %v2829_v7 = vadd.f32 %v2828_v39, %v2786_v4  ;;  %v2866_v8 = vadd.f32 %v2865_v28, %v2823_v1  ;;  %v7127_v1 = vld [vmem:[#allocation10 + $0x2a4] ss:$16 sps:$4 sm:$0xff]  }
 0x26a   :  { %4467 = vmatprep.subr.bf16.mxu1 %v7115_v9  ;;  %v7130_v4 = vld [vmem:[#allocation10 + $0x84] ss:$16 sps:$4 sm:$0xff]  }
 0x26b   :  { %v2908_v41 = vpop.f32.mrf.mxu0  ;;  %v2872_v14 = vadd.f32 %v2871_v40, %v2829_v7  ;;  %v7133_v5 = vld [vmem:[#allocation10 + $0x284] ss:$16 sps:$4 sm:$0xff]   ;;  %v7131_v7 = vld [vmem:[#allocation10 + $0x280] ss:$16 sps:$4 sm:$0xff]  }
 0x26c   :  { %v2951_v42 = vpop.f32.mrf.mxu1  ;;  %v2909_v13 = vadd.f32 %v2908_v41, %v2866_v8  ;;  %v7136_v8 = vld [vmem:[#allocation10 + $0x64] ss:$16 sps:$4 sm:$0xff]  }
 0x26d   :  { %v2910_v46 = vpop.f32.mrf.mxu0 }
 0x26e   :  { %v2953_v47 = vpop.f32.mrf.mxu1  ;;  %v2911_v12 = vadd.f32 %v2910_v46, %v2868_v6  ;;  %v2952_v20 = vadd.f32 %v2951_v42, %v2909_v13  ;;  %v7128_v6 = vld [vmem:[#allocation10 + $0x80] ss:$16 sps:$4 sm:$0xff]   ;;  %v7145_v13 = vld [vmem:[#allocation10 + $0x244] ss:$16 sps:$4 sm:$0xff]  }
 0x26f   :  { %v2912_v54 = vpop.f32.mrf.mxu0 }
 0x270   :  { %v2955_v55 = vpop.f32.mrf.mxu1  ;;  %v2913_v15 = vadd.f32 %v2912_v54, %v2870_v11  ;;  %v2954_v18 = vadd.f32 %v2953_v47, %v2911_v12  ;;  %v7137_v11 = vld [vmem:[#allocation10 + $0x260] ss:$16 sps:$4 sm:$0xff]   ;;  %v7142_v12 = vld [vmem:[#allocation10 + $0x44] ss:$16 sps:$4 sm:$0xff]  }
 0x271   :  { %v2914_v61 = vpop.f32.mrf.mxu0 }
 0x272   :  { %v2957_v62 = vpop.f32.mrf.mxu1  ;;  %v2915_v19 = vadd.f32 %v2914_v61, %v2872_v14  ;;  %v2956_v21 = vadd.f32 %v2955_v55, %v2913_v15  ;;  %v7121_v61 = vld [vmem:[#allocation10 + $0x2c4] ss:$16 sps:$4 sm:$0xff]   ;;  %v7140_v14 = vld [vmem:[#allocation10 + $0x40] ss:$16 sps:$4 sm:$0xff]  }
 0x273   :  { %v7143_v15 = vld [vmem:[#allocation10 + $0x240] ss:$16 sps:$4 sm:$0xff]  }
 0x274   :  { %v2958_v26 = vadd.f32 %v2957_v62, %v2915_v19  ;;  %v7116_v62 = vld [vmem:[#allocation10 + $0xc0] ss:$16 sps:$4 sm:$0xff]  }
 0x275   :  { %v7149_v19 = vld [vmem:[#allocation10 + $0x220] ss:$16 sps:$4 sm:$0xff]  }
 0x2ab   :  { %v2994_v2 = vpop.f32.mrf.mxu0 }
 0x2ac   :  { %v3037_v3 = vpop.f32.mrf.mxu1  ;;  %v2995_v23 = vadd.f32 %v2994_v2, %v2952_v20  ;;  %v7122_v2 = vld [vmem:[#allocation10 + $0xa0] ss:$16 sps:$4 sm:$0xff]   ;;  %v7154_v20 = vld [vmem:[#allocation10 + $0x4] ss:$16 sps:$4 sm:$0xff]  }
 0x2ad   :  { %v2996_v9 = vpop.f32.mrf.mxu0 }
 0x2ae   :  { %v3039_v10 = vpop.f32.mrf.mxu1  ;;  %v2997_v22 = vadd.f32 %v2996_v9, %v2954_v18  ;;  %v3038_v35 = vadd.f32 %v3037_v3, %v2995_v23  ;;  %v7125_v3 = vld [vmem:[#allocation10 + $0x2a0] ss:$16 sps:$4 sm:$0xff]   ;;  %v7139_v9 = vld [vmem:[#allocation10 + $0x264] ss:$16 sps:$4 sm:$0xff]  }
 0x2af   :  { %v2998_v16 = vpop.f32.mrf.mxu0  ;;  %v7146_v18 = vld [vmem:[#allocation10 + $0x20] ss:$16 sps:$4 sm:$0xff]  }
 0x2b0   :  { %v3041_v17 = vpop.f32.mrf.mxu1  ;;  %v2999_v27 = vadd.f32 %v2998_v16, %v2956_v21  ;;  %v3040_v31 = vadd.f32 %v3039_v10, %v2997_v22  ;;  %v7134_v10 = vld [vmem:[#allocation10 + $0x60] ss:$16 sps:$4 sm:$0xff]   ;;  %v7148_v16 = vld [vmem:[#allocation10 + $0x24] ss:$16 sps:$4 sm:$0xff]  }
 0x2b1   :  { %v3000_v24 = vpop.f32.mrf.mxu0  ;;  %v7157_v21 = vld [vmem:[#allocation10 + $0x204] ss:$16 sps:$4 sm:$0xff]   ;;  %v7152_v22 = vld [vmem:[#allocation10] ss:$16 sps:$4 sm:$0xff]  }
 0x2b2   :  { %v3043_v25 = vpop.f32.mrf.mxu1  ;;  %v3001_v33 = vadd.f32 %v3000_v24, %v2958_v26  ;;  %v3042_v38 = vadd.f32 %v3041_v17, %v2999_v27  ;;  %v7151_v17 = vld [vmem:[#allocation10 + $0x224] ss:$16 sps:$4 sm:$0xff]   ;;  %v7155_v23 = vld [vmem:[#allocation10 + $0x200] ss:$16 sps:$4 sm:$0xff]  }
 0x2b3   :  { %v7160_v24 = vld [vmem:[#allocation10 + $0x1e4] ss:$16 sps:$4 sm:$0xff]   ;;  %v7158_v26 = vld [vmem:[#allocation10 + $0x1e0] ss:$16 sps:$4 sm:$0xff]  }
 0x2b4   :  { %v3044_v42 = vadd.f32 %v3043_v25, %v3001_v33  ;;  %v7163_v25 = vld [vmem:[#allocation10 + $0x3e4] ss:$16 sps:$4 sm:$0xff]   ;;  %v7161_v27 = vld [vmem:[#allocation10 + $0x3e0] ss:$16 sps:$4 sm:$0xff]  }
 0x2b5   :  { %v7167_v33 = vld [vmem:[#allocation10 + $0x3c0] ss:$16 sps:$4 sm:$0xff]  }
 0x2eb   :  { %v3080_v28 = vpop.f32.mrf.mxu0 }
 0x2ec   :  { %v3123_v30 = vpop.f32.mrf.mxu1  ;;  %v3081_v40 = vadd.f32 %v3080_v28, %v3038_v35  ;;  %v7166_v28 = vld [vmem:[#allocation10 + $0x1c4] ss:$16 sps:$4 sm:$0xff]  }
 0x2ed   :  { %v3082_v36 = vpop.f32.mrf.mxu0  ;;  %v7172_v35 = vld [vmem:[#allocation10 + $0x1a4] ss:$16 sps:$4 sm:$0xff]  }
 0x2ee   :  { %v3125_v37 = vpop.f32.mrf.mxu1  ;;  %v3083_v39 = vadd.f32 %v3082_v36, %v3040_v31  ;;  %v3124_v49 = vadd.f32 %v3123_v30, %v3081_v40  ;;  %v7169_v30 = vld [vmem:[#allocation10 + $0x3c4] ss:$16 sps:$4 sm:$0xff]   ;;  %v7164_v31 = vld [vmem:[#allocation10 + $0x1c0] ss:$16 sps:$4 sm:$0xff]  }
 0x2ef   :  { %v3084_v41 = vpop.f32.mrf.mxu0  ;;  %v7175_v36 = vld [vmem:[#allocation10 + $0x3a4] ss:$16 sps:$4 sm:$0xff]  }
 0x2f0   :  { %v3127_v43 = vpop.f32.mrf.mxu1  ;;  %v3085_v44 = vadd.f32 %v3084_v41, %v3042_v38  ;;  %v3126_v46 = vadd.f32 %v3125_v37, %v3083_v39  ;;  %v3132_v55 = vmax.f32 %v3124_v49, 0.0  ;;  %v7170_v37 = vld [vmem:[#allocation10 + $0x1a0] ss:$16 sps:$4 sm:$0xff]   ;;  %v7178_v39 = vld [vmem:[#allocation10 + $0x184] ss:$16 sps:$4 sm:$0xff]  }
 0x2f1   :  { %v3086_v45 = vpop.f32.mrf.mxu0  ;;  %v7173_v38 = vld [vmem:[#allocation10 + $0x3a0] ss:$16 sps:$4 sm:$0xff]   ;;  %v7181_v40 = vld [vmem:[#allocation10 + $0x384] ss:$16 sps:$4 sm:$0xff]  }
 0x2f2   :  { %v3128_v47 = vadd.f32 %v3127_v43, %v3085_v44  ;;  %v3087_v48 = vadd.f32 %v3086_v45, %v3044_v42  ;;  %v3129_v50 = vpop.f32.mrf.mxu1  ;;  %v3133_v53 = vmax.f32 %v3126_v46, 0.0  ;;  %v7176_v41 = vld [vmem:[#allocation10 + $0x180] ss:$16 sps:$4 sm:$0xff]   ;;  %v7184_v42 = vld [vmem:[#allocation10 + $0x164] ss:$16 sps:$4 sm:$0xff]  }
 0x2f3   :  { %v7179_v43 = vld [vmem:[#allocation10 + $0x380] ss:$16 sps:$4 sm:$0xff]   ;;  %v7187_v44 = vld [vmem:[#allocation10 + $0x364] ss:$16 sps:$4 sm:$0xff]  }
 0x2f4   :  { %v3130_v51 = vadd.f32 %v3129_v50, %v3087_v48  ;;  %v3134_v52 = vmax.f32 %v3128_v47, 0.0  ;;  %v7182_v45 = vld [vmem:[#allocation10 + $0x160] ss:$16 sps:$4 sm:$0xff]   ;;  %v7190_v47 = vld [vmem:[#allocation10 + $0x144] ss:$16 sps:$4 sm:$0xff]  }
 0x2f5   :  { %v7185_v46 = vld [vmem:[#allocation10 + $0x360] ss:$16 sps:$4 sm:$0xff]   ;;  %v7193_v48 = vld [vmem:[#allocation10 + $0x344] ss:$16 sps:$4 sm:$0xff]  }
 0x2f6   :  { %v3135_v54 = vmax.f32 %v3130_v51, 0.0  ;;  %v3136_v59 = vpack.c.bf16 %v3134_v52, %v3132_v55  ;;  %v7188_v49 = vld [vmem:[#allocation10 + $0x140] ss:$16 sps:$4 sm:$0xff]   ;;  %v7196_v51 = vld [vmem:[#allocation10 + $0x124] ss:$16 sps:$4 sm:$0xff]  }
 0x2f7   :  { %v7191_v50 = vld [vmem:[#allocation10 + $0x340] ss:$16 sps:$4 sm:$0xff]   ;;  %v7199_v52 = vld [vmem:[#allocation10 + $0x324] ss:$16 sps:$4 sm:$0xff]  }
 0x2f8   :  { %v3137_v56 = vpack.c.bf16 %v3135_v54, %v3133_v53  ;;  %v7194_v53 = vld [vmem:[#allocation10 + $0x120] ss:$16 sps:$4 sm:$0xff]   ;;  %v7202_v55 = vld [vmem:[#allocation10 + $0x104] ss:$16 sps:$4 sm:$0xff]  }
 0x2f9   :  { %v7197_v54 = vld [vmem:[#allocation10 + $0x320] ss:$16 sps:$4 sm:$0xff]  }
 0x2fa   :  { %3576 = vmatprep.mubr.bf16.mxu0 %v3137_v56  ;;  %3619 = vmatprep.mubr.bf16.mxu1 %v3137_v56  ;;  %v7205_v56 = vld [vmem:[#allocation10 + $0x304] ss:$16 sps:$4 sm:$0xff]  }
 0x2fb   :  { %3577 = vmatmul.mubr.bf16.vlgmr.msra.gmra.mxu0 %v3136_v59  ;;  %3620 = vmatmul.mubr.bf16.vlgmr.msra.gmra.mxu1 %v3136_v59  ;;  %v7208_v59 = vld [vmem:[#allocation10 + $0xec] ss:$16 sps:$4 sm:$0xff]  }
 0x2fc   :  { %4425 = vmatpush1.bf16.msra.mxu0 %v7110_v57  ;;  %4468 = vmatpush1.bf16.msra.mxu1 %v7113_v58  ;;  %v7200_v57 = vld [vmem:[#allocation10 + $0x100] ss:$16 sps:$4 sm:$0xff]  }
 0x2fd   :  { %4426 = vmatprep.subr.bf16.mxu0 %v7118_v60  ;;  %4469 = vmatprep.subr.bf16.mxu1 %v7121_v61  ;;  %v7203_v58 = vld [vmem:[#allocation10 + $0x300] ss:$16 sps:$4 sm:$0xff]   ;;  %v7211_v60 = vld [vmem:[#allocation10 + $0x2ec] ss:$16 sps:$4 sm:$0xff]   ;;  %v3218_v61 = vsub.s32 3, %v8086_v29 }
 0x300   :  { %4427 = vmatpush1.bf16.msra.mxu0 %v7116_v62  ;;  %4470 = vmatpush1.bf16.msra.mxu1 %v7119_v63  ;;  %v3214_v63 = vsub.s32 2, %v8086_v29 }
 0x301   :  { %4428 = vmatprep.subr.bf16.mxu0 %v7124_v0  ;;  %4471 = vmatprep.subr.bf16.mxu1 %v7127_v1  ;;  %v3202_v1 = vld [vmem:[#allocation8] sm:$0xf] }
 0x304   :  { %4429 = vmatpush1.bf16.msra.mxu0 %v7122_v2  ;;  %4472 = vmatpush1.bf16.msra.mxu1 %v7125_v3 }
 0x305   :  { %4430 = vmatprep.subr.bf16.mxu0 %v7130_v4  ;;  %4473 = vmatprep.subr.bf16.mxu1 %v7133_v5  ;;  %v3211_v4 = vrot.slane %v3202_v1, %v8089_v32  ;;  %v3219_v5 = vrot.slane %v3202_v1, %v3218_v61 }
 0x308   :  { %4431 = vmatpush1.bf16.msra.mxu0 %v7128_v6  ;;  %4474 = vmatpush1.bf16.msra.mxu1 %v7131_v7  ;;  %v3207_v6 = vrot.slane %v3202_v1, %v8092_v34  ;;  %v3215_v7 = vrot.slane %v3202_v1, %v3214_v63  ;;  %v7260_v1 = vld [vmem:[#allocation10 + $0x1c8] ss:$16 sps:$4 sm:$0xff]  }
 0x309   :  { %4432 = vmatprep.subr.bf16.mxu0 %v7136_v8  ;;  %4475 = vmatprep.subr.bf16.mxu1 %v7139_v9 }
 0x30c   :  { %4433 = vmatpush1.bf16.msra.mxu0 %v7134_v10  ;;  %4476 = vmatpush1.bf16.msra.mxu1 %v7137_v11 }
 0x30d   :  { %4434 = vmatprep.subr.bf16.mxu0 %v7142_v12  ;;  %4477 = vmatprep.subr.bf16.mxu1 %v7145_v13 }
 0x310   :  { %4435 = vmatpush1.bf16.msra.mxu0 %v7140_v14  ;;  %4478 = vmatpush1.bf16.msra.mxu1 %v7143_v15 }
 0x311   :  { %4436 = vmatprep.subr.bf16.mxu0 %v7148_v16  ;;  %4479 = vmatprep.subr.bf16.mxu1 %v7151_v17 }
 0x314   :  { %4437 = vmatpush1.bf16.msra.mxu0 %v7146_v18  ;;  %4480 = vmatpush1.bf16.msra.mxu1 %v7149_v19 }
 0x315   :  { %4438 = vmatprep.subr.bf16.mxu0 %v7154_v20  ;;  %4481 = vmatprep.subr.bf16.mxu1 %v7157_v21 }
 0x318   :  { %4439 = vmatpush1.bf16.msra.mxu0 %v7152_v22  ;;  %4482 = vmatpush1.bf16.msra.mxu1 %v7155_v23  ;;  %v7206_v22 = vld [vmem:[#allocation10 + $0xe8] ss:$16 sps:$4 sm:$0xff]  }
 0x319   :  { %4440 = vmatprep.subr.bf16.mxu0 %v7160_v24  ;;  %4483 = vmatprep.subr.bf16.mxu1 %v7163_v25  ;;  %v7209_v23 = vld [vmem:[#allocation10 + $0x2e8] ss:$16 sps:$4 sm:$0xff]  }
 0x31c   :  { %4441 = vmatpush2.bf16.msra.mxu0 %v7158_v26  ;;  %4484 = vmatpush2.bf16.msra.mxu1 %v7161_v27  ;;  %v7214_v26 = vld [vmem:[#allocation10 + $0xcc] ss:$16 sps:$4 sm:$0xff]  }
 0x31d   :  { %4442 = vmatprep.subr.bf16.mxu0 %v7166_v28  ;;  %4485 = vmatprep.subr.bf16.mxu1 %v7169_v30  ;;  %v7217_v27 = vld [vmem:[#allocation10 + $0x2cc] ss:$16 sps:$4 sm:$0xff]   ;;  %v7212_v28 = vld [vmem:[#allocation10 + $0xc8] ss:$16 sps:$4 sm:$0xff]  }
 0x31e   :  { %v7215_v30 = vld [vmem:[#allocation10 + $0x2c8] ss:$16 sps:$4 sm:$0xff]  }
 0x320   :  { %4443 = vmatpush2.bf16.msra.mxu0 %v7164_v31  ;;  %4486 = vmatpush2.bf16.msra.mxu1 %v7167_v33  ;;  %v7220_v31 = vld [vmem:[#allocation10 + $0xac] ss:$16 sps:$4 sm:$0xff]  }
 0x321   :  { %4444 = vmatprep.subr.bf16.mxu0 %v7172_v35  ;;  %4487 = vmatprep.subr.bf16.mxu1 %v7175_v36  ;;  %v7223_v33 = vld [vmem:[#allocation10 + $0x2ac] ss:$16 sps:$4 sm:$0xff]   ;;  %v7218_v35 = vld [vmem:[#allocation10 + $0xa8] ss:$16 sps:$4 sm:$0xff]  }
 0x322   :  { %v7221_v36 = vld [vmem:[#allocation10 + $0x2a8] ss:$16 sps:$4 sm:$0xff]  }
 0x324   :  { %4445 = vmatpush2.bf16.msra.mxu0 %v7170_v37  ;;  %4488 = vmatpush2.bf16.msra.mxu1 %v7173_v38  ;;  %v7226_v37 = vld [vmem:[#allocation10 + $0x8c] ss:$16 sps:$4 sm:$0xff]  }
 0x325   :  { %4446 = vmatprep.subr.bf16.mxu0 %v7178_v39  ;;  %4489 = vmatprep.subr.bf16.mxu1 %v7181_v40  ;;  %v7229_v38 = vld [vmem:[#allocation10 + $0x28c] ss:$16 sps:$4 sm:$0xff]   ;;  %v7224_v39 = vld [vmem:[#allocation10 + $0x88] ss:$16 sps:$4 sm:$0xff]  }
 0x326   :  { %v7227_v40 = vld [vmem:[#allocation10 + $0x288] ss:$16 sps:$4 sm:$0xff]  }
 0x328   :  { %4447 = vmatpush2.bf16.msra.mxu0 %v7176_v41  ;;  %4490 = vmatpush2.bf16.msra.mxu1 %v7179_v43  ;;  %v7232_v41 = vld [vmem:[#allocation10 + $0x6c] ss:$16 sps:$4 sm:$0xff]  }
 0x329   :  { %4448 = vmatprep.subr.bf16.mxu0 %v7184_v42  ;;  %4491 = vmatprep.subr.bf16.mxu1 %v7187_v44  ;;  %v7235_v43 = vld [vmem:[#allocation10 + $0x26c] ss:$16 sps:$4 sm:$0xff]   ;;  %v7230_v42 = vld [vmem:[#allocation10 + $0x68] ss:$16 sps:$4 sm:$0xff]  }
 0x32a   :  { %v7233_v44 = vld [vmem:[#allocation10 + $0x268] ss:$16 sps:$4 sm:$0xff]  }
 0x32c   :  { %4449 = vmatpush2.bf16.msra.mxu0 %v7182_v45  ;;  %4492 = vmatpush2.bf16.msra.mxu1 %v7185_v46  ;;  %v7238_v45 = vld [vmem:[#allocation10 + $0x4c] ss:$16 sps:$4 sm:$0xff]  }
 0x32d   :  { %4450 = vmatprep.subr.bf16.mxu0 %v7190_v47  ;;  %4493 = vmatprep.subr.bf16.mxu1 %v7193_v48  ;;  %v7241_v46 = vld [vmem:[#allocation10 + $0x24c] ss:$16 sps:$4 sm:$0xff]   ;;  %v7236_v47 = vld [vmem:[#allocation10 + $0x48] ss:$16 sps:$4 sm:$0xff]  }
 0x32e   :  { %v7239_v48 = vld [vmem:[#allocation10 + $0x248] ss:$16 sps:$4 sm:$0xff]  }
 0x330   :  { %4451 = vmatpush2.bf16.msra.mxu0 %v7188_v49  ;;  %4494 = vmatpush2.bf16.msra.mxu1 %v7191_v50  ;;  %v7244_v49 = vld [vmem:[#allocation10 + $0x2c] ss:$16 sps:$4 sm:$0xff]  }
 0x331   :  { %4452 = vmatprep.subr.bf16.mxu0 %v7196_v51  ;;  %4495 = vmatprep.subr.bf16.mxu1 %v7199_v52  ;;  %v7247_v50 = vld [vmem:[#allocation10 + $0x22c] ss:$16 sps:$4 sm:$0xff]   ;;  %v7242_v51 = vld [vmem:[#allocation10 + $0x28] ss:$16 sps:$4 sm:$0xff]  }
 0x332   :  { %v7245_v52 = vld [vmem:[#allocation10 + $0x228] ss:$16 sps:$4 sm:$0xff]  }
 0x334   :  { %4453 = vmatpush2.bf16.msra.mxu0 %v7194_v53  ;;  %4496 = vmatpush2.bf16.msra.mxu1 %v7197_v54  ;;  %v7250_v53 = vld [vmem:[#allocation10 + $0xc] ss:$16 sps:$4 sm:$0xff]  }
 0x335   :  { %4454 = vmatprep.subr.bf16.mxu0 %v7202_v55  ;;  %4497 = vmatprep.subr.bf16.mxu1 %v7205_v56  ;;  %v7253_v54 = vld [vmem:[#allocation10 + $0x20c] ss:$16 sps:$4 sm:$0xff]   ;;  %v7248_v55 = vld [vmem:[#allocation10 + $0x8] ss:$16 sps:$4 sm:$0xff]  }
 0x336   :  { %v7251_v56 = vld [vmem:[#allocation10 + $0x208] ss:$16 sps:$4 sm:$0xff]  }
 0x338   :  { %4455 = vmatpush2.bf16.msra.mxu0 %v7200_v57  ;;  %4498 = vmatpush2.bf16.msra.mxu1 %v7203_v58  ;;  %v7256_v57 = vld [vmem:[#allocation10 + $0x1ec] ss:$16 sps:$4 sm:$0xff]  }
 0x339   :  { %4510 = vmatprep.subr.bf16.mxu0 %v7208_v59  ;;  %4553 = vmatprep.subr.bf16.mxu1 %v7211_v60  ;;  %v7259_v58 = vld [vmem:[#allocation10 + $0x3ec] ss:$16 sps:$4 sm:$0xff]   ;;  %v7254_v59 = vld [vmem:[#allocation10 + $0x1e8] ss:$16 sps:$4 sm:$0xff]  }
 0x33a   :  { %v7257_v60 = vld [vmem:[#allocation10 + $0x3e8] ss:$16 sps:$4 sm:$0xff]  }
 0x3bb   :  { %v3578_v62 = vpop.f32.mrf.mxu0  ;;  %v3621_v0 = vpop.f32.mrf.mxu1 }
 0x3bc   :  { %v3579_v18 = vadd.f32 %v3578_v62, %v3207_v6  ;;  %v3622_v19 = vadd.f32 %v3621_v0, %v3215_v7  ;;  %v7262_v62 = vld [vmem:[#allocation10 + $0x1cc] ss:$16 sps:$4 sm:$0xff]  }
 0x3bd   :  { %v3580_v2 = vpop.f32.mrf.mxu0  ;;  %v3623_v3 = vpop.f32.mrf.mxu1  ;;  %v7265_v0 = vld [vmem:[#allocation10 + $0x3cc] ss:$16 sps:$4 sm:$0xff]  }
 0x3be   :  { %v3581_v14 = vadd.f32 %v3580_v2, %v3211_v4  ;;  %v3624_v15 = vadd.f32 %v3623_v3, %v3219_v5  ;;  %v7263_v2 = vld [vmem:[#allocation10 + $0x3c8] ss:$16 sps:$4 sm:$0xff]   ;;  %v7268_v3 = vld [vmem:[#allocation10 + $0x1ac] ss:$16 sps:$4 sm:$0xff]  }
 0x3bf   :  { %v3582_v8 = vpop.f32.mrf.mxu0  ;;  %v3625_v9 = vpop.f32.mrf.mxu1 }
 0x3c0   :  { %v3583_v10 = vadd.f32 %v3582_v8, %v3207_v6  ;;  %v3626_v11 = vadd.f32 %v3625_v9, %v3215_v7  ;;  %v7269_v6 = vld [vmem:[#allocation10 + $0x3a8] ss:$16 sps:$4 sm:$0xff]   ;;  %v7274_v7 = vld [vmem:[#allocation10 + $0x18c] ss:$16 sps:$4 sm:$0xff]  }
 0x3c1   :  { %v3584_v12 = vpop.f32.mrf.mxu0  ;;  %v3627_v13 = vpop.f32.mrf.mxu1  ;;  %v7277_v8 = vld [vmem:[#allocation10 + $0x38c] ss:$16 sps:$4 sm:$0xff]   ;;  %v7272_v9 = vld [vmem:[#allocation10 + $0x188] ss:$16 sps:$4 sm:$0xff]  }
 0x3c2   :  { %v3585_v16 = vadd.f32 %v3584_v12, %v3211_v4  ;;  %v3628_v17 = vadd.f32 %v3627_v13, %v3219_v5  ;;  %v8104_v24 = vpack.c.bf16 %v3583_v10, %v3579_v18  ;;  %v8106_v25 = vpack.c.bf16 %v3626_v11, %v3622_v19  ;;  %v7271_v4 = vld [vmem:[#allocation10 + $0x3ac] ss:$16 sps:$4 sm:$0xff]   ;;  %v7266_v5 = vld [vmem:[#allocation10 + $0x1a8] ss:$16 sps:$4 sm:$0xff]  }
 0x3c3   :  { %v7275_v10 = vld [vmem:[#allocation10 + $0x388] ss:$16 sps:$4 sm:$0xff]   ;;  %v7280_v11 = vld [vmem:[#allocation10 + $0x16c] ss:$16 sps:$4 sm:$0xff]  }
 0x3c4   :  { %v3631_v20 = vpack.c.bf16 %v3585_v16, %v3581_v14  ;;  %v3633_v21 = vpack.c.bf16 %v3628_v17, %v3624_v15  ;;  %v7283_v12 = vld [vmem:[#allocation10 + $0x36c] ss:$16 sps:$4 sm:$0xff]   ;;  %v7278_v13 = vld [vmem:[#allocation10 + $0x168] ss:$16 sps:$4 sm:$0xff]  }
 0x3c5   :  { %v7281_v14 = vld [vmem:[#allocation10 + $0x368] ss:$16 sps:$4 sm:$0xff]   ;;  %v7286_v15 = vld [vmem:[#allocation10 + $0x14c] ss:$16 sps:$4 sm:$0xff]  }
 0x3c6   :  { %4456 = vmatprep.mubr.bf16.mxu0 %v3631_v20  ;;  %4499 = vmatprep.mubr.bf16.mxu1 %v3633_v21  ;;  %v7289_v16 = vld [vmem:[#allocation10 + $0x34c] ss:$16 sps:$4 sm:$0xff]   ;;  %v7284_v17 = vld [vmem:[#allocation10 + $0x148] ss:$16 sps:$4 sm:$0xff]  }
 0x3c7   :  { %4457 = vmatmul.mubr.bf16.vlgmr.msra.gmra.mxu0 %v8104_v24  ;;  %4500 = vmatmul.mubr.bf16.vlgmr.msra.gmra.mxu1 %v8106_v25  ;;  %v7287_v18 = vld [vmem:[#allocation10 + $0x348] ss:$16 sps:$4 sm:$0xff]   ;;  %v7292_v19 = vld [vmem:[#allocation10 + $0x12c] ss:$16 sps:$4 sm:$0xff]  }
 0x3c8   :  { %4511 = vmatpush1.bf16.msra.mxu0 %v7206_v22  ;;  %4554 = vmatpush1.bf16.msra.mxu1 %v7209_v23  ;;  %v7293_v22 = vld [vmem:[#allocation10 + $0x328] ss:$16 sps:$4 sm:$0xff]   ;;  %v7298_v23 = vld [vmem:[#allocation10 + $0x10c] ss:$16 sps:$4 sm:$0xff]  }
 0x3c9   :  { %4542 = vmatprep.mubr.bf16.mxu0 %v3631_v20  ;;  %4585 = vmatprep.mubr.bf16.mxu1 %v3633_v21  ;;  %v7295_v20 = vld [vmem:[#allocation10 + $0x32c] ss:$16 sps:$4 sm:$0xff]   ;;  %v7290_v21 = vld [vmem:[#allocation10 + $0x128] ss:$16 sps:$4 sm:$0xff]  }
 0x3ca   :  { %4512 = vmatprep.subr.bf16.mxu0 %v7214_v26  ;;  %4555 = vmatprep.subr.bf16.mxu1 %v7217_v27  ;;  %v7301_v26 = vld [vmem:[#allocation10 + $0x30c] ss:$16 sps:$4 sm:$0xff]   ;;  %v7296_v27 = vld [vmem:[#allocation10 + $0x108] ss:$16 sps:$4 sm:$0xff]  }
 0x3cc   :  { %4513 = vmatpush1.bf16.msra.mxu0 %v7212_v28  ;;  %4556 = vmatpush1.bf16.msra.mxu1 %v7215_v30  ;;  %v7299_v28 = vld [vmem:[#allocation10 + $0x308] ss:$16 sps:$4 sm:$0xff]  }
 0x3cd   :  { %4514 = vmatprep.subr.bf16.mxu0 %v7220_v31  ;;  %4557 = vmatprep.subr.bf16.mxu1 %v7223_v33  ;;  %v7304_v30 = vld [vmem:[#allocation13 + $0x74] ss:$8 sps:$4 sm:$0xff]   ;;  %v7302_v31 = vld [vmem:[#allocation13 + $0x70] ss:$8 sps:$4 sm:$0xff]   ;;  %v7307_v33 = vld [vmem:[#allocation13 + $0x64] ss:$8 sps:$4 sm:$0xff]  }
 0x3d0   :  { %4515 = vmatpush1.bf16.msra.mxu0 %v7218_v35  ;;  %4558 = vmatpush1.bf16.msra.mxu1 %v7221_v36  ;;  %v7305_v35 = vld [vmem:[#allocation13 + $0x60] ss:$8 sps:$4 sm:$0xff]   ;;  %v7310_v36 = vld [vmem:[#allocation13 + $0x54] ss:$8 sps:$4 sm:$0xff]  }
 0x3d1   :  { %4516 = vmatprep.subr.bf16.mxu0 %v7226_v37  ;;  %4559 = vmatprep.subr.bf16.mxu1 %v7229_v38  ;;  %v7308_v37 = vld [vmem:[#allocation13 + $0x50] ss:$8 sps:$4 sm:$0xff]   ;;  %v7313_v38 = vld [vmem:[#allocation13 + $0x44] ss:$8 sps:$4 sm:$0xff]  }
 0x3d4   :  { %4517 = vmatpush1.bf16.msra.mxu0 %v7224_v39  ;;  %4560 = vmatpush1.bf16.msra.mxu1 %v7227_v40  ;;  %v7311_v39 = vld [vmem:[#allocation13 + $0x40] ss:$8 sps:$4 sm:$0xff]   ;;  %v7316_v40 = vld [vmem:[#allocation13 + $0x34] ss:$8 sps:$4 sm:$0xff]  }
 0x3d5   :  { %4518 = vmatprep.subr.bf16.mxu0 %v7232_v41  ;;  %4561 = vmatprep.subr.bf16.mxu1 %v7235_v43  ;;  %v7314_v41 = vld [vmem:[#allocation13 + $0x30] ss:$8 sps:$4 sm:$0xff]   ;;  %v7319_v43 = vld [vmem:[#allocation13 + $0x24] ss:$8 sps:$4 sm:$0xff]  }
 0x3d8   :  { %4519 = vmatpush1.bf16.msra.mxu0 %v7230_v42  ;;  %4562 = vmatpush1.bf16.msra.mxu1 %v7233_v44  ;;  %v7352_v42 = vld [vmem:[#allocation13 + $0x174] ss:$8 sps:$4 sm:$0xff]   ;;  %v7317_v44 = vld [vmem:[#allocation13 + $0x20] ss:$8 sps:$4 sm:$0xff]  }
 0x3d9   :  { %4520 = vmatprep.subr.bf16.mxu0 %v7238_v45  ;;  %4563 = vmatprep.subr.bf16.mxu1 %v7241_v46  ;;  %v7353_v45 = vld [vmem:[#allocation13 + $0x160] ss:$8 sps:$4 sm:$0xff]   ;;  %v7322_v46 = vld [vmem:[#allocation13 + $0x14] ss:$8 sps:$4 sm:$0xff]  }
 0x3dc   :  { %4521 = vmatpush1.bf16.msra.mxu0 %v7236_v47  ;;  %4564 = vmatpush1.bf16.msra.mxu1 %v7239_v48  ;;  %v7358_v47 = vld [vmem:[#allocation13 + $0x154] ss:$8 sps:$4 sm:$0xff]   ;;  %v7320_v48 = vld [vmem:[#allocation13 + $0x10] ss:$8 sps:$4 sm:$0xff]  }
 0x3dd   :  { %4522 = vmatprep.subr.bf16.mxu0 %v7244_v49  ;;  %4565 = vmatprep.subr.bf16.mxu1 %v7247_v50  ;;  %v7356_v49 = vld [vmem:[#allocation13 + $0x150] ss:$8 sps:$4 sm:$0xff]   ;;  %v7325_v50 = vld [vmem:[#allocation13 + $0x4] ss:$8 sps:$4 sm:$0xff]  }
 0x3e0   :  { %4523 = vmatpush1.bf16.msra.mxu0 %v7242_v51  ;;  %4566 = vmatpush1.bf16.msra.mxu1 %v7245_v52  ;;  %v7361_v51 = vld [vmem:[#allocation13 + $0x144] ss:$8 sps:$4 sm:$0xff]   ;;  %v7323_v52 = vld [vmem:[#allocation13] ss:$8 sps:$4 sm:$0xff]  }
 0x3e1   :  { %4524 = vmatprep.subr.bf16.mxu0 %v7250_v53  ;;  %4567 = vmatprep.subr.bf16.mxu1 %v7253_v54  ;;  %v7359_v53 = vld [vmem:[#allocation13 + $0x140] ss:$8 sps:$4 sm:$0xff]   ;;  %v7328_v54 = vld [vmem:[#allocation13 + $0xf4] ss:$8 sps:$4 sm:$0xff]  }
 0x3e4   :  { %4525 = vmatpush1.bf16.msra.mxu0 %v7248_v55  ;;  %4568 = vmatpush1.bf16.msra.mxu1 %v7251_v56  ;;  %v7364_v55 = vld [vmem:[#allocation13 + $0x134] ss:$8 sps:$4 sm:$0xff]   ;;  %v7326_v56 = vld [vmem:[#allocation13 + $0xf0] ss:$8 sps:$4 sm:$0xff]  }
 0x3e5   :  { %4526 = vmatprep.subr.bf16.mxu0 %v7256_v57  ;;  %4569 = vmatprep.subr.bf16.mxu1 %v7259_v58  ;;  %v7362_v57 = vld [vmem:[#allocation13 + $0x130] ss:$8 sps:$4 sm:$0xff]   ;;  %v7331_v58 = vld [vmem:[#allocation13 + $0xe4] ss:$8 sps:$4 sm:$0xff]  }
 0x3e8   :  { %4527 = vmatpush2.bf16.msra.mxu0 %v7254_v59  ;;  %4570 = vmatpush2.bf16.msra.mxu1 %v7257_v60  ;;  %v7367_v59 = vld [vmem:[#allocation13 + $0x124] ss:$8 sps:$4 sm:$0xff]   ;;  %v7329_v60 = vld [vmem:[#allocation13 + $0xe0] ss:$8 sps:$4 sm:$0xff]  }
 0x3e9   :  { %4528 = vmatprep.subr.bf16.mxu0 %v7262_v62  ;;  %4571 = vmatprep.subr.bf16.mxu1 %v7265_v0  ;;  %v7365_v62 = vld [vmem:[#allocation13 + $0x120] ss:$8 sps:$4 sm:$0xff]   ;;  %v7334_v0 = vld [vmem:[#allocation13 + $0xd4] ss:$8 sps:$4 sm:$0xff]  }
 0x3ec   :  { %4529 = vmatpush2.bf16.msra.mxu0 %v7260_v1  ;;  %4572 = vmatpush2.bf16.msra.mxu1 %v7263_v2  ;;  %v7370_v1 = vld [vmem:[#allocation13 + $0x114] ss:$8 sps:$4 sm:$0xff]   ;;  %v7332_v2 = vld [vmem:[#allocation13 + $0xd0] ss:$8 sps:$4 sm:$0xff]  }
 0x3ed   :  { %4530 = vmatprep.subr.bf16.mxu0 %v7268_v3  ;;  %4573 = vmatprep.subr.bf16.mxu1 %v7271_v4  ;;  %v7368_v3 = vld [vmem:[#allocation13 + $0x110] ss:$8 sps:$4 sm:$0xff]   ;;  %v7337_v4 = vld [vmem:[#allocation13 + $0xc4] ss:$8 sps:$4 sm:$0xff]  }
 0x3f0   :  { %4531 = vmatpush2.bf16.msra.mxu0 %v7266_v5  ;;  %4574 = vmatpush2.bf16.msra.mxu1 %v7269_v6  ;;  %v7373_v5 = vld [vmem:[#allocation13 + $0x104] ss:$8 sps:$4 sm:$0xff]   ;;  %v7335_v6 = vld [vmem:[#allocation13 + $0xc0] ss:$8 sps:$4 sm:$0xff]  }
 0x3f1   :  { %4532 = vmatprep.subr.bf16.mxu0 %v7274_v7  ;;  %4575 = vmatprep.subr.bf16.mxu1 %v7277_v8  ;;  %v7371_v7 = vld [vmem:[#allocation13 + $0x100] ss:$8 sps:$4 sm:$0xff]   ;;  %v7340_v8 = vld [vmem:[#allocation13 + $0xb4] ss:$8 sps:$4 sm:$0xff]  }
 0x3f4   :  { %4533 = vmatpush2.bf16.msra.mxu0 %v7272_v9  ;;  %4576 = vmatpush2.bf16.msra.mxu1 %v7275_v10  ;;  %v7376_v9 = vld [vmem:[#allocation13 + $0x1f4] ss:$8 sps:$4 sm:$0xff]   ;;  %v7338_v10 = vld [vmem:[#allocation13 + $0xb0] ss:$8 sps:$4 sm:$0xff]  }
 0x3f5   :  { %4534 = vmatprep.subr.bf16.mxu0 %v7280_v11  ;;  %4577 = vmatprep.subr.bf16.mxu1 %v7283_v12  ;;  %v7374_v11 = vld [vmem:[#allocation13 + $0x1f0] ss:$8 sps:$4 sm:$0xff]   ;;  %v7343_v12 = vld [vmem:[#allocation13 + $0xa4] ss:$8 sps:$4 sm:$0xff]  }
 0x3f8   :  { %4535 = vmatpush2.bf16.msra.mxu0 %v7278_v13  ;;  %4578 = vmatpush2.bf16.msra.mxu1 %v7281_v14  ;;  %v7379_v13 = vld [vmem:[#allocation13 + $0x1e4] ss:$8 sps:$4 sm:$0xff]   ;;  %v7341_v14 = vld [vmem:[#allocation13 + $0xa0] ss:$8 sps:$4 sm:$0xff]  }
 0x3f9   :  { %4536 = vmatprep.subr.bf16.mxu0 %v7286_v15  ;;  %4579 = vmatprep.subr.bf16.mxu1 %v7289_v16  ;;  %v7377_v15 = vld [vmem:[#allocation13 + $0x1e0] ss:$8 sps:$4 sm:$0xff]   ;;  %v7346_v16 = vld [vmem:[#allocation13 + $0x94] ss:$8 sps:$4 sm:$0xff]  }
 0x3fc   :  { %4537 = vmatpush2.bf16.msra.mxu0 %v7284_v17  ;;  %4580 = vmatpush2.bf16.msra.mxu1 %v7287_v18  ;;  %v7382_v17 = vld [vmem:[#allocation13 + $0x1d4] ss:$8 sps:$4 sm:$0xff]   ;;  %v7344_v18 = vld [vmem:[#allocation13 + $0x90] ss:$8 sps:$4 sm:$0xff]  }
 0x3fd   :  { %4538 = vmatprep.subr.bf16.mxu0 %v7292_v19  ;;  %4581 = vmatprep.subr.bf16.mxu1 %v7295_v20  ;;  %v7380_v19 = vld [vmem:[#allocation13 + $0x1d0] ss:$8 sps:$4 sm:$0xff]   ;;  %v7349_v20 = vld [vmem:[#allocation13 + $0x84] ss:$8 sps:$4 sm:$0xff]  }
 0x400   :  { %4539 = vmatpush2.bf16.msra.mxu0 %v7290_v21  ;;  %4582 = vmatpush2.bf16.msra.mxu1 %v7293_v22  ;;  %v7385_v21 = vld [vmem:[#allocation13 + $0x1c4] ss:$8 sps:$4 sm:$0xff]   ;;  %v7347_v22 = vld [vmem:[#allocation13 + $0x80] ss:$8 sps:$4 sm:$0xff]  }
 0x401   :  { %4540 = vmatprep.subr.bf16.mxu0 %v7298_v23  ;;  %4583 = vmatprep.subr.bf16.mxu1 %v7301_v26  ;;  %v7383_v23 = vld [vmem:[#allocation13 + $0x1c0] ss:$8 sps:$4 sm:$0xff]   ;;  %v7388_v26 = vld [vmem:[#allocation13 + $0x1b4] ss:$8 sps:$4 sm:$0xff]  }
 0x404   :  { %4541 = vmatpush2.bf16.msra.mxu0 %v7296_v27  ;;  %4584 = vmatpush2.bf16.msra.mxu1 %v7299_v28  ;;  %v7386_v27 = vld [vmem:[#allocation13 + $0x1b0] ss:$8 sps:$4 sm:$0xff]   ;;  %v7391_v28 = vld [vmem:[#allocation13 + $0x1a4] ss:$8 sps:$4 sm:$0xff]  }
 0x405   :  { %5004 = vmatprep.subr.bf16.mxu0 %v7304_v30  ;;  %5047 = vmatprep.subr.bf16.mxu1 %v7352_v42  ;;  %v7389_v30 = vld [vmem:[#allocation13 + $0x1a0] ss:$8 sps:$4 sm:$0xff]  }
 0x407   :  { %4543 = vmatmul.mubr.bf16.vlgmr.msra.gmra.mxu0 %v8104_v24  ;;  %4586 = vmatmul.mubr.bf16.vlgmr.msra.gmra.mxu1 %v8106_v25  ;;  %v7350_v24 = vld [vmem:[#allocation13 + $0x170] ss:$8 sps:$4 sm:$0xff]   ;;  %v7355_v25 = vld [vmem:[#allocation13 + $0x164] ss:$8 sps:$4 sm:$0xff]  }
 0x408   :  { %5005 = vmatpush1.bf16.msra.mxu0 %v7302_v31  ;;  %5048 = vmatpush1.bf16.msra.mxu1 %v7350_v24  ;;  %v7394_v31 = vld [vmem:[#allocation13 + $0x194] ss:$8 sps:$4 sm:$0xff]  }
 0x409   :  { %5006 = vmatprep.subr.bf16.mxu0 %v7307_v33  ;;  %5049 = vmatprep.subr.bf16.mxu1 %v7355_v25  ;;  %v7392_v33 = vld [vmem:[#allocation13 + $0x190] ss:$8 sps:$4 sm:$0xff]  }
 0x40c   :  { %5007 = vmatpush1.bf16.msra.mxu0 %v7305_v35  ;;  %5050 = vmatpush1.bf16.msra.mxu1 %v7353_v45  ;;  %v7397_v35 = vld [vmem:[#allocation13 + $0x184] ss:$8 sps:$4 sm:$0xff]  }
 0x40d   :  { %5008 = vmatprep.subr.bf16.mxu0 %v7310_v36  ;;  %5051 = vmatprep.subr.bf16.mxu1 %v7358_v47  ;;  %v7395_v36 = vld [vmem:[#allocation13 + $0x180] ss:$8 sps:$4 sm:$0xff]  }
 0x410   :  { %5009 = vmatpush1.bf16.msra.mxu0 %v7308_v37  ;;  %5052 = vmatpush1.bf16.msra.mxu1 %v7356_v49  ;;  %v3762_v37 = vld [vmem:[#allocation11] sm:$0xf] }
 0x411   :  { %5010 = vmatprep.subr.bf16.mxu0 %v7313_v38  ;;  %5053 = vmatprep.subr.bf16.mxu1 %v7361_v51  ;;  %v3771_v38 = vrot.slane %v3762_v37, %v8089_v32 }
 0x414   :  { %5011 = vmatpush1.bf16.msra.mxu0 %v7311_v39  ;;  %5054 = vmatpush1.bf16.msra.mxu1 %v7359_v53  ;;  %v3767_v39 = vrot.slane %v3762_v37, %v8092_v34 }
 0x415   :  { %5012 = vmatprep.subr.bf16.mxu0 %v7316_v40  ;;  %5055 = vmatprep.subr.bf16.mxu1 %v7364_v55 }
 0x418   :  { %5013 = vmatpush1.bf16.msra.mxu0 %v7314_v41  ;;  %5056 = vmatpush1.bf16.msra.mxu1 %v7362_v57 }
 0x419   :  { %5014 = vmatprep.subr.bf16.mxu0 %v7319_v43  ;;  %5057 = vmatprep.subr.bf16.mxu1 %v7367_v59 }
 0x41c   :  { %5015 = vmatpush1.bf16.msra.mxu0 %v7317_v44  ;;  %5058 = vmatpush1.bf16.msra.mxu1 %v7365_v62  ;;  %v3775_v62 = vrot.slane %v3762_v37, %v3214_v63 }
 0x41d   :  { %5016 = vmatprep.subr.bf16.mxu0 %v7322_v46  ;;  %5059 = vmatprep.subr.bf16.mxu1 %v7370_v1 }
 0x420   :  { %5017 = vmatpush1.bf16.msra.mxu0 %v7320_v48  ;;  %5060 = vmatpush1.bf16.msra.mxu1 %v7368_v3 }
 0x421   :  { %5018 = vmatprep.subr.bf16.mxu0 %v7325_v50  ;;  %5061 = vmatprep.subr.bf16.mxu1 %v7373_v5 }
 0x424   :  { %5019 = vmatpush1.bf16.msra.mxu0 %v7323_v52  ;;  %5062 = vmatpush1.bf16.msra.mxu1 %v7371_v7 }
 0x425   :  { %5020 = vmatprep.subr.bf16.mxu0 %v7328_v54  ;;  %5063 = vmatprep.subr.bf16.mxu1 %v7376_v9 }
 0x428   :  { %5021 = vmatpush2.bf16.msra.mxu0 %v7326_v56  ;;  %5064 = vmatpush2.bf16.msra.mxu1 %v7374_v11 }
 0x429   :  { %5022 = vmatprep.subr.bf16.mxu0 %v7331_v58  ;;  %5065 = vmatprep.subr.bf16.mxu1 %v7379_v13 }
 0x42c   :  { %5023 = vmatpush2.bf16.msra.mxu0 %v7329_v60  ;;  %5066 = vmatpush2.bf16.msra.mxu1 %v7377_v15  ;;  %v3779_v60 = vrot.slane %v3762_v37, %v3218_v61  ;;  %v7416_v37 = vld [vmem:[#allocation16 + $0x10] ss:$8 sps:$4 sm:$0xff]  }
 0x42d   :  { %5024 = vmatprep.subr.bf16.mxu0 %v7334_v0  ;;  %5067 = vmatprep.subr.bf16.mxu1 %v7382_v17 }
 0x430   :  { %5025 = vmatpush2.bf16.msra.mxu0 %v7332_v2  ;;  %5068 = vmatpush2.bf16.msra.mxu1 %v7380_v19  ;;  %v7398_v19 = vld [vmem:[#allocation16 + $0x70] ss:$8 sps:$4 sm:$0xff]  }
 0x431   :  { %5026 = vmatprep.subr.bf16.mxu0 %v7337_v4  ;;  %5069 = vmatprep.subr.bf16.mxu1 %v7385_v21  ;;  %v7403_v21 = vld [vmem:[#allocation16 + $0x64] ss:$8 sps:$4 sm:$0xff]  }
 0x434   :  { %5027 = vmatpush2.bf16.msra.mxu0 %v7335_v6  ;;  %5070 = vmatpush2.bf16.msra.mxu1 %v7383_v23  ;;  %v7406_v23 = vld [vmem:[#allocation16 + $0x54] ss:$8 sps:$4 sm:$0xff]  }
 0x435   :  { %5028 = vmatprep.subr.bf16.mxu0 %v7340_v8  ;;  %5071 = vmatprep.subr.bf16.mxu1 %v7388_v26  ;;  %v7404_v26 = vld [vmem:[#allocation16 + $0x50] ss:$8 sps:$4 sm:$0xff]  }
 0x438   :  { %5029 = vmatpush2.bf16.msra.mxu0 %v7338_v10  ;;  %5072 = vmatpush2.bf16.msra.mxu1 %v7386_v27  ;;  %v7409_v27 = vld [vmem:[#allocation16 + $0x44] ss:$8 sps:$4 sm:$0xff]  }
 0x439   :  { %5030 = vmatprep.subr.bf16.mxu0 %v7343_v12  ;;  %5073 = vmatprep.subr.bf16.mxu1 %v7391_v28  ;;  %v7407_v28 = vld [vmem:[#allocation16 + $0x40] ss:$8 sps:$4 sm:$0xff]  }
 0x43c   :  { %5031 = vmatpush2.bf16.msra.mxu0 %v7341_v14  ;;  %5074 = vmatpush2.bf16.msra.mxu1 %v7389_v30  ;;  %v7412_v30 = vld [vmem:[#allocation16 + $0x34] ss:$8 sps:$4 sm:$0xff]  }
 0x43d   :  { %5032 = vmatprep.subr.bf16.mxu0 %v7346_v16  ;;  %5075 = vmatprep.subr.bf16.mxu1 %v7394_v31  ;;  %v7410_v31 = vld [vmem:[#allocation16 + $0x30] ss:$8 sps:$4 sm:$0xff]  }
 0x440   :  { %5033 = vmatpush2.bf16.msra.mxu0 %v7344_v18  ;;  %5076 = vmatpush2.bf16.msra.mxu1 %v7392_v33  ;;  %v7415_v33 = vld [vmem:[#allocation16 + $0x24] ss:$8 sps:$4 sm:$0xff]  }
 0x441   :  { %5034 = vmatprep.subr.bf16.mxu0 %v7349_v20  ;;  %5077 = vmatprep.subr.bf16.mxu1 %v7397_v35  ;;  %v7400_v20 = vld [vmem:[#allocation16 + $0x74] ss:$8 sps:$4 sm:$0xff]   ;;  %v7413_v35 = vld [vmem:[#allocation16 + $0x20] ss:$8 sps:$4 sm:$0xff]  }
 0x444   :  { %5035 = vmatpush2.bf16.msra.mxu0 %v7347_v22  ;;  %5078 = vmatpush2.bf16.msra.mxu1 %v7395_v36  ;;  %v7401_v22 = vld [vmem:[#allocation16 + $0x60] ss:$8 sps:$4 sm:$0xff]   ;;  %v7418_v36 = vld [vmem:[#allocation16 + $0x14] ss:$8 sps:$4 sm:$0xff]  }
 0x445   :  { %5300 = vmatprep.subr.bf16.mxu0 %v7400_v20 }
 0x487   :  { %v4458_v40 = vpop.f32.mrf.mxu0  ;;  %v4501_v41 = vpop.f32.mrf.mxu1 }
 0x488   :  { %v4459_v25 = vadd.f32 %v4458_v40, %v3767_v39  ;;  %v7424_v40 = vld [vmem:[#allocation16 + $0xf4] ss:$8 sps:$4 sm:$0xff]  }
 0x489   :  { %v4460_v43 = vpop.f32.mrf.mxu0  ;;  %v4503_v42 = vpop.f32.mrf.mxu1 }
 0x48a   :  { %v4461_v24 = vadd.f32 %v4460_v43, %v3771_v38  ;;  %v4502_v51 = vadd.f32 %v4501_v41, %v4459_v25  ;;  %v7422_v41 = vld [vmem:[#allocation16 + $0xf0] ss:$8 sps:$4 sm:$0xff]   ;;  %v7427_v43 = vld [vmem:[#allocation16 + $0xe4] ss:$8 sps:$4 sm:$0xff]  }
 0x48b   :  { %v4462_v44 = vpop.f32.mrf.mxu0  ;;  %v4505_v45 = vpop.f32.mrf.mxu1  ;;  %v7428_v25 = vld [vmem:[#allocation16 + $0xd0] ss:$8 sps:$4 sm:$0xff]  }
 0x48c   :  { %v4463_v46 = vadd.f32 %v4462_v44, %v3767_v39  ;;  %v4504_v48 = vadd.f32 %v4503_v42, %v4461_v24  ;;  %v4596_v57 = vmax.f32 %v4502_v51, 0.0  ;;  %v7419_v39 = vld [vmem:[#allocation16] ss:$8 sps:$4 sm:$0xff]   ;;  %v7430_v24 = vld [vmem:[#allocation16 + $0xd4] ss:$8 sps:$4 sm:$0xff]  }
 0x48d   :  { %v4464_v47 = vpop.f32.mrf.mxu0  ;;  %v4507_v52 = vpop.f32.mrf.mxu1  ;;  %v7425_v42 = vld [vmem:[#allocation16 + $0xe0] ss:$8 sps:$4 sm:$0xff]   ;;  %v7433_v44 = vld [vmem:[#allocation16 + $0xc4] ss:$8 sps:$4 sm:$0xff]   ;;  %v7440_v51 = vld [vmem:[#allocation16 + $0x90] ss:$8 sps:$4 sm:$0xff]  }
 0x48e   :  { %v4506_v49 = vadd.f32 %v4505_v45, %v4463_v46  ;;  %v4465_v50 = vadd.f32 %v4464_v47, %v3771_v38  ;;  %v4597_v55 = vmax.f32 %v4504_v48, 0.0  ;;  %v7421_v38 = vld [vmem:[#allocation16 + $0x4] ss:$8 sps:$4 sm:$0xff]   ;;  %v7431_v45 = vld [vmem:[#allocation16 + $0xc0] ss:$8 sps:$4 sm:$0xff]  }
 0x48f   :  { %v7436_v46 = vld [vmem:[#allocation16 + $0xb4] ss:$8 sps:$4 sm:$0xff]   ;;  %v7434_v47 = vld [vmem:[#allocation16 + $0xb0] ss:$8 sps:$4 sm:$0xff]   ;;  %v7439_v48 = vld [vmem:[#allocation16 + $0xa4] ss:$8 sps:$4 sm:$0xff]  }
 0x490   :  { %v4508_v53 = vadd.f32 %v4507_v52, %v4465_v50  ;;  %v4600_v54 = vmax.f32 %v4506_v49, 0.0  ;;  %v7437_v49 = vld [vmem:[#allocation16 + $0xa0] ss:$8 sps:$4 sm:$0xff]   ;;  %v7442_v50 = vld [vmem:[#allocation16 + $0x94] ss:$8 sps:$4 sm:$0xff]  }
 0x491   :  { %v7445_v52 = vld [vmem:[#allocation16 + $0x84] ss:$8 sps:$4 sm:$0xff]  }
 0x492   :  { %v4601_v56 = vmax.f32 %v4508_v53, 0.0  ;;  %v4604_v59 = vpack.c.bf16 %v4600_v54, %v4596_v57  ;;  %v7443_v53 = vld [vmem:[#allocation16 + $0x80] ss:$8 sps:$4 sm:$0xff]   ;;  %v7449_v57 = vld [vmem:[#allocation19 + $0x30] sm:$0xff]  }
 0x493   :  { %v7446_v54 = vld [vmem:[#allocation19 + $0x78] sm:$0xff]  }
 0x494   :  { %v4605_v58 = vpack.c.bf16 %v4601_v56, %v4597_v55  ;;  %v7447_v55 = vld [vmem:[#allocation19 + $0x38] sm:$0xff]   ;;  %v7448_v56 = vld [vmem:[#allocation19 + $0x70] sm:$0xff]   ;;  %6364 = vmatprep.subr.bf16.mxu1 %v7446_v54 }
 0x495   :  { %v7467_v54 = vld [vmem:[#allocation22 + $0x10] sm:$0xff]  }
 0x496   :  { %5036 = vmatprep.mubr.bf16.mxu0 %v4605_v58  ;;  %v7450_v58 = vld [vmem:[#allocation19 + $0x68] sm:$0xff]  }
 0x497   :  { %5037 = vmatmul.mubr.bf16.vlgmr.msra.gmra.mxu0 %v4604_v59  ;;  %v7451_v59 = vld [vmem:[#allocation19 + $0x28] sm:$0xff]  }
 0x498   :  { %5301 = vmatpush1.bf16.msra.mxu0 %v7398_v19 }
 0x499   :  { %5302 = vmatprep.subr.bf16.mxu0 %v7403_v21 }
 0x49c   :  { %5303 = vmatpush1.bf16.msra.mxu0 %v7401_v22 }
 0x49d   :  { %5304 = vmatprep.subr.bf16.mxu0 %v7406_v23 }
 0x4a0   :  { %5305 = vmatpush1.bf16.msra.mxu0 %v7404_v26  ;;  %v7456_v26 = vld [vmem:[#allocation19 + $0x50] sm:$0xff]  }
 0x4a1   :  { %5306 = vmatprep.subr.bf16.mxu0 %v7409_v27  ;;  %v7457_v27 = vld [vmem:[#allocation19 + $0x10] sm:$0xff]  }
 0x4a4   :  { %5307 = vmatpush1.bf16.msra.mxu0 %v7407_v28  ;;  %v7458_v28 = vld [vmem:[#allocation19 + $0x48] sm:$0xff]  }
 0x4a5   :  { %5308 = vmatprep.subr.bf16.mxu0 %v7412_v30  ;;  %v7459_v30 = vld [vmem:[#allocation19 + $0x8] sm:$0xff]  }
 0x4a8   :  { %5309 = vmatpush1.bf16.msra.mxu0 %v7410_v31  ;;  %v7460_v31 = vld [vmem:[#allocation19 + $0x40] sm:$0xff]  }
 0x4a9   :  { %5310 = vmatprep.subr.bf16.mxu0 %v7415_v33  ;;  %v7461_v33 = vld [vmem:[#allocation19] sm:$0xff]  }
 0x4ac   :  { %5311 = vmatpush1.bf16.msra.mxu0 %v7413_v35  ;;  %v7808_v35 = vmov 0.0  }
 0x4ad   :  { %5312 = vmatprep.subr.bf16.mxu0 %v7418_v36  ;;  %v5128_v36 = vld [vmem:[#allocation17] sm:$0x3] }
 0x4b0   :  { %5313 = vmatpush1.bf16.msra.mxu0 %v7416_v37 }
 0x4b1   :  { %5314 = vmatprep.subr.bf16.mxu0 %v7421_v38  ;;  %v5137_v38 = vrot.slane %v5128_v36, %v8089_v32 }
 0x4b4   :  { %5315 = vmatpush1.bf16.msra.mxu0 %v7419_v39  ;;  %v5133_v39 = vrot.slane %v5128_v36, %v8092_v34 }
 0x4b5   :  { %5316 = vmatprep.subr.bf16.mxu0 %v7424_v40 }
 0x4b8   :  { %5317 = vmatpush2.bf16.msra.mxu0 %v7422_v41 }
 0x4b9   :  { %5318 = vmatprep.subr.bf16.mxu0 %v7427_v43 }
 0x4bc   :  { %5319 = vmatpush2.bf16.msra.mxu0 %v7425_v42 }
 0x4bd   :  { %5320 = vmatprep.subr.bf16.mxu0 %v7430_v24 }
 0x4c0   :  { %5321 = vmatpush2.bf16.msra.mxu0 %v7428_v25 }
 0x4c1   :  { %5322 = vmatprep.subr.bf16.mxu0 %v7433_v44 }
 0x4c4   :  { %5323 = vmatpush2.bf16.msra.mxu0 %v7431_v45 }
 0x4c5   :  { %5324 = vmatprep.subr.bf16.mxu0 %v7436_v46 }
 0x4c7   :  { %v4544_v0 = vpop.f32.mrf.mxu0  ;;  %v4587_v1 = vpop.f32.mrf.mxu1 }
 0x4c8   :  { %v4545_v5 = vadd.f32 %v4544_v0, %v3775_v62  ;;  %5325 = vmatpush2.bf16.msra.mxu0 %v7434_v47  ;;  %v7454_v0 = vld [vmem:[#allocation19 + $0x58] sm:$0xff]  }
 0x4c9   :  { %v4546_v2 = vpop.f32.mrf.mxu0  ;;  %v4589_v3 = vpop.f32.mrf.mxu1  ;;  %5326 = vmatprep.subr.bf16.mxu0 %v7439_v48 }
 0x4ca   :  { %v4547_v4 = vadd.f32 %v4546_v2, %v3779_v60  ;;  %v4588_v13 = vadd.f32 %v4587_v1, %v4545_v5  ;;  %v7455_v1 = vld [vmem:[#allocation19 + $0x18] sm:$0xff]  }
 0x4cb   :  { %v4548_v6 = vpop.f32.mrf.mxu0  ;;  %v4591_v7 = vpop.f32.mrf.mxu1 }
 0x4cc   :  { %v4549_v8 = vadd.f32 %v4548_v6, %v3775_v62  ;;  %v4590_v10 = vadd.f32 %v4589_v3, %v4547_v4  ;;  %v4598_v63 = vmax.f32 %v4588_v13, 0.0  ;;  %5327 = vmatpush2.bf16.msra.mxu0 %v7437_v49  ;;  %v7453_v62 = vld [vmem:[#allocation19 + $0x20] sm:$0xff]   ;;  %v4672_v4 = vld [vmem:[#allocation14] sm:$0x3] }
 0x4cd   :  { %v4550_v9 = vpop.f32.mrf.mxu0  ;;  %v4593_v14 = vpop.f32.mrf.mxu1  ;;  %5328 = vmatprep.subr.bf16.mxu0 %v7442_v50  ;;  %v4681_v6 = vrot.slane %v4672_v4, %v8089_v32  ;;  %v7462_v50 = vld [vmem:[#allocation22 + $0x38] sm:$0xff]   ;;  %v7463_v32 = vld [vmem:[#allocation22 + $0x30] sm:$0xff]  }
 0x4ce   :  { %v4592_v11 = vadd.f32 %v4591_v7, %v4549_v8  ;;  %v4551_v12 = vadd.f32 %v4550_v9, %v3779_v60  ;;  %v4599_v16 = vmax.f32 %v4590_v10, 0.0  ;;  %v7452_v60 = vld [vmem:[#allocation19 + $0x60] sm:$0xff]   ;;  %v4677_v7 = vrot.slane %v4672_v4, %v8092_v34  ;;  %v7464_v34 = vld [vmem:[#allocation22 + $0x28] sm:$0xff]  }
 0x4d0   :  { %v4594_v15 = vadd.f32 %v4593_v14, %v4551_v12  ;;  %v4602_v61 = vmax.f32 %v4592_v11, 0.0  ;;  %5329 = vmatpush2.bf16.msra.mxu0 %v7440_v51 }
 0x4d1   :  { %5330 = vmatprep.subr.bf16.mxu0 %v7445_v52  ;;  %v7465_v52 = vld [vmem:[#allocation22 + $0x20] sm:$0xff]  }
 0x4d2   :  { %v4603_v29 = vmax.f32 %v4594_v15, 0.0  ;;  %v4606_v18 = vpack.c.bf16 %v4602_v61, %v4598_v63 }
 0x4d4   :  { %v4607_v17 = vpack.c.bf16 %v4603_v29, %v4599_v16  ;;  %5331 = vmatpush2.bf16.msra.mxu0 %v7443_v53  ;;  %v7466_v53 = vld [vmem:[#allocation22 + $0x18] sm:$0xff]  }
 0x4d6   :  { %5079 = vmatprep.mubr.bf16.mxu1 %v4607_v17 }
 0x4d7   :  { %5080 = vmatmul.mubr.bf16.vlgmr.msra.gmra.mxu1 %v4606_v18 }
 0x4d8   :  { %6365 = vmatpush3.bf16.msra.mxu1 %v7447_v55  ;;  %v7468_v55 = vld [vmem:[#allocation22 + $0x8] sm:$0xff]  }
 0x4d9   :  { %6366 = vmatprep.subr.bf16.mxu1 %v7448_v56  ;;  %v7469_v56 = vld [vmem:[#allocation22] sm:$0xff]  }
 0x4dc   :  { %6367 = vmatpush3.bf16.msra.mxu1 %v7449_v57 }
 0x4dd   :  { %6368 = vmatprep.subr.bf16.mxu1 %v7450_v58 }
 0x4e0   :  { %6369 = vmatpush3.bf16.msra.mxu1 %v7451_v59 }
 0x4e1   :  { %6370 = vmatprep.subr.bf16.mxu1 %v7452_v60  ;;  %v6338_v60 = vld [vmem:[#allocation20] ss:$0 sm:$0xff] }
 0x4e4   :  { %6371 = vmatpush3.bf16.msra.mxu1 %v7453_v62 }
 0x4e5   :  { %6372 = vmatprep.subr.bf16.mxu1 %v7454_v0 }
 0x4e8   :  { %6373 = vmatpush3.bf16.msra.mxu1 %v7455_v1 }
 0x4e9   :  { %6374 = vmatprep.subr.bf16.mxu1 %v7456_v26 }
 0x4ec   :  { %6375 = vmatpush3.bf16.msra.mxu1 %v7457_v27 }
 0x4ed   :  { %6376 = vmatprep.subr.bf16.mxu1 %v7458_v28 }
 0x4f0   :  { %6377 = vmatpush3.bf16.msra.mxu1 %v7459_v30 }
 0x4f1   :  { %6378 = vmatprep.subr.bf16.mxu1 %v7460_v31 }
 0x4f4   :  { %6379 = vmatpush3.bf16.msra.mxu1 %v7461_v33 }
 0x4f5   :  { %6395 = vmatprep.subr.bf16.mxu1 %v7808_v35 }
 0x557   :  { %v5038_v2 = vpop.f32.mrf.mxu0 }
 0x558   :  { %v5039_v13 = vadd.f32 %v5038_v2, %v4677_v7 }
 0x559   :  { %v5040_v3 = vpop.f32.mrf.mxu0 }
 0x55a   :  { %v5041_v11 = vadd.f32 %v5040_v3, %v4681_v6 }
 0x55b   :  { %v5042_v5 = vpop.f32.mrf.mxu0 }
 0x55c   :  { %v5043_v12 = vadd.f32 %v5042_v5, %v4677_v7  ;;  %v6355_v7 = vld [vmem:[#allocation23] ss:$0 sm:$0xff] }
 0x55d   :  { %v5044_v9 = vpop.f32.mrf.mxu0 }
 0x55e   :  { %v5045_v15 = vadd.f32 %v5044_v9, %v4681_v6 }
 0x597   :  { %v5081_v8 = vpop.f32.mrf.mxu1 }
 0x598   :  { %v5082_v29 = vadd.f32 %v5081_v8, %v5039_v13 }
 0x599   :  { %v5083_v10 = vpop.f32.mrf.mxu1 }
 0x59a   :  { %v5084_v61 = vadd.f32 %v5083_v10, %v5041_v11  ;;  %v5090_v21 = vmax.f32 %v5082_v29, 0.0 }
 0x59b   :  { %v5085_v14 = vpop.f32.mrf.mxu1 }
 0x59c   :  { %v5086_v16 = vadd.f32 %v5085_v14, %v5043_v12  ;;  %v5091_v19 = vmax.f32 %v5084_v61, 0.0 }
 0x59d   :  { %v5087_v63 = vpop.f32.mrf.mxu1 }
 0x59e   :  { %v5088_v17 = vadd.f32 %v5087_v63, %v5045_v15  ;;  %v5092_v18 = vmax.f32 %v5086_v16, 0.0 }
 0x5a0   :  { %v5093_v20 = vmax.f32 %v5088_v17, 0.0  ;;  %v5094_v23 = vpack.c.bf16 %v5092_v18, %v5090_v21 }
 0x5a2   :  { %v5095_v22 = vpack.c.bf16 %v5093_v20, %v5091_v19 }
 0x5a4   :  { %5332 = vmatprep.mubr.bf16.mxu0 %v5095_v22 }
 0x5a5   :  { %5333 = vmatmul.mubr.bf16.vlgmr.msra.gmra.mxu0 %v5094_v23 }
 0x665   :  { %v5334_v37 = vpop.f32.mrf.mxu0 }
 0x666   :  { %v5335_v24 = vadd.f32 %v5334_v37, %v5133_v39 }
 0x667   :  { %v5336_v40 = vpop.f32.mrf.mxu0 }
 0x668   :  { %v5337_v43 = vadd.f32 %v5336_v40, %v5137_v38  ;;  %v5343_v48 = vmax.f32 %v5335_v24, 0.0 }
 0x669   :  { %v5338_v41 = vpop.f32.mrf.mxu0 }
 0x66a   :  { %v5339_v42 = vadd.f32 %v5338_v41, %v5133_v39  ;;  %v5344_v46 = vmax.f32 %v5337_v43, 0.0 }
 0x66b   :  { %v5340_v25 = vpop.f32.mrf.mxu0 }
 0x66c   :  { %v5341_v44 = vadd.f32 %v5340_v25, %v5137_v38  ;;  %v5345_v45 = vmax.f32 %v5339_v42, 0.0 }
 0x66e   :  { %v5346_v47 = vmax.f32 %v5341_v44, 0.0  ;;  %v5347_v51 = vpack.c.bf16 %v5345_v45, %v5343_v48 }
 0x670   :  { %v5348_v49 = vpack.c.bf16 %v5346_v47, %v5344_v46 }
 0x672   :  { %5516 = vmatprep.mubr.bf16.mxu1 %v5348_v49 }
 0x673   :  { %5517 = vmatmul.mubr.bf16.vlgmr.msra.gmra.mxu1 %v5347_v51 }
 0x674   :  { %6396 = vmatpush3.bf16.msra.mxu1 %v7462_v50  ;;  %6411 = vmatprep.mubr.msk.bf16.mxu1 %vm7809_vm0, %v7808_v35 }
 0x675   :  { %6397 = vmatprep.subr.bf16.mxu1 %v7808_v35 }
 0x678   :  { %6398 = vmatpush3.bf16.msra.mxu1 %v7463_v32 }
 0x679   :  { %6399 = vmatprep.subr.bf16.mxu1 %v7808_v35 }
 0x67c   :  { %6400 = vmatpush3.bf16.msra.mxu1 %v7464_v34 }
 0x67d   :  { %6401 = vmatprep.subr.bf16.mxu1 %v7808_v35 }
 0x680   :  { %6402 = vmatpush3.bf16.msra.mxu1 %v7465_v52 }
 0x681   :  { %6403 = vmatprep.subr.bf16.mxu1 %v7808_v35 }
 0x684   :  { %6404 = vmatpush3.bf16.msra.mxu1 %v7466_v53 }
 0x685   :  { %6405 = vmatprep.subr.bf16.mxu1 %v7808_v35 }
 0x688   :  { %6406 = vmatpush3.bf16.msra.mxu1 %v7467_v54 }
 0x689   :  { %6407 = vmatprep.subr.bf16.mxu1 %v7808_v35 }
 0x68c   :  { %6408 = vmatpush3.bf16.msra.mxu1 %v7468_v55 }
 0x68d   :  { %6409 = vmatprep.subr.bf16.mxu1 %v7808_v35 }
 0x690   :  { %6410 = vmatpush3.bf16.msra.mxu1 %v7469_v56 }
 0x733   :  { %v6380_v57 = vpop.f32.mrf.mxu1 }
 0x735   :  { %v6381_v58 = vpop.f32.mrf.mxu1 }
 0x736   :  { %v6382_v59 = vadd.f32 %v6381_v58, %v6380_v57 }
 0x737   :  { %v6383_v62 = vpop.f32.mrf.mxu1 }
 0x738   :  { %v5519_v1 = vadd.f32 %v6382_v59, %v6338_v60 }
 0x739   :  { %v6384_v0 = vpop.f32.mrf.mxu1 }
 0x73a   :  { %v6385_v2 = vadd.f32 %v6384_v0, %v6383_v62  ;;  %v5525_v4 = vmax.f32 %v5519_v1, 0.0 }
 0x73c   :  { %v5522_v3 = vadd.f32 %v6385_v2, %v6338_v60 }
 0x73e   :  { %v5526_v5 = vmax.f32 %v5522_v3, 0.0 }
 0x740   :  { %v5527_v6 = vpack.c.bf16 %v5526_v5, %v5525_v4 }
 0x742   :  { %6412 = vmatmul.mubr.bf16.vlgmr.msra.gmra.mxu1 %v5527_v6 }
 0x802   :  { %v5633_v8 = vpop.f32.mrf.mxu1 }
 0x803   :  { %v5634_v9 = vadd.f32 %v6355_v7, %v5633_v8 }
 0x804   :  { %v6413_v10 = vpop.f32.mrf.mxu1 }
 0x805   :  { %5640 = vst [vmem:[#allocation25] sm:$0xff] %v5634_v9 }
 0x806   :  { %v5636_v11 = vpop.f32.mrf.mxu1 }
 0x807   :  { %v5637_v12 = vadd.f32 %v6355_v7, %v5636_v11 }
 0x808   :  { %v6414_v13 = vpop.f32.mrf.mxu1 }
 0x809   :  { %5641 = vst [vmem:[#allocation25 + $0x8] sm:$0xff] %v5637_v12 }
 0x80a   :  { %7761 = shalt.err (!%p7758_p4)
}
 0x80b   :  { %5653 = dma.vmem_to_hbm [thread:$0]  %s5648_s23, 256, %s8143_s15, [#allocation4], %s7795_s10, %s7795_s10, %s7796_s2  }
 0x80c   :  { %7786 = dma.done.wait [#allocation4], 256  }
 0x80d   :  { %7787 = vsyncadd [#allocation4], 4294967040 }
 0x80e   :  { %5657 = vsyncpa [#allocation3], 1 }
 0x80f   :  { %5658 = vsyncpa [#allocation6], 1 }
 0x810   :  { %5659 = vsyncpa [#allocation9], 1 }
 0x811   :  { %5660 = vsyncpa [#allocation12], 1 }
 0x812   :  { %5661 = vsyncpa [#allocation15], 1 }
 0x813   :  { %5662 = vsyncpa [#allocation18], 1 }
 0x814   :  { %5663 = vsyncpa [#allocation21], 1 }
 0x815   :  { %5664 = vsyncpa [#allocation24], 1 }
 0x816   :  { %5665 = vsyncpa [#allocation4], 1 }

</bundles_post_ra>
